<compile_context>
chip_gen: v7x
topology: tpu7x:2x2x1
jax: 0.10.0
libtpu: 0.0.40
codegen_flags: <defaults>
</compile_context>

<pallas_src>
import functools

import jax
import jax.numpy as jnp
import numpy as np
from jax.experimental import pallas as pl
from jax.experimental.pallas import tpu as pltpu

# ----------------------------- model hyper-params (small, synthetic) ----------
BATCH = 2
IN_CH = 3
IMG = 32                             # H = W = 32
PATCH = 8                            # 4x4 grid of patches
GRID = IMG // PATCH                  # 4
NUM_PATCHES = GRID * GRID            # 16
CPP = IN_CH * PATCH * PATCH          # 192 (im2col row length of patch embed)
HIDDEN = 32
NUM_HEADS = 2
HEAD_DIM = HIDDEN // NUM_HEADS
MLP_DIM = 64
DEPTH = 2
NUM_KEYPOINTS = 4
UP_SCALE = 4
OH = GRID * UP_SCALE                 # 16
OW = GRID * UP_SCALE                 # 16
LN_EPS = 1e-6


# ----------------------------- Pallas kernels --------------------------------
def _encoder_kernel(x_ref, pos_ref, pw_ref, pb_ref,
                    ln1g_ref, ln1b_ref, qkvw_ref, qkvb_ref,
                    projw_ref, projb_ref, ln2g_ref, ln2b_ref,
                    fc1w_ref, fc1b_ref, fc2w_ref, fc2b_ref,
                    lnfg_ref, lnfb_ref, o_ref,
                    *, depth, num_heads, head_dim, ln_eps):
    """Whole ViT encoder (+ final LN + head ReLU) for one image.

    Grid axis = batch, marked "parallel" (megacore sharding on v7x)."""

    def layernorm(x, g, b):
        # f32 elementwise math on the VPU (also correct on v5e: no bf16 VPU).
        mu = jnp.mean(x, axis=-1, keepdims=True)
        var = jnp.mean(jnp.square(x - mu), axis=-1, keepdims=True)
        return (x - mu) * jax.lax.rsqrt(var + ln_eps) * g + b

    def mm(x, w, bias):
        # bf16 MXU operands, f32 accumulation.
        return jnp.dot(x.astype(jnp.bfloat16), w,
                       preferred_element_type=jnp.float32) + bias

    P, D = pos_ref.shape
    scale = 1.0 / float(np.sqrt(head_dim))

    # ---- patch embedding (+ position embedding) ----
    tokens = mm(x_ref[0], pw_ref[...], pb_ref[...]) + pos_ref[...]      # (P, D) f32

    # ---- transformer encoder (static unroll, DEPTH is small) ----
    for d in range(depth):
        # multi-head self attention
        x2 = layernorm(tokens, ln1g_ref[d], ln1b_ref[d])
        qkv = mm(x2, qkvw_ref[d], qkvb_ref[d])                          # (P, 3D)
        heads = []
        for h in range(num_heads):            # per-head clean 2-D MXU dots
            q = qkv[:, h * head_dim:(h + 1) * head_dim]
            k = qkv[:, D + h * head_dim:D + (h + 1) * head_dim]
            v = qkv[:, 2 * D + h * head_dim:2 * D + (h + 1) * head_dim]
            s = jax.lax.dot_general(
                q.astype(jnp.bfloat16), k.astype(jnp.bfloat16),
                (((1,), (1,)), ((), ())),
                preferred_element_type=jnp.float32) * scale             # (P, P)
            s = s - jnp.max(s, axis=-1, keepdims=True)
            p = jnp.exp(s)
            p = p * pl.reciprocal(jnp.sum(p, axis=-1, keepdims=True), approx=True)
            heads.append(jnp.dot(p.astype(jnp.bfloat16), v.astype(jnp.bfloat16),
                                 preferred_element_type=jnp.float32))
        attn = jnp.concatenate(heads, axis=-1)                          # (P, D)
        tokens = tokens + mm(attn, projw_ref[d], projb_ref[d])

        # MLP
        x2 = layernorm(tokens, ln2g_ref[d], ln2b_ref[d])
        # TODO(synk): HF ViT uses exact (erf) GELU; tanh approximation used here.
        h1 = jax.nn.gelu(mm(x2, fc1w_ref[d], fc1b_ref[d]), approximate=True)
        tokens = tokens + mm(h1, fc2w_ref[d], fc2b_ref[d])

    # final LN + decoder-head ReLU; output bf16 (it is only an MXU operand later).
    feat = jnp.maximum(layernorm(tokens, lnfg_ref[...], lnfb_ref[...]), 0.0)
    o_ref[0] = feat.astype(o_ref.dtype)


def _decoder_kernel(feat_ref, w_ref, b_ref, o_ref):
    """Folded decoder: (bilinear upsample x4 then 3x3 conv) as ONE lane-dense
    matmul.  Output last dim = K*OH*OW = 1024 (multiple of 128 -> unmasked vst)."""
    heat = jnp.dot(feat_ref[...], w_ref[...], preferred_element_type=jnp.float32)
    o_ref[...] = (heat + b_ref[...]).astype(o_ref.dtype)


# ----------------------------- pallas_call wrappers ---------------------------
def _replicated_spec(shape):
    zeros = (0,) * len(shape)
    return pl.BlockSpec(shape, lambda b, _z=zeros: _z)


@jax.jit
def vitpose_forward(pixel_values, fused):
    """pixel_values: (B, C, H, W) NCHW float32 -> heatmaps (B, K, H', W')."""
    B, C, H, W = pixel_values.shape
    gh, gw = H // PATCH, W // PATCH
    P = gh * gw
    cpp = C * PATCH * PATCH

    # patch-embed im2col (pure one-off layout op on the input, done in wrapper).
    # bf16: it is only ever an MXU operand inside the kernel -> halves the DMA.
    x = pixel_values.reshape(B, C, gh, PATCH, gw, PATCH)
    x = x.transpose(0, 2, 4, 1, 3, 5).reshape(B, P, cpp).astype(jnp.bfloat16)

    enc_weights = (fused["pos"], fused["patch_w"], fused["patch_b"],
                   fused["ln1_g"], fused["ln1_b"], fused["qkv_w"], fused["qkv_b"],
                   fused["proj_w"], fused["proj_b"], fused["ln2_g"], fused["ln2_b"],
                   fused["fc1_w"], fused["fc1_b"], fused["fc2_w"], fused["fc2_b"],
                   fused["lnf_g"], fused["lnf_b"])

    enc_kernel = functools.partial(
        _encoder_kernel, depth=DEPTH, num_heads=NUM_HEADS,
        head_dim=HEAD_DIM, ln_eps=LN_EPS)

    feat = pl.pallas_call(
        enc_kernel,
        out_shape=jax.ShapeDtypeStruct((B, P, HIDDEN), jnp.bfloat16),
        grid=(B,),
        in_specs=[pl.BlockSpec((1, P, cpp), lambda b: (b, 0, 0))]
                 + [_replicated_spec(w.shape) for w in enc_weights],
        out_specs=pl.BlockSpec((1, P, HIDDEN), lambda b: (b, 0, 0)),
        compiler_params=pltpu.CompilerParams(
            dimension_semantics=("parallel",)),   # v7x: shard batch over 2 TCs
    )(x, *enc_weights)

    # Decoder: single lane-dense matmul over the folded (upsample o conv3x3) matrix.
    feat = feat.reshape(B, P * HIDDEN)            # contiguous reshape (free in XLA)
    n_out = NUM_KEYPOINTS * OH * OW
    heat = pl.pallas_call(
        _decoder_kernel,
        out_shape=jax.ShapeDtypeStruct((B, n_out), jnp.float32),
        grid=(1,),
        in_specs=[_replicated_spec((B, P * HIDDEN)),
                  _replicated_spec(fused["dec_w"].shape),
                  _replicated_spec(fused["dec_b"].shape)],
        out_specs=_replicated_spec((B, n_out)),
    )(feat, fused["dec_w"], fused["dec_b"])

    return heat.reshape(B, NUM_KEYPOINTS, OH, OW)


# ----------------------------- weights / decoder fold -------------------------
def bilinear_matrix(in_size, out_size):
    """Row i holds the interpolation weights for output pixel i
    (matches torch nn.Upsample(mode='bilinear', align_corners=False))."""
    scale = in_size / out_size
    m = np.zeros((out_size, in_size), dtype=np.float32)
    for i in range(out_size):
        src = (i + 0.5) * scale - 0.5
        src = min(max(src, 0.0), in_size - 1)
        lo = int(np.floor(src))
        hi = min(lo + 1, in_size - 1)
        frac = src - lo
        m[i, lo] += 1.0 - frac
        m[i, hi] += frac
    return jnp.asarray(m)


def build_decoder_matrix(head_w, head_b, uh, uw):
    """Fold ( bilinear upsample x4 ) o ( 3x3 conv, pad=1 ) into one matrix.

    Input index  : (h, w, d) flattened as p*HIDDEN + d  (p = h*GRID + w) of the
                   ReLU'd token/feature map.
    Output index : (k, i, j) flattened as k*OH*OW + i*OW + j of the heatmaps.
    """
    head_w = np.asarray(head_w, np.float64)                  # (HIDDEN*9, K), rows (d, kh, kw)
    head_b = np.asarray(head_b, np.float32)
    uh = np.asarray(uh, np.float64)                          # (OH, GRID)
    uw = np.asarray(uw, np.float64)                          # (OW, GRID)
    K = head_w.shape[1]

    w_conv = head_w.reshape(HIDDEN, 3, 3, K)                 # [d, kh, kw, k]
    # zero-padded upsample matrices: row r corresponds to padded spatial index r.
    uh_pad = np.zeros((OH + 2, GRID)); uh_pad[1:OH + 1] = uh
    uw_pad = np.zeros((OW + 2, GRID)); uw_pad[1:OW + 1] = uw
    # uh3[a, i, h] = uh_pad[i + a, h]  (tap a, output row i, source row h)
    uh3 = np.stack([uh_pad[a:a + OH] for a in range(3)], axis=0)   # (3, OH, GRID)
    uw3 = np.stack([uw_pad[b:b + OW] for b in range(3)], axis=0)   # (3, OW, GRID)

    # M[h, w, d, k, i, j] = sum_{a,b} w_conv[d,a,b,k] * uh3[a,i,h] * uw3[b,j,w]
    m = np.einsum("dabk,aih,bjw->hwdkij", w_conv, uh3, uw3)
    dec_w = m.reshape(NUM_PATCHES * HIDDEN, K * OH * OW).astype(np.float32)
    dec_b = np.repeat(head_b, OH * OW).reshape(1, K * OH * OW).astype(np.float32)
    return jnp.asarray(dec_w), jnp.asarray(dec_b)


def init_params(key):
    def nrm(k, shape, std=0.02):
        return (jax.random.normal(k, shape, jnp.float32) * std).astype(jnp.float32)

    keys = jax.random.split(key, 8 + DEPTH)
    params = {
        "patch_w": nrm(keys[0], (CPP, HIDDEN)),
        "patch_b": jnp.zeros((HIDDEN,), jnp.float32),
        "pos_embed": nrm(keys[1], (1, NUM_PATCHES, HIDDEN)),
        "ln_f_g": jnp.ones((HIDDEN,), jnp.float32),
        "ln_f_b": jnp.zeros((HIDDEN,), jnp.float32),
        "head_w": nrm(keys[2], (HIDDEN * 9, NUM_KEYPOINTS)),
        "head_b": jnp.zeros((NUM_KEYPOINTS,), jnp.float32),
        "uh": bilinear_matrix(GRID, OH),
        "uw": bilinear_matrix(GRID, OW),
        "blocks": [],
    }
    for d in range(DEPTH):
        bk = jax.random.split(keys[8 + d], 4)
        params["blocks"].append({
            "ln1_g": jnp.ones((HIDDEN,), jnp.float32),
            "ln1_b": jnp.zeros((HIDDEN,), jnp.float32),
            "qkv_w": nrm(bk[0], (HIDDEN, 3 * HIDDEN)),
            "qkv_b": jnp.zeros((3 * HIDDEN,), jnp.float32),
            "proj_w": nrm(bk[1], (HIDDEN, HIDDEN)),
            "proj_b": jnp.zeros((HIDDEN,), jnp.float32),
            "ln2_g": jnp.ones((HIDDEN,), jnp.float32),
            "ln2_b": jnp.zeros((HIDDEN,), jnp.float32),
            "fc1_w": nrm(bk[2], (HIDDEN, MLP_DIM)),
            "fc1_b": jnp.zeros((MLP_DIM,), jnp.float32),
            "fc2_w": nrm(bk[3], (MLP_DIM, HIDDEN)),
            "fc2_b": jnp.zeros((HIDDEN,), jnp.float32),
        })
    return params


def prepare_fused(params):
    """Stack per-block weights along a DEPTH axis, cast matmul weights to bf16,
    and fold the decoder (upsample + 3x3 conv) into one matrix."""
    bf16 = jnp.bfloat16
    blocks = params["blocks"]

    def stack_w(name):
        return jnp.stack([blk[name] for blk in blocks], axis=0).astype(bf16)

    def stack_b(name, cols):
        return jnp.stack([blk[name] for blk in blocks], axis=0).reshape(DEPTH, 1, cols)

    fused = {
        "pos": params["pos_embed"].reshape(NUM_PATCHES, HIDDEN),
        "patch_w": params["patch_w"].astype(bf16),
        "patch_b": params["patch_b"].reshape(1, HIDDEN),
        "ln1_g": stack_b("ln1_g", HIDDEN), "ln1_b": stack_b("ln1_b", HIDDEN),
        "qkv_w": stack_w("qkv_w"), "qkv_b": stack_b("qkv_b", 3 * HIDDEN),
        "proj_w": stack_w("proj_w"), "proj_b": stack_b("proj_b", HIDDEN),
        "ln2_g": stack_b("ln2_g", HIDDEN), "ln2_b": stack_b("ln2_b", HIDDEN),
        "fc1_w": stack_w("fc1_w"), "fc1_b": stack_b("fc1_b", MLP_DIM),
        "fc2_w": stack_w("fc2_w"), "fc2_b": stack_b("fc2_b", HIDDEN),
        "lnf_g": params["ln_f_g"].reshape(1, HIDDEN),
        "lnf_b": params["ln_f_b"].reshape(1, HIDDEN),
    }
    dec_w, dec_b = build_decoder_matrix(params["head_w"], params["head_b"],
                                        params["uh"], params["uw"])
    fused["dec_w"] = dec_w.astype(bf16)
    fused["dec_b"] = dec_b
    return fused


# ----------------------------- pure-JAX f32 reference (unfused) ---------------
def reference_forward(pixel_values, params):
    B, C, H, W = pixel_values.shape
    gh, gw = H // PATCH, W // PATCH
    P = gh * gw

    def ln(x, g, b):
        mu = jnp.mean(x, axis=-1, keepdims=True)
        var = jnp.mean((x - mu) ** 2, axis=-1, keepdims=True)
        return (x - mu) * jax.lax.rsqrt(var + LN_EPS) * g + b

    x = pixel_values.reshape(B, C, gh, PATCH, gw, PATCH)
    x = x.transpose(0, 2, 4, 1, 3, 5).reshape(B * P, C * PATCH * PATCH)
    tokens = (x @ params["patch_w"] + params["patch_b"]).reshape(B, P, HIDDEN)
    tokens = tokens + params["pos_embed"]

    for blk in params["blocks"]:
        x2 = ln(tokens, blk["ln1_g"], blk["ln1_b"])
        qkv = x2 @ blk["qkv_w"] + blk["qkv_b"]
        qkv = qkv.reshape(B, P, 3, NUM_HEADS, HEAD_DIM).transpose(2, 0, 3, 1, 4)
        q, k, v = qkv[0], qkv[1], qkv[2]
        s = jnp.einsum("bhqd,bhkd->bhqk", q, k) / np.sqrt(HEAD_DIM)
        p = jax.nn.softmax(s, axis=-1)
        attn = jnp.einsum("bhqk,bhkd->bhqd", p, v)
        attn = attn.transpose(0, 2, 1, 3).reshape(B, P, HIDDEN)
        tokens = tokens + (attn @ blk["proj_w"] + blk["proj_b"])
        x2 = ln(tokens, blk["ln2_g"], blk["ln2_b"])
        h = jax.nn.gelu(x2 @ blk["fc1_w"] + blk["fc1_b"], approximate=True)
        tokens = tokens + (h @ blk["fc2_w"] + blk["fc2_b"])

    tokens = ln(tokens, params["ln_f_g"], params["ln_f_b"])
    feat = jnp.maximum(tokens.transpose(0, 2, 1).reshape(B, HIDDEN, gh, gw), 0.0)
    up = jnp.einsum("bdhw,ih->bdiw", feat, params["uh"])
    up = jnp.einsum("bdiw,jw->bdij", up, params["uw"])
    oh, ow = gh * UP_SCALE, gw * UP_SCALE
    padded = jnp.pad(up, ((0, 0), (0, 0), (1, 1), (1, 1)))
    patches = jnp.stack(
        [padded[:, :, a:a + oh, b:b + ow] for a in range(3) for b in range(3)],
        axis=2)                                                  # (B, D, 9, oh, ow)
    patches = patches.transpose(0, 3, 4, 1, 2).reshape(B * oh * ow, HIDDEN * 9)
    heat = patches @ params["head_w"] + params["head_b"]
    return heat.reshape(B, oh, ow, NUM_KEYPOINTS).transpose(0, 3, 1, 2)


# ----------------------------- main -------------------------------------------
if __name__ == "__main__":
    key = jax.random.PRNGKey(0)
    k_params, k_input = jax.random.split(key)
    params = init_params(k_params)
    fused = prepare_fused(params)
    pixel_values = jax.random.normal(k_input, (BATCH, IN_CH, IMG, IMG), jnp.float32)

    heatmaps = jax.block_until_ready(vitpose_forward(pixel_values, fused))

    expected = (BATCH, NUM_KEYPOINTS, OH, OW)
    assert heatmaps.shape == expected, (heatmaps.shape, expected)
    assert bool(jnp.all(jnp.isfinite(heatmaps)))

    # Numerical sanity check against the unfused pure-JAX f32 reference
    # (Pallas path uses bf16 matmul operands -> loose tolerance).
    ref = jax.block_until_ready(jax.jit(reference_forward)(pixel_values, params))
    np.testing.assert_allclose(np.asarray(heatmaps), np.asarray(ref),
                               rtol=5e-2, atol=5e-2)
    print("KERNEL_OK")
</pallas_src>

<mosaic_0001>
module attributes {stable_mosaic.version = 11 : i64} {
  func.func @_decoder_kernel(%arg0: i32, %arg1: memref<2x512xbf16, #tpu.memory_space<vmem>>, %arg2: memref<512x1024xbf16, #tpu.memory_space<vmem>>, %arg3: memref<1x1024xf32, #tpu.memory_space<vmem>>, %arg4: memref<2x1024xf32, #tpu.memory_space<vmem>>) attributes {dimension_semantics = [#tpu.dimension_semantics<arbitrary>], iteration_bounds = array<i64: 1>, scalar_prefetch = 0 : i64, scratch_operands = 0 : i64, tpu.core_type = #tpu.core_type<tc>, window_params = [{pipeline_mode = #tpu.pipeline_mode<synchronous>, transform_indices = @transform_0, window_bounds = array<i64: 2, 512>}, {pipeline_mode = #tpu.pipeline_mode<synchronous>, transform_indices = @transform_1, window_bounds = array<i64: 512, 1024>}, {pipeline_mode = #tpu.pipeline_mode<synchronous>, transform_indices = @transform_2, window_bounds = array<i64: 1, 1024>}, {pipeline_mode = #tpu.pipeline_mode<synchronous>, transform_indices = @transform_3, window_bounds = array<i64: 2, 1024>}]} {
    %c0 = arith.constant 0 : index
    %c0_0 = arith.constant 0 : index
    %0 = vector.load %arg1[%c0, %c0_0] : memref<2x512xbf16, #tpu.memory_space<vmem>>, vector<2x512xbf16>
    %c0_1 = arith.constant 0 : index
    %c0_2 = arith.constant 0 : index
    %1 = vector.load %arg2[%c0_1, %c0_2] : memref<512x1024xbf16, #tpu.memory_space<vmem>>, vector<512x1024xbf16>
    %cst = arith.constant dense<0.000000e+00> : vector<2x1024xf32>
    %2 = tpu.matmul %0, %1, %cst {dimension_numbers = #tpu.dot_dimension_numbers<[1], [0], [0], [1], [0, 0, 1, 1], [], []>} : vector<2x512xbf16>, vector<512x1024xbf16>, vector<2x1024xf32> -> vector<2x1024xf32>
    %c0_3 = arith.constant 0 : index
    %c0_4 = arith.constant 0 : index
    %3 = vector.load %arg3[%c0_3, %c0_4] : memref<1x1024xf32, #tpu.memory_space<vmem>>, vector<1x1024xf32>
    %4 = vector.broadcast %3 : vector<1x1024xf32> to vector<2x1024xf32>
    %5 = arith.addf %2, %4 : vector<2x1024xf32>
    %c0_5 = arith.constant 0 : index
    %c0_6 = arith.constant 0 : index
    %6 = vector.load %arg4[%c0_5, %c0_6] : memref<2x1024xf32, #tpu.memory_space<vmem>>, vector<2x1024xf32>
    tpu.vector_store %arg4[%c0_5, %c0_6], %5 {strides = array<i32>} : memref<2x1024xf32, #tpu.memory_space<vmem>>, vector<2x1024xf32>,
    return
  }
  func.func @transform_0(%arg0: i32) -> (i32, i32) {
    %c0_i32 = arith.constant 0 : i32
    %c0_i32_0 = arith.constant 0 : i32
    %c0_i32_1 = arith.constant 0 : i32
    return %c0_i32, %c0_i32_0 : i32, i32
  }
  func.func @transform_1(%arg0: i32) -> (i32, i32) {
    %c0_i32 = arith.constant 0 : i32
    %c0_i32_0 = arith.constant 0 : i32
    %c0_i32_1 = arith.constant 0 : i32
    return %c0_i32, %c0_i32_0 : i32, i32
  }
  func.func @transform_2(%arg0: i32) -> (i32, i32) {
    %c0_i32 = arith.constant 0 : i32
    %c0_i32_0 = arith.constant 0 : i32
    %c0_i32_1 = arith.constant 0 : i32
    return %c0_i32, %c0_i32_0 : i32, i32
  }
  func.func @transform_3(%arg0: i32) -> (i32, i32) {
    %c0_i32 = arith.constant 0 : i32
    %c0_i32_0 = arith.constant 0 : i32
    %c0_i32_1 = arith.constant 0 : i32
    return %c0_i32, %c0_i32_0 : i32, i32
  }
}

module attributes {stable_mosaic.version = 11 : i64} {
  func.func @_encoder_kernel(%arg0: i32, %arg1: memref<1x16x192xbf16, #tpu.memory_space<vmem>>, %arg2: memref<16x32xf32, #tpu.memory_space<vmem>>, %arg3: memref<192x32xbf16, #tpu.memory_space<vmem>>, %arg4: memref<1x32xf32, #tpu.memory_space<vmem>>, %arg5: memref<2x1x32xf32, #tpu.memory_space<vmem>>, %arg6: memref<2x1x32xf32, #tpu.memory_space<vmem>>, %arg7: memref<2x32x96xbf16, #tpu.memory_space<vmem>>, %arg8: memref<2x1x96xf32, #tpu.memory_space<vmem>>, %arg9: memref<2x32x32xbf16, #tpu.memory_space<vmem>>, %arg10: memref<2x1x32xf32, #tpu.memory_space<vmem>>, %arg11: memref<2x1x32xf32, #tpu.memory_space<vmem>>, %arg12: memref<2x1x32xf32, #tpu.memory_space<vmem>>, %arg13: memref<2x32x64xbf16, #tpu.memory_space<vmem>>, %arg14: memref<2x1x64xf32, #tpu.memory_space<vmem>>, %arg15: memref<2x64x32xbf16, #tpu.memory_space<vmem>>, %arg16: memref<2x1x32xf32, #tpu.memory_space<vmem>>, %arg17: memref<1x32xf32, #tpu.memory_space<vmem>>, %arg18: memref<1x32xf32, #tpu.memory_space<vmem>>, %arg19: memref<1x16x32xbf16, #tpu.memory_space<vmem>>) attributes {dimension_semantics = [#tpu.dimension_semantics<parallel>], iteration_bounds = array<i64: 2>, scalar_prefetch = 0 : i64, scratch_operands = 0 : i64, tpu.core_type = #tpu.core_type<tc>, window_params = [{transform_indices = @transform_0, window_bounds = array<i64: 1, 16, 192>}, {pipeline_mode = #tpu.pipeline_mode<synchronous>, transform_indices = @transform_1, window_bounds = array<i64: 16, 32>}, {pipeline_mode = #tpu.pipeline_mode<synchronous>, transform_indices = @transform_2, window_bounds = array<i64: 192, 32>}, {pipeline_mode = #tpu.pipeline_mode<synchronous>, transform_indices = @transform_3, window_bounds = array<i64: 1, 32>}, {pipeline_mode = #tpu.pipeline_mode<synchronous>, transform_indices = @transform_4, window_bounds = array<i64: 2, 1, 32>}, {pipeline_mode = #tpu.pipeline_mode<synchronous>, transform_indices = @transform_5, window_bounds = array<i64: 2, 1, 32>}, {pipeline_mode = #tpu.pipeline_mode<synchronous>, transform_indices = @transform_6, window_bounds = array<i64: 2, 32, 96>}, {pipeline_mode = #tpu.pipeline_mode<synchronous>, transform_indices = @transform_7, window_bounds = array<i64: 2, 1, 96>}, {pipeline_mode = #tpu.pipeline_mode<synchronous>, transform_indices = @transform_8, window_bounds = array<i64: 2, 32, 32>}, {pipeline_mode = #tpu.pipeline_mode<synchronous>, transform_indices = @transform_9, window_bounds = array<i64: 2, 1, 32>}, {pipeline_mode = #tpu.pipeline_mode<synchronous>, transform_indices = @transform_10, window_bounds = array<i64: 2, 1, 32>}, {pipeline_mode = #tpu.pipeline_mode<synchronous>, transform_indices = @transform_11, window_bounds = array<i64: 2, 1, 32>}, {pipeline_mode = #tpu.pipeline_mode<synchronous>, transform_indices = @transform_12, window_bounds = array<i64: 2, 32, 64>}, {pipeline_mode = #tpu.pipeline_mode<synchronous>, transform_indices = @transform_13, window_bounds = array<i64: 2, 1, 64>}, {pipeline_mode = #tpu.pipeline_mode<synchronous>, transform_indices = @transform_14, window_bounds = array<i64: 2, 64, 32>}, {pipeline_mode = #tpu.pipeline_mode<synchronous>, transform_indices = @transform_15, window_bounds = array<i64: 2, 1, 32>}, {pipeline_mode = #tpu.pipeline_mode<synchronous>, transform_indices = @transform_16, window_bounds = array<i64: 1, 32>}, {pipeline_mode = #tpu.pipeline_mode<synchronous>, transform_indices = @transform_17, window_bounds = array<i64: 1, 32>}, {transform_indices = @transform_18, window_bounds = array<i64: 1, 16, 32>}]} {
    %c0 = arith.constant 0 : index
    %c0_0 = arith.constant 0 : index
    %c0_1 = arith.constant 0 : index
    %0 = vector.load %arg1[%c0, %c0_0, %c0_1] : memref<1x16x192xbf16, #tpu.memory_space<vmem>>, vector<1x16x192xbf16>
    %1 = vector.shape_cast %0 : vector<1x16x192xbf16> to vector<16x192xbf16>
    %c0_2 = arith.constant 0 : index
    %c0_3 = arith.constant 0 : index
    %2 = vector.load %arg3[%c0_2, %c0_3] : memref<192x32xbf16, #tpu.memory_space<vmem>>, vector<192x32xbf16>
    %c0_4 = arith.constant 0 : index
    %c0_5 = arith.constant 0 : index
    %3 = vector.load %arg4[%c0_4, %c0_5] : memref<1x32xf32, #tpu.memory_space<vmem>>, vector<1x32xf32>
    %cst = arith.constant dense<0.000000e+00> : vector<16x32xf32>
    %4 = tpu.matmul %1, %2, %cst {dimension_numbers = #tpu.dot_dimension_numbers<[1], [0], [0], [1], [0, 0, 1, 1], [], []>} : vector<16x192xbf16>, vector<192x32xbf16>, vector<16x32xf32> -> vector<16x32xf32>
    %5 = vector.broadcast %3 : vector<1x32xf32> to vector<16x32xf32>
    %6 = arith.addf %4, %5 : vector<16x32xf32>
    %c0_6 = arith.constant 0 : index
    %c0_7 = arith.constant 0 : index
    %7 = vector.load %arg2[%c0_6, %c0_7] : memref<16x32xf32, #tpu.memory_space<vmem>>, vector<16x32xf32>
    %8 = arith.addf %6, %7 : vector<16x32xf32>
    %c0_8 = arith.constant 0 : index
    %c0_9 = arith.constant 0 : index
    %c0_10 = arith.constant 0 : index
    %9 = vector.load %arg5[%c0_8, %c0_9, %c0_10] : memref<2x1x32xf32, #tpu.memory_space<vmem>>, vector<1x1x32xf32>
    %10 = vector.shape_cast %9 : vector<1x1x32xf32> to vector<1x32xf32>
    %c0_11 = arith.constant 0 : index
    %c0_12 = arith.constant 0 : index
    %c0_13 = arith.constant 0 : index
    %11 = vector.load %arg6[%c0_11, %c0_12, %c0_13] : memref<2x1x32xf32, #tpu.memory_space<vmem>>, vector<1x1x32xf32>
    %12 = vector.shape_cast %11 : vector<1x1x32xf32> to vector<1x32xf32>
    %cst_14 = arith.constant dense<0.000000e+00> : vector<16xf32>
    %13 = vector.multi_reduction <add>, %8, %cst_14 [1] : vector<16x32xf32> to vector<16xf32>
    %14 = vector.shape_cast %13 : vector<16xf32> to vector<16x1xf32>
    %cst_15 = arith.constant 3.200000e+01 : f32
    %15 = vector.broadcast %cst_15 : f32 to vector<16x1xf32>
    %16 = arith.divf %14, %15 : vector<16x1xf32>
    %17 = vector.broadcast %16 : vector<16x1xf32> to vector<16x32xf32>
    %18 = arith.subf %8, %17 : vector<16x32xf32>
    %19 = arith.mulf %18, %18 : vector<16x32xf32>
    %cst_16 = arith.constant dense<0.000000e+00> : vector<16xf32>
    %20 = vector.multi_reduction <add>, %19, %cst_16 [1] : vector<16x32xf32> to vector<16xf32>
    %21 = vector.shape_cast %20 : vector<16xf32> to vector<16x1xf32>
    %cst_17 = arith.constant 3.200000e+01 : f32
    %22 = vector.broadcast %cst_17 : f32 to vector<16x1xf32>
    %23 = arith.divf %21, %22 : vector<16x1xf32>
    %24 = vector.broadcast %16 : vector<16x1xf32> to vector<16x32xf32>
    %25 = arith.subf %8, %24 : vector<16x32xf32>
    %cst_18 = arith.constant 9.99999997E-7 : f32
    %26 = vector.broadcast %cst_18 : f32 to vector<16x1xf32>
    %27 = arith.addf %23, %26 : vector<16x1xf32>
    %28 = math.rsqrt %27 : vector<16x1xf32>
    %29 = vector.broadcast %28 : vector<16x1xf32> to vector<16x32xf32>
    %30 = arith.mulf %25, %29 : vector<16x32xf32>
    %31 = vector.broadcast %10 : vector<1x32xf32> to vector<16x32xf32>
    %32 = arith.mulf %30, %31 : vector<16x32xf32>
    %33 = vector.broadcast %12 : vector<1x32xf32> to vector<16x32xf32>
    %34 = arith.addf %32, %33 : vector<16x32xf32>
    %c0_19 = arith.constant 0 : index
    %c0_20 = arith.constant 0 : index
    %c0_21 = arith.constant 0 : index
    %35 = vector.load %arg7[%c0_19, %c0_20, %c0_21] : memref<2x32x96xbf16, #tpu.memory_space<vmem>>, vector<1x32x96xbf16>
    %36 = vector.shape_cast %35 : vector<1x32x96xbf16> to vector<32x96xbf16>
    %c0_22 = arith.constant 0 : index
    %c0_23 = arith.constant 0 : index
    %c0_24 = arith.constant 0 : index
    %37 = vector.load %arg8[%c0_22, %c0_23, %c0_24] : memref<2x1x96xf32, #tpu.memory_space<vmem>>, vector<1x1x96xf32>
    %38 = vector.shape_cast %37 : vector<1x1x96xf32> to vector<1x96xf32>
    %39 = arith.truncf %34 : vector<16x32xf32> to vector<16x32xbf16>
    %cst_25 = arith.constant dense<0.000000e+00> : vector<16x96xf32>
    %40 = tpu.matmul %39, %36, %cst_25 {dimension_numbers = #tpu.dot_dimension_numbers<[1], [0], [0], [1], [0, 0, 1, 1], [], []>} : vector<16x32xbf16>, vector<32x96xbf16>, vector<16x96xf32> -> vector<16x96xf32>
    %41 = vector.broadcast %38 : vector<1x96xf32> to vector<16x96xf32>
    %42 = arith.addf %40, %41 : vector<16x96xf32>
    %43 = vector.extract_strided_slice %42 {offsets = [0, 0], sizes = [16, 16], strides = [1, 1]} : vector<16x96xf32> to vector<16x16xf32>
    %44 = vector.extract_strided_slice %42 {offsets = [0, 32], sizes = [16, 16], strides = [1, 1]} : vector<16x96xf32> to vector<16x16xf32>
    %45 = vector.extract_strided_slice %42 {offsets = [0, 64], sizes = [16, 16], strides = [1, 1]} : vector<16x96xf32> to vector<16x16xf32>
    %46 = arith.truncf %43 : vector<16x16xf32> to vector<16x16xbf16>
    %47 = arith.truncf %44 : vector<16x16xf32> to vector<16x16xbf16>
    %cst_26 = arith.constant dense<0.000000e+00> : vector<16x16xf32>
    %48 = tpu.matmul %46, %47, %cst_26 {dimension_numbers = #tpu.dot_dimension_numbers<[1], [1], [0], [0], [0, 0, 1, 0], [], []>} : vector<16x16xbf16>, vector<16x16xbf16>, vector<16x16xf32> -> vector<16x16xf32>
    %cst_27 = arith.constant 2.500000e-01 : f32
    %49 = vector.broadcast %cst_27 : f32 to vector<16x16xf32>
    %50 = arith.mulf %48, %49 : vector<16x16xf32>
    %cst_28 = arith.constant dense<0xFF800000> : vector<16xf32>
    %51 = vector.multi_reduction <maximumf>, %50, %cst_28 [1] : vector<16x16xf32> to vector<16xf32>
    %52 = vector.shape_cast %51 : vector<16xf32> to vector<16x1xf32>
    %53 = vector.broadcast %52 : vector<16x1xf32> to vector<16x16xf32>
    %54 = arith.subf %50, %53 : vector<16x16xf32>
    %55 = math.exp %54 : vector<16x16xf32>
    %cst_29 = arith.constant dense<0.000000e+00> : vector<16xf32>
    %56 = vector.multi_reduction <add>, %55, %cst_29 [1] : vector<16x16xf32> to vector<16xf32>
    %57 = vector.shape_cast %56 : vector<16xf32> to vector<16x1xf32>
    %58 = tpu.reciprocal %57 {approx = true} : vector<16x1xf32> -> vector<16x1xf32>
    %59 = vector.broadcast %58 : vector<16x1xf32> to vector<16x16xf32>
    %60 = arith.mulf %55, %59 : vector<16x16xf32>
    %61 = arith.truncf %60 : vector<16x16xf32> to vector<16x16xbf16>
    %62 = arith.truncf %45 : vector<16x16xf32> to vector<16x16xbf16>
    %cst_30 = arith.constant dense<0.000000e+00> : vector<16x16xf32>
    %63 = tpu.matmul %61, %62, %cst_30 {dimension_numbers = #tpu.dot_dimension_numbers<[1], [0], [0], [1], [0, 0, 1, 1], [], []>} : vector<16x16xbf16>, vector<16x16xbf16>, vector<16x16xf32> -> vector<16x16xf32>
    %64 = vector.extract_strided_slice %42 {offsets = [0, 16], sizes = [16, 16], strides = [1, 1]} : vector<16x96xf32> to vector<16x16xf32>
    %65 = vector.extract_strided_slice %42 {offsets = [0, 48], sizes = [16, 16], strides = [1, 1]} : vector<16x96xf32> to vector<16x16xf32>
    %66 = vector.extract_strided_slice %42 {offsets = [0, 80], sizes = [16, 16], strides = [1, 1]} : vector<16x96xf32> to vector<16x16xf32>
    %67 = arith.truncf %64 : vector<16x16xf32> to vector<16x16xbf16>
    %68 = arith.truncf %65 : vector<16x16xf32> to vector<16x16xbf16>
    %cst_31 = arith.constant dense<0.000000e+00> : vector<16x16xf32>
    %69 = tpu.matmul %67, %68, %cst_31 {dimension_numbers = #tpu.dot_dimension_numbers<[1], [1], [0], [0], [0, 0, 1, 0], [], []>} : vector<16x16xbf16>, vector<16x16xbf16>, vector<16x16xf32> -> vector<16x16xf32>
    %cst_32 = arith.constant 2.500000e-01 : f32
    %70 = vector.broadcast %cst_32 : f32 to vector<16x16xf32>
    %71 = arith.mulf %69, %70 : vector<16x16xf32>
    %cst_33 = arith.constant dense<0xFF800000> : vector<16xf32>
    %72 = vector.multi_reduction <maximumf>, %71, %cst_33 [1] : vector<16x16xf32> to vector<16xf32>
    %73 = vector.shape_cast %72 : vector<16xf32> to vector<16x1xf32>
    %74 = vector.broadcast %73 : vector<16x1xf32> to vector<16x16xf32>
    %75 = arith.subf %71, %74 : vector<16x16xf32>
    %76 = math.exp %75 : vector<16x16xf32>
    %cst_34 = arith.constant dense<0.000000e+00> : vector<16xf32>
    %77 = vector.multi_reduction <add>, %76, %cst_34 [1] : vector<16x16xf32> to vector<16xf32>
    %78 = vector.shape_cast %77 : vector<16xf32> to vector<16x1xf32>
    %79 = tpu.reciprocal %78 {approx = true} : vector<16x1xf32> -> vector<16x1xf32>
    %80 = vector.broadcast %79 : vector<16x1xf32> to vector<16x16xf32>
    %81 = arith.mulf %76, %80 : vector<16x16xf32>
    %82 = arith.truncf %81 : vector<16x16xf32> to vector<16x16xbf16>
    %83 = arith.truncf %66 : vector<16x16xf32> to vector<16x16xbf16>
    %cst_35 = arith.constant dense<0.000000e+00> : vector<16x16xf32>
    %84 = tpu.matmul %82, %83, %cst_35 {dimension_numbers = #tpu.dot_dimension_numbers<[1], [0], [0], [1], [0, 0, 1, 1], [], []>} : vector<16x16xbf16>, vector<16x16xbf16>, vector<16x16xf32> -> vector<16x16xf32>
    %85 = tpu.concatenate %63, %84 in 1 : vector<16x16xf32>, vector<16x16xf32> -> vector<16x32xf32>
    %c0_36 = arith.constant 0 : index
    %c0_37 = arith.constant 0 : index
    %c0_38 = arith.constant 0 : index
    %86 = vector.load %arg9[%c0_36, %c0_37, %c0_38] : memref<2x32x32xbf16, #tpu.memory_space<vmem>>, vector<1x32x32xbf16>
    %87 = vector.shape_cast %86 : vector<1x32x32xbf16> to vector<32x32xbf16>
    %c0_39 = arith.constant 0 : index
    %c0_40 = arith.constant 0 : index
    %c0_41 = arith.constant 0 : index
    %88 = vector.load %arg10[%c0_39, %c0_40, %c0_41] : memref<2x1x32xf32, #tpu.memory_space<vmem>>, vector<1x1x32xf32>
    %89 = vector.shape_cast %88 : vector<1x1x32xf32> to vector<1x32xf32>
    %90 = arith.truncf %85 : vector<16x32xf32> to vector<16x32xbf16>
    %cst_42 = arith.constant dense<0.000000e+00> : vector<16x32xf32>
    %91 = tpu.matmul %90, %87, %cst_42 {dimension_numbers = #tpu.dot_dimension_numbers<[1], [0], [0], [1], [0, 0, 1, 1], [], []>} : vector<16x32xbf16>, vector<32x32xbf16>, vector<16x32xf32> -> vector<16x32xf32>
    %92 = vector.broadcast %89 : vector<1x32xf32> to vector<16x32xf32>
    %93 = arith.addf %91, %92 : vector<16x32xf32>
    %94 = arith.addf %8, %93 : vector<16x32xf32>
    %c0_43 = arith.constant 0 : index
    %c0_44 = arith.constant 0 : index
    %c0_45 = arith.constant 0 : index
    %95 = vector.load %arg11[%c0_43, %c0_44, %c0_45] : memref<2x1x32xf32, #tpu.memory_space<vmem>>, vector<1x1x32xf32>
    %96 = vector.shape_cast %95 : vector<1x1x32xf32> to vector<1x32xf32>
    %c0_46 = arith.constant 0 : index
    %c0_47 = arith.constant 0 : index
    %c0_48 = arith.constant 0 : index
    %97 = vector.load %arg12[%c0_46, %c0_47, %c0_48] : memref<2x1x32xf32, #tpu.memory_space<vmem>>, vector<1x1x32xf32>
    %98 = vector.shape_cast %97 : vector<1x1x32xf32> to vector<1x32xf32>
    %cst_49 = arith.constant dense<0.000000e+00> : vector<16xf32>
    %99 = vector.multi_reduction <add>, %94, %cst_49 [1] : vector<16x32xf32> to vector<16xf32>
    %100 = vector.shape_cast %99 : vector<16xf32> to vector<16x1xf32>
    %cst_50 = arith.constant 3.200000e+01 : f32
    %101 = vector.broadcast %cst_50 : f32 to vector<16x1xf32>
    %102 = arith.divf %100, %101 : vector<16x1xf32>
    %103 = vector.broadcast %102 : vector<16x1xf32> to vector<16x32xf32>
    %104 = arith.subf %94, %103 : vector<16x32xf32>
    %105 = arith.mulf %104, %104 : vector<16x32xf32>
    %cst_51 = arith.constant dense<0.000000e+00> : vector<16xf32>
    %106 = vector.multi_reduction <add>, %105, %cst_51 [1] : vector<16x32xf32> to vector<16xf32>
    %107 = vector.shape_cast %106 : vector<16xf32> to vector<16x1xf32>
    %cst_52 = arith.constant 3.200000e+01 : f32
    %108 = vector.broadcast %cst_52 : f32 to vector<16x1xf32>
    %109 = arith.divf %107, %108 : vector<16x1xf32>
    %110 = vector.broadcast %102 : vector<16x1xf32> to vector<16x32xf32>
    %111 = arith.subf %94, %110 : vector<16x32xf32>
    %cst_53 = arith.constant 9.99999997E-7 : f32
    %112 = vector.broadcast %cst_53 : f32 to vector<16x1xf32>
    %113 = arith.addf %109, %112 : vector<16x1xf32>
    %114 = math.rsqrt %113 : vector<16x1xf32>
    %115 = vector.broadcast %114 : vector<16x1xf32> to vector<16x32xf32>
    %116 = arith.mulf %111, %115 : vector<16x32xf32>
    %117 = vector.broadcast %96 : vector<1x32xf32> to vector<16x32xf32>
    %118 = arith.mulf %116, %117 : vector<16x32xf32>
    %119 = vector.broadcast %98 : vector<1x32xf32> to vector<16x32xf32>
    %120 = arith.addf %118, %119 : vector<16x32xf32>
    %c0_54 = arith.constant 0 : index
    %c0_55 = arith.constant 0 : index
    %c0_56 = arith.constant 0 : index
    %121 = vector.load %arg13[%c0_54, %c0_55, %c0_56] : memref<2x32x64xbf16, #tpu.memory_space<vmem>>, vector<1x32x64xbf16>
    %122 = vector.shape_cast %121 : vector<1x32x64xbf16> to vector<32x64xbf16>
    %c0_57 = arith.constant 0 : index
    %c0_58 = arith.constant 0 : index
    %c0_59 = arith.constant 0 : index
    %123 = vector.load %arg14[%c0_57, %c0_58, %c0_59] : memref<2x1x64xf32, #tpu.memory_space<vmem>>, vector<1x1x64xf32>
    %124 = vector.shape_cast %123 : vector<1x1x64xf32> to vector<1x64xf32>
    %125 = arith.truncf %120 : vector<16x32xf32> to vector<16x32xbf16>
    %cst_60 = arith.constant dense<0.000000e+00> : vector<16x64xf32>
    %126 = tpu.matmul %125, %122, %cst_60 {dimension_numbers = #tpu.dot_dimension_numbers<[1], [0], [0], [1], [0, 0, 1, 1], [], []>} : vector<16x32xbf16>, vector<32x64xbf16>, vector<16x64xf32> -> vector<16x64xf32>
    %127 = vector.broadcast %124 : vector<1x64xf32> to vector<16x64xf32>
    %128 = arith.addf %126, %127 : vector<16x64xf32>
    %129 = arith.mulf %128, %128 : vector<16x64xf32>
    %130 = arith.mulf %128, %129 : vector<16x64xf32>
    %cst_61 = arith.constant 4.471500e-02 : f32
    %131 = vector.broadcast %cst_61 : f32 to vector<16x64xf32>
    %132 = arith.mulf %131, %130 : vector<16x64xf32>
    %133 = arith.addf %128, %132 : vector<16x64xf32>
    %cst_62 = arith.constant 0.797884583 : f32
    %134 = vector.broadcast %cst_62 : f32 to vector<16x64xf32>
    %135 = arith.mulf %134, %133 : vector<16x64xf32>
    %136 = math.tanh %135 : vector<16x64xf32>
    %cst_63 = arith.constant 1.000000e+00 : f32
    %137 = vector.broadcast %cst_63 : f32 to vector<16x64xf32>
    %138 = arith.addf %137, %136 : vector<16x64xf32>
    %cst_64 = arith.constant 5.000000e-01 : f32
    %139 = vector.broadcast %cst_64 : f32 to vector<16x64xf32>
    %140 = arith.mulf %139, %138 : vector<16x64xf32>
    %141 = arith.mulf %128, %140 : vector<16x64xf32>
    %c0_65 = arith.constant 0 : index
    %c0_66 = arith.constant 0 : index
    %c0_67 = arith.constant 0 : index
    %142 = vector.load %arg15[%c0_65, %c0_66, %c0_67] : memref<2x64x32xbf16, #tpu.memory_space<vmem>>, vector<1x64x32xbf16>
    %143 = vector.shape_cast %142 : vector<1x64x32xbf16> to vector<64x32xbf16>
    %c0_68 = arith.constant 0 : index
    %c0_69 = arith.constant 0 : index
    %c0_70 = arith.constant 0 : index
    %144 = vector.load %arg16[%c0_68, %c0_69, %c0_70] : memref<2x1x32xf32, #tpu.memory_space<vmem>>, vector<1x1x32xf32>
    %145 = vector.shape_cast %144 : vector<1x1x32xf32> to vector<1x32xf32>
    %146 = arith.truncf %141 : vector<16x64xf32> to vector<16x64xbf16>
    %cst_71 = arith.constant dense<0.000000e+00> : vector<16x32xf32>
    %147 = tpu.matmul %146, %143, %cst_71 {dimension_numbers = #tpu.dot_dimension_numbers<[1], [0], [0], [1], [0, 0, 1, 1], [], []>} : vector<16x64xbf16>, vector<64x32xbf16>, vector<16x32xf32> -> vector<16x32xf32>
    %148 = vector.broadcast %145 : vector<1x32xf32> to vector<16x32xf32>
    %149 = arith.addf %147, %148 : vector<16x32xf32>
    %150 = arith.addf %94, %149 : vector<16x32xf32>
    %c1 = arith.constant 1 : index
    %c0_72 = arith.constant 0 : index
    %c0_73 = arith.constant 0 : index
    %151 = vector.load %arg5[%c1, %c0_72, %c0_73] : memref<2x1x32xf32, #tpu.memory_space<vmem>>, vector<1x1x32xf32>
    %152 = vector.shape_cast %151 : vector<1x1x32xf32> to vector<1x32xf32>
    %c1_74 = arith.constant 1 : index
    %c0_75 = arith.constant 0 : index
    %c0_76 = arith.constant 0 : index
    %153 = vector.load %arg6[%c1_74, %c0_75, %c0_76] : memref<2x1x32xf32, #tpu.memory_space<vmem>>, vector<1x1x32xf32>
    %154 = vector.shape_cast %153 : vector<1x1x32xf32> to vector<1x32xf32>
    %cst_77 = arith.constant dense<0.000000e+00> : vector<16xf32>
    %155 = vector.multi_reduction <add>, %150, %cst_77 [1] : vector<16x32xf32> to vector<16xf32>
    %156 = vector.shape_cast %155 : vector<16xf32> to vector<16x1xf32>
    %cst_78 = arith.constant 3.200000e+01 : f32
    %157 = vector.broadcast %cst_78 : f32 to vector<16x1xf32>
    %158 = arith.divf %156, %157 : vector<16x1xf32>
    %159 = vector.broadcast %158 : vector<16x1xf32> to vector<16x32xf32>
    %160 = arith.subf %150, %159 : vector<16x32xf32>
    %161 = arith.mulf %160, %160 : vector<16x32xf32>
    %cst_79 = arith.constant dense<0.000000e+00> : vector<16xf32>
    %162 = vector.multi_reduction <add>, %161, %cst_79 [1] : vector<16x32xf32> to vector<16xf32>
    %163 = vector.shape_cast %162 : vector<16xf32> to vector<16x1xf32>
    %cst_80 = arith.constant 3.200000e+01 : f32
    %164 = vector.broadcast %cst_80 : f32 to vector<16x1xf32>
    %165 = arith.divf %163, %164 : vector<16x1xf32>
    %166 = vector.broadcast %158 : vector<16x1xf32> to vector<16x32xf32>
    %167 = arith.subf %150, %166 : vector<16x32xf32>
    %cst_81 = arith.constant 9.99999997E-7 : f32
    %168 = vector.broadcast %cst_81 : f32 to vector<16x1xf32>
    %169 = arith.addf %165, %168 : vector<16x1xf32>
    %170 = math.rsqrt %169 : vector<16x1xf32>
    %171 = vector.broadcast %170 : vector<16x1xf32> to vector<16x32xf32>
    %172 = arith.mulf %167, %171 : vector<16x32xf32>
    %173 = vector.broadcast %152 : vector<1x32xf32> to vector<16x32xf32>
    %174 = arith.mulf %172, %173 : vector<16x32xf32>
    %175 = vector.broadcast %154 : vector<1x32xf32> to vector<16x32xf32>
    %176 = arith.addf %174, %175 : vector<16x32xf32>
    %c1_82 = arith.constant 1 : index
    %c0_83 = arith.constant 0 : index
    %c0_84 = arith.constant 0 : index
    %177 = vector.load %arg7[%c1_82, %c0_83, %c0_84] : memref<2x32x96xbf16, #tpu.memory_space<vmem>>, vector<1x32x96xbf16>
    %178 = vector.shape_cast %177 : vector<1x32x96xbf16> to vector<32x96xbf16>
    %c1_85 = arith.constant 1 : index
    %c0_86 = arith.constant 0 : index
    %c0_87 = arith.constant 0 : index
    %179 = vector.load %arg8[%c1_85, %c0_86, %c0_87] : memref<2x1x96xf32, #tpu.memory_space<vmem>>, vector<1x1x96xf32>
    %180 = vector.shape_cast %179 : vector<1x1x96xf32> to vector<1x96xf32>
    %181 = arith.truncf %176 : vector<16x32xf32> to vector<16x32xbf16>
    %cst_88 = arith.constant dense<0.000000e+00> : vector<16x96xf32>
    %182 = tpu.matmul %181, %178, %cst_88 {dimension_numbers = #tpu.dot_dimension_numbers<[1], [0], [0], [1], [0, 0, 1, 1], [], []>} : vector<16x32xbf16>, vector<32x96xbf16>, vector<16x96xf32> -> vector<16x96xf32>
    %183 = vector.broadcast %180 : vector<1x96xf32> to vector<16x96xf32>
    %184 = arith.addf %182, %183 : vector<16x96xf32>
    %185 = vector.extract_strided_slice %184 {offsets = [0, 0], sizes = [16, 16], strides = [1, 1]} : vector<16x96xf32> to vector<16x16xf32>
    %186 = vector.extract_strided_slice %184 {offsets = [0, 32], sizes = [16, 16], strides = [1, 1]} : vector<16x96xf32> to vector<16x16xf32>
    %187 = vector.extract_strided_slice %184 {offsets = [0, 64], sizes = [16, 16], strides = [1, 1]} : vector<16x96xf32> to vector<16x16xf32>
    %188 = arith.truncf %185 : vector<16x16xf32> to vector<16x16xbf16>
    %189 = arith.truncf %186 : vector<16x16xf32> to vector<16x16xbf16>
    %cst_89 = arith.constant dense<0.000000e+00> : vector<16x16xf32>
    %190 = tpu.matmul %188, %189, %cst_89 {dimension_numbers = #tpu.dot_dimension_numbers<[1], [1], [0], [0], [0, 0, 1, 0], [], []>} : vector<16x16xbf16>, vector<16x16xbf16>, vector<16x16xf32> -> vector<16x16xf32>
    %cst_90 = arith.constant 2.500000e-01 : f32
    %191 = vector.broadcast %cst_90 : f32 to vector<16x16xf32>
    %192 = arith.mulf %190, %191 : vector<16x16xf32>
    %cst_91 = arith.constant dense<0xFF800000> : vector<16xf32>
    %193 = vector.multi_reduction <maximumf>, %192, %cst_91 [1] : vector<16x16xf32> to vector<16xf32>
    %194 = vector.shape_cast %193 : vector<16xf32> to vector<16x1xf32>
    %195 = vector.broadcast %194 : vector<16x1xf32> to vector<16x16xf32>
    %196 = arith.subf %192, %195 : vector<16x16xf32>
    %197 = math.exp %196 : vector<16x16xf32>
    %cst_92 = arith.constant dense<0.000000e+00> : vector<16xf32>
    %198 = vector.multi_reduction <add>, %197, %cst_92 [1] : vector<16x16xf32> to vector<16xf32>
    %199 = vector.shape_cast %198 : vector<16xf32> to vector<16x1xf32>
    %200 = tpu.reciprocal %199 {approx = true} : vector<16x1xf32> -> vector<16x1xf32>
    %201 = vector.broadcast %200 : vector<16x1xf32> to vector<16x16xf32>
    %202 = arith.mulf %197, %201 : vector<16x16xf32>
    %203 = arith.truncf %202 : vector<16x16xf32> to vector<16x16xbf16>
    %204 = arith.truncf %187 : vector<16x16xf32> to vector<16x16xbf16>
    %cst_93 = arith.constant dense<0.000000e+00> : vector<16x16xf32>
    %205 = tpu.matmul %203, %204, %cst_93 {dimension_numbers = #tpu.dot_dimension_numbers<[1], [0], [0], [1], [0, 0, 1, 1], [], []>} : vector<16x16xbf16>, vector<16x16xbf16>, vector<16x16xf32> -> vector<16x16xf32>
    %206 = vector.extract_strided_slice %184 {offsets = [0, 16], sizes = [16, 16], strides = [1, 1]} : vector<16x96xf32> to vector<16x16xf32>
    %207 = vector.extract_strided_slice %184 {offsets = [0, 48], sizes = [16, 16], strides = [1, 1]} : vector<16x96xf32> to vector<16x16xf32>
    %208 = vector.extract_strided_slice %184 {offsets = [0, 80], sizes = [16, 16], strides = [1, 1]} : vector<16x96xf32> to vector<16x16xf32>
    %209 = arith.truncf %206 : vector<16x16xf32> to vector<16x16xbf16>
    %210 = arith.truncf %207 : vector<16x16xf32> to vector<16x16xbf16>
    %cst_94 = arith.constant dense<0.000000e+00> : vector<16x16xf32>
    %211 = tpu.matmul %209, %210, %cst_94 {dimension_numbers = #tpu.dot_dimension_numbers<[1], [1], [0], [0], [0, 0, 1, 0], [], []>} : vector<16x16xbf16>, vector<16x16xbf16>, vector<16x16xf32> -> vector<16x16xf32>
    %cst_95 = arith.constant 2.500000e-01 : f32
    %212 = vector.broadcast %cst_95 : f32 to vector<16x16xf32>
    %213 = arith.mulf %211, %212 : vector<16x16xf32>
    %cst_96 = arith.constant dense<0xFF800000> : vector<16xf32>
    %214 = vector.multi_reduction <maximumf>, %213, %cst_96 [1] : vector<16x16xf32> to vector<16xf32>
    %215 = vector.shape_cast %214 : vector<16xf32> to vector<16x1xf32>
    %216 = vector.broadcast %215 : vector<16x1xf32> to vector<16x16xf32>
    %217 = arith.subf %213, %216 : vector<16x16xf32>
    %218 = math.exp %217 : vector<16x16xf32>
    %cst_97 = arith.constant dense<0.000000e+00> : vector<16xf32>
    %219 = vector.multi_reduction <add>, %218, %cst_97 [1] : vector<16x16xf32> to vector<16xf32>
    %220 = vector.shape_cast %219 : vector<16xf32> to vector<16x1xf32>
    %221 = tpu.reciprocal %220 {approx = true} : vector<16x1xf32> -> vector<16x1xf32>
    %222 = vector.broadcast %221 : vector<16x1xf32> to vector<16x16xf32>
    %223 = arith.mulf %218, %222 : vector<16x16xf32>
    %224 = arith.truncf %223 : vector<16x16xf32> to vector<16x16xbf16>
    %225 = arith.truncf %208 : vector<16x16xf32> to vector<16x16xbf16>
    %cst_98 = arith.constant dense<0.000000e+00> : vector<16x16xf32>
    %226 = tpu.matmul %224, %225, %cst_98 {dimension_numbers = #tpu.dot_dimension_numbers<[1], [0], [0], [1], [0, 0, 1, 1], [], []>} : vector<16x16xbf16>, vector<16x16xbf16>, vector<16x16xf32> -> vector<16x16xf32>
    %227 = tpu.concatenate %205, %226 in 1 : vector<16x16xf32>, vector<16x16xf32> -> vector<16x32xf32>
    %c1_99 = arith.constant 1 : index
    %c0_100 = arith.constant 0 : index
    %c0_101 = arith.constant 0 : index
    %228 = vector.load %arg9[%c1_99, %c0_100, %c0_101] : memref<2x32x32xbf16, #tpu.memory_space<vmem>>, vector<1x32x32xbf16>
    %229 = vector.shape_cast %228 : vector<1x32x32xbf16> to vector<32x32xbf16>
    %c1_102 = arith.constant 1 : index
    %c0_103 = arith.constant 0 : index
    %c0_104 = arith.constant 0 : index
    %230 = vector.load %arg10[%c1_102, %c0_103, %c0_104] : memref<2x1x32xf32, #tpu.memory_space<vmem>>, vector<1x1x32xf32>
    %231 = vector.shape_cast %230 : vector<1x1x32xf32> to vector<1x32xf32>
    %232 = arith.truncf %227 : vector<16x32xf32> to vector<16x32xbf16>
    %cst_105 = arith.constant dense<0.000000e+00> : vector<16x32xf32>
    %233 = tpu.matmul %232, %229, %cst_105 {dimension_numbers = #tpu.dot_dimension_numbers<[1], [0], [0], [1], [0, 0, 1, 1], [], []>} : vector<16x32xbf16>, vector<32x32xbf16>, vector<16x32xf32> -> vector<16x32xf32>
    %234 = vector.broadcast %231 : vector<1x32xf32> to vector<16x32xf32>
    %235 = arith.addf %233, %234 : vector<16x32xf32>
    %236 = arith.addf %150, %235 : vector<16x32xf32>
    %c1_106 = arith.constant 1 : index
    %c0_107 = arith.constant 0 : index
    %c0_108 = arith.constant 0 : index
    %237 = vector.load %arg11[%c1_106, %c0_107, %c0_108] : memref<2x1x32xf32, #tpu.memory_space<vmem>>, vector<1x1x32xf32>
    %238 = vector.shape_cast %237 : vector<1x1x32xf32> to vector<1x32xf32>
    %c1_109 = arith.constant 1 : index
    %c0_110 = arith.constant 0 : index
    %c0_111 = arith.constant 0 : index
    %239 = vector.load %arg12[%c1_109, %c0_110, %c0_111] : memref<2x1x32xf32, #tpu.memory_space<vmem>>, vector<1x1x32xf32>
    %240 = vector.shape_cast %239 : vector<1x1x32xf32> to vector<1x32xf32>
    %cst_112 = arith.constant dense<0.000000e+00> : vector<16xf32>
    %241 = vector.multi_reduction <add>, %236, %cst_112 [1] : vector<16x32xf32> to vector<16xf32>
    %242 = vector.shape_cast %241 : vector<16xf32> to vector<16x1xf32>
    %cst_113 = arith.constant 3.200000e+01 : f32
    %243 = vector.broadcast %cst_113 : f32 to vector<16x1xf32>
    %244 = arith.divf %242, %243 : vector<16x1xf32>
    %245 = vector.broadcast %244 : vector<16x1xf32> to vector<16x32xf32>
    %246 = arith.subf %236, %245 : vector<16x32xf32>
    %247 = arith.mulf %246, %246 : vector<16x32xf32>
    %cst_114 = arith.constant dense<0.000000e+00> : vector<16xf32>
    %248 = vector.multi_reduction <add>, %247, %cst_114 [1] : vector<16x32xf32> to vector<16xf32>
    %249 = vector.shape_cast %248 : vector<16xf32> to vector<16x1xf32>
    %cst_115 = arith.constant 3.200000e+01 : f32
    %250 = vector.broadcast %cst_115 : f32 to vector<16x1xf32>
    %251 = arith.divf %249, %250 : vector<16x1xf32>
    %252 = vector.broadcast %244 : vector<16x1xf32> to vector<16x32xf32>
    %253 = arith.subf %236, %252 : vector<16x32xf32>
    %cst_116 = arith.constant 9.99999997E-7 : f32
    %254 = vector.broadcast %cst_116 : f32 to vector<16x1xf32>
    %255 = arith.addf %251, %254 : vector<16x1xf32>
    %256 = math.rsqrt %255 : vector<16x1xf32>
    %257 = vector.broadcast %256 : vector<16x1xf32> to vector<16x32xf32>
    %258 = arith.mulf %253, %257 : vector<16x32xf32>
    %259 = vector.broadcast %238 : vector<1x32xf32> to vector<16x32xf32>
    %260 = arith.mulf %258, %259 : vector<16x32xf32>
    %261 = vector.broadcast %240 : vector<1x32xf32> to vector<16x32xf32>
    %262 = arith.addf %260, %261 : vector<16x32xf32>
    %c1_117 = arith.constant 1 : index
    %c0_118 = arith.constant 0 : index
    %c0_119 = arith.constant 0 : index
    %263 = vector.load %arg13[%c1_117, %c0_118, %c0_119] : memref<2x32x64xbf16, #tpu.memory_space<vmem>>, vector<1x32x64xbf16>
    %264 = vector.shape_cast %263 : vector<1x32x64xbf16> to vector<32x64xbf16>
    %c1_120 = arith.constant 1 : index
    %c0_121 = arith.constant 0 : index
    %c0_122 = arith.constant 0 : index
    %265 = vector.load %arg14[%c1_120, %c0_121, %c0_122] : memref<2x1x64xf32, #tpu.memory_space<vmem>>, vector<1x1x64xf32>
    %266 = vector.shape_cast %265 : vector<1x1x64xf32> to vector<1x64xf32>
    %267 = arith.truncf %262 : vector<16x32xf32> to vector<16x32xbf16>
    %cst_123 = arith.constant dense<0.000000e+00> : vector<16x64xf32>
    %268 = tpu.matmul %267, %264, %cst_123 {dimension_numbers = #tpu.dot_dimension_numbers<[1], [0], [0], [1], [0, 0, 1, 1], [], []>} : vector<16x32xbf16>, vector<32x64xbf16>, vector<16x64xf32> -> vector<16x64xf32>
    %269 = vector.broadcast %266 : vector<1x64xf32> to vector<16x64xf32>
    %270 = arith.addf %268, %269 : vector<16x64xf32>
    %271 = arith.mulf %270, %270 : vector<16x64xf32>
    %272 = arith.mulf %270, %271 : vector<16x64xf32>
    %cst_124 = arith.constant 4.471500e-02 : f32
    %273 = vector.broadcast %cst_124 : f32 to vector<16x64xf32>
    %274 = arith.mulf %273, %272 : vector<16x64xf32>
    %275 = arith.addf %270, %274 : vector<16x64xf32>
    %cst_125 = arith.constant 0.797884583 : f32
    %276 = vector.broadcast %cst_125 : f32 to vector<16x64xf32>
    %277 = arith.mulf %276, %275 : vector<16x64xf32>
    %278 = math.tanh %277 : vector<16x64xf32>
    %cst_126 = arith.constant 1.000000e+00 : f32
    %279 = vector.broadcast %cst_126 : f32 to vector<16x64xf32>
    %280 = arith.addf %279, %278 : vector<16x64xf32>
    %cst_127 = arith.constant 5.000000e-01 : f32
    %281 = vector.broadcast %cst_127 : f32 to vector<16x64xf32>
    %282 = arith.mulf %281, %280 : vector<16x64xf32>
    %283 = arith.mulf %270, %282 : vector<16x64xf32>
    %c1_128 = arith.constant 1 : index
    %c0_129 = arith.constant 0 : index
    %c0_130 = arith.constant 0 : index
    %284 = vector.load %arg15[%c1_128, %c0_129, %c0_130] : memref<2x64x32xbf16, #tpu.memory_space<vmem>>, vector<1x64x32xbf16>
    %285 = vector.shape_cast %284 : vector<1x64x32xbf16> to vector<64x32xbf16>
    %c1_131 = arith.constant 1 : index
    %c0_132 = arith.constant 0 : index
    %c0_133 = arith.constant 0 : index
    %286 = vector.load %arg16[%c1_131, %c0_132, %c0_133] : memref<2x1x32xf32, #tpu.memory_space<vmem>>, vector<1x1x32xf32>
    %287 = vector.shape_cast %286 : vector<1x1x32xf32> to vector<1x32xf32>
    %288 = arith.truncf %283 : vector<16x64xf32> to vector<16x64xbf16>
    %cst_134 = arith.constant dense<0.000000e+00> : vector<16x32xf32>
    %289 = tpu.matmul %288, %285, %cst_134 {dimension_numbers = #tpu.dot_dimension_numbers<[1], [0], [0], [1], [0, 0, 1, 1], [], []>} : vector<16x64xbf16>, vector<64x32xbf16>, vector<16x32xf32> -> vector<16x32xf32>
    %290 = vector.broadcast %287 : vector<1x32xf32> to vector<16x32xf32>
    %291 = arith.addf %289, %290 : vector<16x32xf32>
    %292 = arith.addf %236, %291 : vector<16x32xf32>
    %c0_135 = arith.constant 0 : index
    %c0_136 = arith.constant 0 : index
    %293 = vector.load %arg17[%c0_135, %c0_136] : memref<1x32xf32, #tpu.memory_space<vmem>>, vector<1x32xf32>
    %c0_137 = arith.constant 0 : index
    %c0_138 = arith.constant 0 : index
    %294 = vector.load %arg18[%c0_137, %c0_138] : memref<1x32xf32, #tpu.memory_space<vmem>>, vector<1x32xf32>
    %cst_139 = arith.constant dense<0.000000e+00> : vector<16xf32>
    %295 = vector.multi_reduction <add>, %292, %cst_139 [1] : vector<16x32xf32> to vector<16xf32>
    %296 = vector.shape_cast %295 : vector<16xf32> to vector<16x1xf32>
    %cst_140 = arith.constant 3.200000e+01 : f32
    %297 = vector.broadcast %cst_140 : f32 to vector<16x1xf32>
    %298 = arith.divf %296, %297 : vector<16x1xf32>
    %299 = vector.broadcast %298 : vector<16x1xf32> to vector<16x32xf32>
    %300 = arith.subf %292, %299 : vector<16x32xf32>
    %301 = arith.mulf %300, %300 : vector<16x32xf32>
    %cst_141 = arith.constant dense<0.000000e+00> : vector<16xf32>
    %302 = vector.multi_reduction <add>, %301, %cst_141 [1] : vector<16x32xf32> to vector<16xf32>
    %303 = vector.shape_cast %302 : vector<16xf32> to vector<16x1xf32>
    %cst_142 = arith.constant 3.200000e+01 : f32
    %304 = vector.broadcast %cst_142 : f32 to vector<16x1xf32>
    %305 = arith.divf %303, %304 : vector<16x1xf32>
    %306 = vector.broadcast %298 : vector<16x1xf32> to vector<16x32xf32>
    %307 = arith.subf %292, %306 : vector<16x32xf32>
    %cst_143 = arith.constant 9.99999997E-7 : f32
    %308 = vector.broadcast %cst_143 : f32 to vector<16x1xf32>
    %309 = arith.addf %305, %308 : vector<16x1xf32>
    %310 = math.rsqrt %309 : vector<16x1xf32>
    %311 = vector.broadcast %310 : vector<16x1xf32> to vector<16x32xf32>
    %312 = arith.mulf %307, %311 : vector<16x32xf32>
    %313 = vector.broadcast %293 : vector<1x32xf32> to vector<16x32xf32>
    %314 = arith.mulf %312, %313 : vector<16x32xf32>
    %315 = vector.broadcast %294 : vector<1x32xf32> to vector<16x32xf32>
    %316 = arith.addf %314, %315 : vector<16x32xf32>
    %cst_144 = arith.constant 0.000000e+00 : f32
    %317 = vector.broadcast %cst_144 : f32 to vector<16x32xf32>
    %318 = arith.maximumf %316, %317 : vector<16x32xf32>
    %319 = arith.truncf %318 : vector<16x32xf32> to vector<16x32xbf16>
    %c0_145 = arith.constant 0 : index
    %c0_146 = arith.constant 0 : index
    %c0_147 = arith.constant 0 : index
    %320 = vector.load %arg19[%c0_145, %c0_146, %c0_147] : memref<1x16x32xbf16, #tpu.memory_space<vmem>>, vector<1x16x32xbf16>
    %321 = vector.shape_cast %320 : vector<1x16x32xbf16> to vector<16x32xbf16>
    %322 = vector.shape_cast %319 : vector<16x32xbf16> to vector<1x16x32xbf16>
    tpu.vector_store %arg19[%c0_145, %c0_146, %c0_147], %322 {strides = array<i32>} : memref<1x16x32xbf16, #tpu.memory_space<vmem>>, vector<1x16x32xbf16>,
    return
  }
  func.func @transform_0(%arg0: i32) -> (i32, i32, i32) {
    %c0_i32 = arith.constant 0 : i32
    %c0_i32_0 = arith.constant 0 : i32
    %c0_i32_1 = arith.constant 0 : i32
    return %arg0, %c0_i32, %c0_i32_0 : i32, i32, i32
  }
  func.func @transform_1(%arg0: i32) -> (i32, i32) {
    %c0_i32 = arith.constant 0 : i32
    %c0_i32_0 = arith.constant 0 : i32
    %c0_i32_1 = arith.constant 0 : i32
    return %c0_i32, %c0_i32_0 : i32, i32
  }
  func.func @transform_2(%arg0: i32) -> (i32, i32) {
    %c0_i32 = arith.constant 0 : i32
    %c0_i32_0 = arith.constant 0 : i32
    %c0_i32_1 = arith.constant 0 : i32
    return %c0_i32, %c0_i32_0 : i32, i32
  }
  func.func @transform_3(%arg0: i32) -> (i32, i32) {
    %c0_i32 = arith.constant 0 : i32
    %c0_i32_0 = arith.constant 0 : i32
    %c0_i32_1 = arith.constant 0 : i32
    return %c0_i32, %c0_i32_0 : i32, i32
  }
  func.func @transform_4(%arg0: i32) -> (i32, i32, i32) {
    %c0_i32 = arith.constant 0 : i32
    %c0_i32_0 = arith.constant 0 : i32
    %c0_i32_1 = arith.constant 0 : i32
    %c0_i32_2 = arith.constant 0 : i32
    return %c0_i32, %c0_i32_0, %c0_i32_1 : i32, i32, i32
  }
  func.func @transform_5(%arg0: i32) -> (i32, i32, i32) {
    %c0_i32 = arith.constant 0 : i32
    %c0_i32_0 = arith.constant 0 : i32
    %c0_i32_1 = arith.constant 0 : i32
    %c0_i32_2 = arith.constant 0 : i32
    return %c0_i32, %c0_i32_0, %c0_i32_1 : i32, i32, i32
  }
  func.func @transform_6(%arg0: i32) -> (i32, i32, i32) {
    %c0_i32 = arith.constant 0 : i32
    %c0_i32_0 = arith.constant 0 : i32
    %c0_i32_1 = arith.constant 0 : i32
    %c0_i32_2 = arith.constant 0 : i32
    return %c0_i32, %c0_i32_0, %c0_i32_1 : i32, i32, i32
  }
  func.func @transform_7(%arg0: i32) -> (i32, i32, i32) {
    %c0_i32 = arith.constant 0 : i32
    %c0_i32_0 = arith.constant 0 : i32
    %c0_i32_1 = arith.constant 0 : i32
    %c0_i32_2 = arith.constant 0 : i32
    return %c0_i32, %c0_i32_0, %c0_i32_1 : i32, i32, i32
  }
  func.func @transform_8(%arg0: i32) -> (i32, i32, i32) {
    %c0_i32 = arith.constant 0 : i32
    %c0_i32_0 = arith.constant 0 : i32
    %c0_i32_1 = arith.constant 0 : i32
    %c0_i32_2 = arith.constant 0 : i32
    return %c0_i32, %c0_i32_0, %c0_i32_1 : i32, i32, i32
  }
  func.func @transform_9(%arg0: i32) -> (i32, i32, i32) {
    %c0_i32 = arith.constant 0 : i32
    %c0_i32_0 = arith.constant 0 : i32
    %c0_i32_1 = arith.constant 0 : i32
    %c0_i32_2 = arith.constant 0 : i32
    return %c0_i32, %c0_i32_0, %c0_i32_1 : i32, i32, i32
  }
  func.func @transform_10(%arg0: i32) -> (i32, i32, i32) {
    %c0_i32 = arith.constant 0 : i32
    %c0_i32_0 = arith.constant 0 : i32
    %c0_i32_1 = arith.constant 0 : i32
    %c0_i32_2 = arith.constant 0 : i32
    return %c0_i32, %c0_i32_0, %c0_i32_1 : i32, i32, i32
  }
  func.func @transform_11(%arg0: i32) -> (i32, i32, i32) {
    %c0_i32 = arith.constant 0 : i32
    %c0_i32_0 = arith.constant 0 : i32
    %c0_i32_1 = arith.constant 0 : i32
    %c0_i32_2 = arith.constant 0 : i32
    return %c0_i32, %c0_i32_0, %c0_i32_1 : i32, i32, i32
  }
  func.func @transform_12(%arg0: i32) -> (i32, i32, i32) {
    %c0_i32 = arith.constant 0 : i32
    %c0_i32_0 = arith.constant 0 : i32
    %c0_i32_1 = arith.constant 0 : i32
    %c0_i32_2 = arith.constant 0 : i32
    return %c0_i32, %c0_i32_0, %c0_i32_1 : i32, i32, i32
  }
  func.func @transform_13(%arg0: i32) -> (i32, i32, i32) {
    %c0_i32 = arith.constant 0 : i32
    %c0_i32_0 = arith.constant 0 : i32
    %c0_i32_1 = arith.constant 0 : i32
    %c0_i32_2 = arith.constant 0 : i32
    return %c0_i32, %c0_i32_0, %c0_i32_1 : i32, i32, i32
  }
  func.func @transform_14(%arg0: i32) -> (i32, i32, i32) {
    %c0_i32 = arith.constant 0 : i32
    %c0_i32_0 = arith.constant 0 : i32
    %c0_i32_1 = arith.constant 0 : i32
    %c0_i32_2 = arith.constant 0 : i32
    return %c0_i32, %c0_i32_0, %c0_i32_1 : i32, i32, i32
  }
  func.func @transform_15(%arg0: i32) -> (i32, i32, i32) {
    %c0_i32 = arith.constant 0 : i32
    %c0_i32_0 = arith.constant 0 : i32
    %c0_i32_1 = arith.constant 0 : i32
    %c0_i32_2 = arith.constant 0 : i32
    return %c0_i32, %c0_i32_0, %c0_i32_1 : i32, i32, i32
  }
  func.func @transform_16(%arg0: i32) -> (i32, i32) {
    %c0_i32 = arith.constant 0 : i32
    %c0_i32_0 = arith.constant 0 : i32
    %c0_i32_1 = arith.constant 0 : i32
    return %c0_i32, %c0_i32_0 : i32, i32
  }
  func.func @transform_17(%arg0: i32) -> (i32, i32) {
    %c0_i32 = arith.constant 0 : i32
    %c0_i32_0 = arith.constant 0 : i32
    %c0_i32_1 = arith.constant 0 : i32
    return %c0_i32, %c0_i32_0 : i32, i32
  }
  func.func @transform_18(%arg0: i32) -> (i32, i32, i32) {
    %c0_i32 = arith.constant 0 : i32
    %c0_i32_0 = arith.constant 0 : i32
    %c0_i32_1 = arith.constant 0 : i32
    return %arg0, %c0_i32, %c0_i32_0 : i32, i32, i32
  }
}

</mosaic_0001>

<bundles_post_ra>
// kernel: vitpose_forward.2
= control target key start
LH: loop header
LB: loop body
LE: loop exit
PB: predicated region body
PF: predicated region fallthrough
CT: control target
= control target key end

     0   :  { %s3539_s0 = inlined_call_operand.vmem [shape: bf16[2,16,192], index: 0, kind: input, shape index: {}]   ;;  %s3540_s1 = inlined_call_operand.hbm [shape: f32[16,32], index: 1, kind: input, shape index: {}]   ;;  %s3541_s2 = inlined_call_operand.vmem [shape: bf16[192,32], index: 2, kind: input, shape index: {}]   ;;  %s3542_s3 = inlined_call_operand.vmem [shape: f32[1,32], index: 3, kind: input, shape index: {}]   ;;  %s3543_s4 = inlined_call_operand.vmem [shape: f32[2,1,32], index: 4, kind: input, shape index: {}]   ;;  %s3544_s5 = inlined_call_operand.vmem [shape: f32[2,1,32], index: 5, kind: input, shape index: {}]   ;;  %s3545_s6 = inlined_call_operand.vmem [shape: bf16[2,32,96], index: 6, kind: input, shape index: {}]   ;;  %s3546_s7 = inlined_call_operand.vmem [shape: f32[2,1,96], index: 7, kind: input, shape index: {}]   ;;  %s3547_s8 = inlined_call_operand.vmem [shape: bf16[2,32,32], index: 8, kind: input, shape index: {}]   ;;  %s3548_s9 = inlined_call_operand.vmem [shape: f32[2,1,32], index: 9, kind: input, shape index: {}]   ;;  %s3549_s10 = inlined_call_operand.vmem [shape: f32[2,1,32], index: 10, kind: input, shape index: {}]   ;;  %s3550_s11 = inlined_call_operand.vmem [shape: f32[2,1,32], index: 11, kind: input, shape index: {}]   ;;  %s3551_s12 = inlined_call_operand.vmem [shape: bf16[2,32,64], index: 12, kind: input, shape index: {}]   ;;  %s3552_s13 = inlined_call_operand.hbm [shape: f32[2,1,64], index: 13, kind: input, shape index: {}]   ;;  %s3553_s14 = inlined_call_operand.vmem [shape: bf16[2,64,32], index: 14, kind: input, shape index: {}]   ;;  %s3554_s15 = inlined_call_operand.hbm [shape: f32[2,1,32], index: 15, kind: input, shape index: {}]   ;;  %s3555_s16 = inlined_call_operand.hbm [shape: f32[1,32], index: 16, kind: input, shape index: {}]   ;;  %s3556_s17 = inlined_call_operand.hbm [shape: f32[1,32], index: 17, kind: input, shape index: {}]   ;;  %s3557_s18 = inlined_call_operand.vmem [shape: bf16[2,16,32], index: 18, kind: output, shape index: {}]  }
   0x1   :  { %3567 = sst [smem:[#allocation14_spill]] %s3539_s0 }
   0x2   :  { %3568 = sst [smem:[#allocation15_spill]] %s3540_s1 }
   0x3   :  { %3569 = sst [smem:[#allocation16_spill]] %s3541_s2 }
   0x4   :  { %3570 = sst [smem:[#allocation17_spill]] %s3550_s11 }
   0x5   :  { %3571 = sst [smem:[#allocation18_spill]] %s3552_s13 }
   0x6   :  { %3572 = sst [smem:[#allocation19_spill]] %s3553_s14 }
   0x7   :  { %3573 = sst [smem:[#allocation20_spill]] %s3557_s18 }
   0x8   :  { %23 = vsyncpa [#allocation3], 0 }
   0x9   :  { %24 = vsyncpa [#allocation5], 0 }
   0xa   :  { %25 = vsyncpa [#allocation8], 0  ;;  %s3031_s27 = smov 0  }
   0xb LB: > { %3574 = sst [smem:[#allocation13_spill]] %s2916_s27  ;;  %s2918_s28 = smov [#allocation4]   ;;  %s2916_s27 = sphi %s3031_s27, %s31_s27  }
   0xc   : > { %s503_s29 = sshll.u32 %s2918_s28, 4  ;;  %s3037_s30 = sadd.s32 4294967295, %s2916_s27   ;;  %s3042_s29 = int_to_ptr.vmem [resolvable:$true] %s503_s29 }
   0xd   : > { %p2296_p0 = scmp.ge.s32.totalorder %s2916_s27, 1  ;;  %p445_p1 = scmp.lt.s32.totalorder %s2916_s27, 3 }
   0xe   : > { %p3565_p2 = scmp.eq.s32.totalorder %s3037_s30, 0  ;;  %s2919_s19 = smov [#allocation7]  }
   0xf   : > { %p3044_p3 = pnand %p2296_p0, %p445_p1  ;;  %s533_s1 = sshll.u32 %s2919_s19, 4  ;;  %s3050_s1 = int_to_ptr.vmem [resolvable:$true] %s533_s1 }
  0x10   : > { %s2920_s21 = smov [#allocation2]   ;;  %s3577_s13 = sld [smem:[#allocation18_spill]] }
  0x11   : > { %s3575_s0 = scalar_select %p3044_p3, 1, 0 }
  0x12   : > { %p2601_p4 = pneg %p3044_p3  ;;  %s457_s22 = sshll.u32 %s2920_s21, 4  ;;  %s3058_s22 = int_to_ptr.vmem [resolvable:$true] %s457_s22 }
  0x14   : > { %p3054_p5 = pnand %p3565_p2, %p2601_p4 }
  0x16   : > { %s2758_s24 = scalar_lea.hbm %s3577_s13, 32  ;;  %p3068_p7 = pneg %p3054_p5 }
  0x17   : > { %p2759_p6 = scmp.ne.s32.totalorder %s3577_s13, %s2758_s24  ;;  %p2765_p10 = scmp.lt.u32.totalorder %s2758_s24, %s3577_s13 }
  0x19   : > { %p2761_p8 = pnand %p3068_p7, %p2759_p6 }
  0x1b   : > { %p2762_p9 = pneg %p2761_p8 }
  0x1d   : > { %p2767_p11 = pnand %p2765_p10, %p2762_p9 }
  0x1f   : > { %2770 = shalt.err (!%p2767_p11)
}
  0x20   : > { %s2771_s2 = scalar_lea.vmem %s3042_s29, 32  ;;  %p2779_p1 = scmp.lt.s32.totalorder %s3042_s29, %s3042_s29 }
  0x21   : > { %p2772_p12 = scmp.ne.s32.totalorder %s3042_s29, %s2771_s2  ;;  %p2780_p4 = scmp.lt.s32.totalorder %s2771_s2, %s2771_s2 }
  0x23   : > { %p2774_p13 = pnand %p2772_p12, %p3068_p7  ;;  %p2781_p6 = por %p2780_p4, %p2779_p1 }
  0x25   : > { %p2775_p0 = pneg %p2774_p13 }
  0x27   : > { %p2782_p8 = pnand %p2781_p6, %p2775_p0 }
  0x29   : > { %2785 = shalt.err (!%p2782_p8)
}
  0x2a   : > { %s3563_s23 = smov 16   ;;  %s3564_s24 = smov 1  }
  0x2b   : > { %2607 = dma.hbm_to_vmem [thread:$0]  (!%p3054_p5), %s3577_s13, 32, %s3042_s29, [#allocation5], %s3563_s23, %s3563_s23, %s3564_s24  }
  0x2c   : > { %s2786_s2 = scalar_lea.hbm %s3555_s16, 16 }
  0x2d   : > { %p2787_p9 = scmp.ne.s32.totalorder %s3555_s16, %s2786_s2  ;;  %p2793_p12 = scmp.lt.u32.totalorder %s2786_s2, %s3555_s16 }
  0x2f   : > { %p2789_p10 = pnand %p2787_p9, %p3068_p7 }
  0x31   : > { %p2790_p11 = pneg %p2789_p10 }
  0x33   : > { %p2795_p13 = pnand %p2793_p12, %p2790_p11 }
  0x35   : > { %2798 = shalt.err (!%p2795_p13)
}
  0x36   : > { %s2799_s29 = scalar_lea.vmem %s3050_s1, 16  ;;  %s2806_s18 = scalar_lea.vmem %s3050_s1, 32 }
  0x37   : > { %p2800_p0 = scmp.ne.s32.totalorder %s3050_s1, %s2799_s29  ;;  %p2807_p6 = scmp.lt.s32.totalorder %s3050_s1, %s3050_s1 }
  0x38   : > { %p2808_p8 = scmp.lt.s32.totalorder %s2806_s18, %s2799_s29 }
  0x39   : > { %p2802_p1 = pnand %p2800_p0, %p3068_p7 }
  0x3a   : > { %p2809_p9 = por %p2808_p8, %p2807_p6 }
  0x3b   : > { %p2803_p4 = pneg %p2802_p1 }
  0x3d   : > { %p2810_p10 = pnand %p2809_p9, %p2803_p4 }
  0x3f   : > { %2813 = shalt.err (!%p2810_p10)
}
  0x40   : > { %2613 = dma.hbm_to_vmem [thread:$0]  (!%p3054_p5), %s3555_s16, 16, %s3050_s1, [#allocation8]  }
  0x41   : > { %s3579_s26 = sld [smem:[#allocation15_spill]] }
  0x47   : > { %s2814_s19 = scalar_lea.hbm %s3579_s26, 256 }
  0x48   : > { %p2815_p11 = scmp.ne.s32.totalorder %s3579_s26, %s2814_s19  ;;  %p2821_p0 = scmp.lt.u32.totalorder %s2814_s19, %s3579_s26 }
  0x4a   : > { %p2817_p12 = pnand %p2815_p11, %p3068_p7 }
  0x4c   : > { %p2818_p13 = pneg %p2817_p12 }
  0x4e   : > { %p2823_p1 = pnand %p2821_p0, %p2818_p13 }
  0x50   : > { %2826 = shalt.err (!%p2823_p1)
}
  0x51   : > { %s2827_s1 = scalar_lea.vmem %s3058_s22, 256  ;;  %p2835_p9 = scmp.lt.s32.totalorder %s3058_s22, %s3058_s22 }
  0x52   : > { %p2828_p4 = scmp.ne.s32.totalorder %s3058_s22, %s2827_s1  ;;  %p2836_p10 = scmp.lt.s32.totalorder %s2827_s1, %s2827_s1 }
  0x54   : > { %p2830_p6 = pnand %p2828_p4, %p3068_p7  ;;  %p2837_p11 = por %p2836_p10, %p2835_p9 }
  0x56   : > { %p2831_p8 = pneg %p2830_p6 }
  0x58   : > { %p2838_p12 = pnand %p2837_p11, %p2831_p8 }
  0x5a   : > { %2841 = shalt.err (!%p2838_p12)
}
  0x5b   : > { %s2923_s11 = smov 128   ;;  %s2924_s14 = smov 8  }
  0x5c   : > { %2604 = dma.hbm_to_vmem [thread:$0]  (!%p3054_p5), %s3579_s26, 256, %s3058_s22, [#allocation3], %s2923_s11, %s2923_s11, %s2924_s14  }
  0x5d   : > { %s2925_s19 = smov [#allocation6]   ;;  %s2926_s2 = smov [#allocation9]  }
  0x5e   : > { %s519_s21 = sshll.u32 %s2925_s19, 4  ;;  %s544_s29 = sshll.u32 %s2926_s2, 4  ;;  %s520_s21 = int_to_ptr.vmem [resolvable:$true] %s519_s21  ;;  %s3139_s29 = int_to_ptr.vmem [resolvable:$true] %s544_s29 }
  0x5f   : > { %s2842_s23 = scalar_lea.hbm %s3554_s15, 32 }
  0x60   : > { %p2843_p13 = scmp.ne.s32.totalorder %s3554_s15, %s2842_s23  ;;  %p2849_p4 = scmp.lt.u32.totalorder %s2842_s23, %s3554_s15 }
  0x62   : > { %p2845_p0 = pnand %p2843_p13, %p3068_p7 }
  0x64   : > { %p2846_p1 = pneg %p2845_p0 }
  0x66   : > { %p2851_p6 = pnand %p2849_p4, %p2846_p1 }
  0x68   : > { %2854 = shalt.err (!%p2851_p6)
}
  0x69   : > { %s2855_s11 = scalar_lea.vmem %s520_s21, 32  ;;  %p2863_p11 = scmp.lt.s32.totalorder %s520_s21, %s520_s21 }
  0x6a   : > { %p2856_p8 = scmp.ne.s32.totalorder %s520_s21, %s2855_s11  ;;  %p2864_p12 = scmp.lt.s32.totalorder %s2855_s11, %s2855_s11 }
  0x6c   : > { %p2858_p9 = pnand %p2856_p8, %p3068_p7  ;;  %p2865_p2 = por %p2864_p12, %p2863_p11 }
  0x6e   : > { %p2859_p10 = pneg %p2858_p9 }
  0x70   : > { %p2866_p3 = pnand %p2865_p2, %p2859_p10 }
  0x72   : > { %2869 = shalt.err (!%p2866_p3)
}
  0x73   : > { %s3580_s13 = smov 1   ;;  %s3581_s24 = smov 16  }
  0x74   : > { %2610 = dma.hbm_to_vmem [thread:$0]  (!%p3054_p5), %s3554_s15, 32, %s520_s21, [#allocation5], %s3581_s24, %s3581_s24, %s3580_s13  }
  0x75   : > { %s2870_s2 = scalar_lea.hbm %s3556_s17, 16 }
  0x76   : > { %p2871_p13 = scmp.ne.s32.totalorder %s3556_s17, %s2870_s2  ;;  %p2877_p0 = scmp.lt.u32.totalorder %s2870_s2, %s3556_s17 }
  0x78   : > { %p2873_p2 = pnand %p2871_p13, %p3068_p7 }
  0x7a   : > { %p2874_p3 = pneg %p2873_p2 }
  0x7c   : > { %p2879_p1 = pnand %p2877_p0, %p2874_p3 }
  0x7e   : > { %2882 = shalt.err (!%p2879_p1)
}
  0x7f   : > { %s2883_s21 = scalar_lea.vmem %s3139_s29, 16  ;;  %s2890_s11 = scalar_lea.vmem %s3139_s29, 32 }
  0x80   : > { %p2884_p4 = scmp.ne.s32.totalorder %s3139_s29, %s2883_s21  ;;  %p2891_p9 = scmp.lt.s32.totalorder %s3139_s29, %s3139_s29 }
  0x81   : > { %p2892_p10 = scmp.lt.s32.totalorder %s2890_s11, %s2883_s21 }
  0x82   : > { %p2886_p6 = pnand %p2884_p4, %p3068_p7 }
  0x83   : > { %p2893_p11 = por %p2892_p10, %p2891_p9 }
  0x84   : > { %p2887_p8 = pneg %p2886_p6 }
  0x86   : > { %p2894_p12 = pnand %p2893_p11, %p2887_p8 }
  0x88   : > { %2897 = shalt.err (!%p2894_p12)
}
  0x89   : > { %2616 = dma.hbm_to_vmem [thread:$0]  (!%p3054_p5), %s3556_s17, 16, %s3139_s29, [#allocation8]  }
  0x8a   : > { %p3582_p13 = scmp.ne.s32.totalorder %s3575_s0, 0 }
  0x8b   : > { %p3583_p7 = scmp.eq.s32.totalorder (!%p3582_p13), %s3037_s30, 0 }
  0x8c   : > { %565 = sbr.rel (%p3582_p13) target bundleno = 6341 (0x18c5), region = 92 }
  0x93   : > { %2903 = dma.done.wait (%p3583_p7), [#allocation3], 256   ;;  %p3584_p2 = pmov %p3583_p7 }
  0x95   : > { %2905 = vsyncadd (%p3584_p2), [#allocation3], 4294967040  ;;  %p3585_p3 = pmov %p3584_p2 }
  0x96   : > { %p3586_p0 = pmov %p3584_p2 }
  0x97   : > { %2907 = dma.done.wait (%p3585_p3), [#allocation5], 64  }
  0x98   : > { %2909 = vsyncadd (%p3586_p0), [#allocation5], 4294967232  ;;  %p3587_p1 = pmov %p3586_p0 }
  0x99   : > { %p3588_p5 = pmov %p3586_p0 }
  0x9a   : > { %2911 = dma.done.wait (%p3587_p1), [#allocation8], 32  }
  0x9b   : > { %2913 = vsyncadd (%p3588_p5), [#allocation8], 4294967264  ;;  %v2927_v0 = vmov 0   ;;  %p635_p4 = scmp.lt.s32.totalorder %s3037_s30, 1  ;;  %s3589_s28 = sld [smem:[#allocation16_spill]]  ;;  %vm760_vm0 = vcmask 523264  }
  0x9c   : > { %764 = vmatprep.subr.bf16.mxu0 %v2927_v0  ;;  %s3590_s22 = sld [smem:[#allocation14_spill]]  ;;  %v2313_v15 = vld [vmem:[%s3542_s3] ss:$0 sm:$0xff]  ;;  %v806_v21 = vld [vmem:[#allocation2 + $0x8] sm:$0xff]  ;;  %vm811_vm1 = vcmask 261120   ;;  %v2928_v39 = vmov 0.0  }
  0x9d   : > { %s3596_s30 = smov (!%p635_p4, %s3037_s30), 1  ;;  %v805_v17 = vld [vmem:[#allocation2] sm:$0xff]  ;;  %2461 = vmatprep.subr.bf16.mxu1 %v2928_v39  ;;  %v2679_v40 = vld [vmem:[%s3545_s6 + $0x8] sm:$0xff]   ;;  %vm2929_vm2 = vmmov 0   ;;  %s2930_s1 = smov 96   ;;  %vm927_vm3 = vcmask 130048  }
  0x9e   : > { %s2413_s19 = sshll.u32 %s3596_s30, 4  ;;  %v2678_v38 = vld [vmem:[%s3545_s6] sm:$0xff]   ;;  %2465 = vmatprep.mubr.msk.bf16.mxu1 %vm2929_vm2, %v2928_v39  ;;  %s2931_s27 = smov 80   ;;  %vm2186_vm4 = vcmask 257024  }
  0x9f   : > { %2462 = vmatpush3.bf16.msra.mxu1 %v2678_v38  ;;  %v2329_v49 = vld [vmem:[%s3543_s4] ss:$0 sm:$0xff]  ;;  %s2933_s11 = smov 64   ;;  %s2934_s13 = smov 48  }
  0xa0   : > { %2463 = vmatprep.subr.bf16.mxu1 %v2928_v39  ;;  %v2330_v53 = vld [vmem:[%s3544_s5] ss:$0 sm:$0xff]  ;;  %s2935_s29 = smov 16   ;;  %s3591_s14 = sld [smem:[#allocation17_spill]] }
  0xa1   : > { %v2663_v1 = vld [vmem:[%s3589_s28] sm:$0xff]   ;;  %v2664_v2 = vld [vmem:[%s3589_s28 + $0x8] sm:$0xff]   ;;  %v2665_v3 = vld [vmem:[%s3589_s28 + $0x10] sm:$0xff]   ;;  %s2414_s24 = sshll.u32 %s3596_s30, 3  ;;  %s3593_s20 = sld [smem:[#allocation20_spill]] }
  0xa2   : > { %765 = vmatpush1.bf16.msra.mxu0 %v2663_v1  ;;  %v2666_v4 = vld [vmem:[%s3589_s28 + $0x18] sm:$0xff]   ;;  %s639_s21 = scalar_lea.vmem %s3590_s22, %s2413_s19  ;;  %v2667_v5 = vld [vmem:[%s3589_s28 + $0x20] sm:$0xff]   ;;  %v2668_v7 = vld [vmem:[%s3589_s28 + $0x28] sm:$0xff]   ;;  %s2932_s22 = smov 112  }
  0xa3   : > { %766 = vmatprep.subr.bf16.mxu0 %v2927_v0  ;;  %v2677_v6 = vld [vmem:[%s639_s21 + $0x4] ss:$8 sps:$4 sm:$0xff]   ;;  %v2669_v8 = vld [vmem:[%s3589_s28 + $0x30] sm:$0xff]   ;;  %v2670_v9 = vld [vmem:[%s3589_s28 + $0x38] sm:$0xff]   ;;  %2464 = vmatpush3.bf16.msra.mxu1 %v2679_v40  ;;  %s3592_s19 = sld [smem:[#allocation19_spill]] }
  0xa4   : > { %2328 = vmatprep.mubr.msk.bf16.mxu0 %vm760_vm0, %v2677_v6  ;;  %v2671_v10 = vld [vmem:[%s3589_s28 + $0x40] sm:$0xff]   ;;  %v2672_v11 = vld [vmem:[%s3589_s28 + $0x48] sm:$0xff]   ;;  %v2673_v12 = vld [vmem:[%s3589_s28 + $0x50] sm:$0xff]   ;;  %2469 = vmatprep.subr.bf16.mxu1 %v2928_v39 }
  0xa5   : > { %v2674_v13 = vld [vmem:[%s3589_s28 + $0x58] sm:$0xff]   ;;  %v2675_v14 = vld [vmem:[%s639_s21] ss:$8 sps:$4 sm:$0xff]  }
  0xa6   : > { %767 = vmatpush1.bf16.msra.mxu0 %v2664_v2  ;;  %v2331_v58 = vld [vmem:[%s3546_s7] ss:$0 sm:$0xff] }
  0xa7   : > { %768 = vmatprep.subr.bf16.mxu0 %v2927_v0  ;;  %s644_s23 = scalar_lea.vmem %s3593_s20, %s2414_s24 }
  0xaa   : > { %769 = vmatpush1.bf16.msra.mxu0 %v2665_v3 }
  0xab   : > { %770 = vmatprep.subr.bf16.mxu0 %v2927_v0 }
  0xae   : > { %771 = vmatpush1.bf16.msra.mxu0 %v2666_v4 }
  0xaf   : > { %772 = vmatprep.subr.bf16.mxu0 %v2927_v0 }
  0xb2   : > { %773 = vmatpush1.bf16.msra.mxu0 %v2667_v5 }
  0xb3   : > { %774 = vmatprep.subr.bf16.mxu0 %v2927_v0 }
  0xb6   : > { %775 = vmatpush1.bf16.msra.mxu0 %v2668_v7 }
  0xb7   : > { %776 = vmatprep.subr.bf16.mxu0 %v2927_v0 }
  0xba   : > { %777 = vmatpush1.bf16.msra.mxu0 %v2669_v8 }
  0xbb   : > { %778 = vmatprep.subr.bf16.mxu0 %v2927_v0 }
  0xbe   : > { %779 = vmatpush1.bf16.msra.mxu0 %v2670_v9 }
  0xbf   : > { %780 = vmatprep.subr.bf16.mxu0 %v2927_v0 }
  0xc2   : > { %781 = vmatpush1.bf16.msra.mxu0 %v2671_v10 }
  0xc3   : > { %782 = vmatprep.subr.bf16.mxu0 %v2927_v0 }
  0xc6   : > { %783 = vmatpush1.bf16.msra.mxu0 %v2672_v11 }
  0xc7   : > { %784 = vmatprep.subr.bf16.mxu0 %v2927_v0 }
  0xca   : > { %785 = vmatpush1.bf16.msra.mxu0 %v2673_v12 }
  0xcb   : > { %786 = vmatprep.subr.bf16.mxu0 %v2927_v0 }
  0xce   : > { %787 = vmatpush1.bf16.msra.mxu0 %v2674_v13 }
  0xcf   : > { %2521 = vmatprep.subr.bf16.mxu0 %v2928_v39 }
  0xd1   : > { %797 = vmatmul.mubr.bf16.vlgmr.msra.gmra.mrb[0].mxu0 %v2675_v14 }
  0xd2   : > { %2525 = vmatprep.mubr.msk.bf16.mxu0 %vm2929_vm2, %v2928_v39 }
 0x1a4   : > { %v798_v16 = vpop.f32.mrb[0].mxu0 }
 0x1a5   : > { %v799_v18 = vadd.f32 %v2313_v15, %v798_v16  ;;  %v800_v19 = vpop.f32.mrb[1].mxu0 }
 0x1a6   : > { %v801_v20 = vpop.f32.mrb[2].mxu0 }
 0x1a7   : > { %v3248_v22 = vadd.f32 %v805_v17, %v799_v18  ;;  %v802_v23 = vadd.f32 %v2313_v15, %v801_v20  ;;  %v803_v24 = vpop.f32.mrb[3].mxu0 }
 0x1a9   : > { %v3250_v25 = vadd.f32 %v806_v21, %v802_v23  ;;  %v812_v26 = vsel %vm811_vm1, %v3248_v22, 0.0 }
 0x1aa   : > { %813 = vadd.xlane.f32.xlu0 %v812_v26 }
 0x1ab   : > { %v815_v27 = vsel %vm811_vm1, %v3250_v25, 0.0 }
 0x1ae   : > { %816 = vadd.xlane.f32.xlu0 %v815_v27 }
 0x237   : > { %v814_v28 = vpop.xlane.xlu0 %813 }
 0x238   : > { %v819_v29 = vmul.f32 0.03125, %v814_v28 }
 0x23a   : > { %v821_v30 = vsub.f32 %v3248_v22, %v819_v29 }
 0x23b   : > { %v817_v31 = vpop.xlane.xlu0 %816 }
 0x23c   : > { %v820_v32 = vmul.f32 0.03125, %v817_v31  ;;  %v823_v33 = vmul.f32 %v821_v30, %v821_v30 }
 0x23e   : > { %v822_v34 = vsub.f32 %v3250_v25, %v820_v32  ;;  %v825_v35 = vsel %vm811_vm1, %v823_v33, 0.0 }
 0x23f   : > { %826 = vadd.xlane.f32.xlu1 %v825_v35 }
 0x240   : > { %v824_v36 = vmul.f32 %v822_v34, %v822_v34 }
 0x242   : > { %v828_v37 = vsel %vm811_vm1, %v824_v36, 0.0 }
 0x243   : > { %829 = vadd.xlane.f32.xlu1 %v828_v37 }
 0x2cc   : > { %v827_v41 = vpop.xlane.xlu1 %826 }
 0x2cd   : > { %v831_v42 = vmul.f32 0.03125, %v827_v41 }
 0x2cf   : > { %v833_v43 = vadd.f32 1e-06, %v831_v42 }
 0x2d0   : > { %v830_v44 = vpop.xlane.xlu1 %829 }
 0x2d1   : > { %2698 = vrsqrt.f32 %v833_v43  ;;  %v832_v45 = vmul.f32 0.03125, %v830_v44 }
 0x2d3   : > { %v834_v46 = vadd.f32 1e-06, %v832_v45 }
 0x2d5   : > { %2700 = vrsqrt.f32 %v834_v46 }
 0x2db   : > { %v2699_v47 = vpop.eup %2698 }
 0x2dc   : > { %v837_v48 = vmul.f32 %v2699_v47, %v821_v30 }
 0x2de   : > { %v845_v52 = vmul.f32 %v2329_v49, %v837_v48 }
 0x2df   : > { %v2701_v50 = vpop.eup %2700 }
 0x2e0   : > { %v838_v51 = vmul.f32 %v2701_v50, %v822_v34  ;;  %v853_v55 = vadd.f32 %v2330_v53, %v845_v52 }
 0x2e2   : > { %v846_v54 = vmul.f32 %v2329_v49, %v838_v51 }
 0x2e4   : > { %v854_v56 = vadd.f32 %v2330_v53, %v846_v54 }
 0x2e6   : > { %v860_v57 = vpack.c.bf16 %v854_v56, %v853_v55 }
 0x2e8   : > { %2466 = vmatmul.mubr.msk.bf16.vlgmr.msra.gmra.mrb[0].mxu1 %vm811_vm1, %v860_v57 }
 0x2e9   : > { %2471 = vmatprep.mubr.msk.bf16.mxu1 %vm2929_vm2, %v2928_v39 }
 0x3bb   : > { %v916_v59 = vpop.f32.mrb[0].mxu1 }
 0x3bc   : > { %v2467_v60 = vpop.f32.mrb[1].mxu1  ;;  %v917_v62 = vadd.f32 %v2331_v58, %v916_v59 }
 0x3bd   : > { %v919_v61 = vpop.f32.mrb[2].mxu1 }
 0x3be   : > { %v920_v63 = vadd.f32 %v2331_v58, %v919_v61  ;;  %v2468_v0 = vpop.f32.mrb[3].mxu1 }
 0x3c0   : > { %v3286_v1 = vpack.c.bf16 %v920_v63, %v917_v62 }
 0x3c2   : > { %925 = vrot.lane.b32.xlu0 %v3286_v1, %s2930_s1 }
 0x3c6   : > { %1049 = vrot.lane.b32.xlu0 %v3286_v1, %s2931_s27 }
 0x3ca   : > { %1047 = vrot.lane.b32.xlu0 %v3286_v1, %s2932_s22 }
 0x434   : > { %v926_v2 = vpop.permute.xlu0 %925 }
 0x435   : > { %v932_v3 = vsel %vm927_vm3, %v926_v2, 0 }
 0x436   : > { %2470 = vmatpush3.bf16.xpose.msra.mxu1 %v932_v3  ;;  %v2681_v3 = vld [vmem:[%s3547_s8 + $0x8] sm:$0xff]  }
 0x437   : > { %2475 = vmatprep.subr.bf16.mxu1 %v2928_v39 }
 0x438   : > { %v1050_v31 = vpop.permute.xlu0 %1049 }
 0x439   : > { %v1055_v33 = vsel %vm927_vm3, %v1050_v31, 0 }
 0x43c   : > { %v1048_v34 = vpop.permute.xlu0 %1047 }
 0x43d   : > { %2472 = vmatmul.mubr.msk.bf16.vlgmr.msra.gmra.mrb[4].mxu1 %vm927_vm3, %v3286_v1 }
 0x43e   : > { %2477 = vmatprep.mubr.msk.bf16.mxu1 %vm2929_vm2, %v2928_v39 }
 0x510   : > { %v968_v4 = vpop.f32.mrb[4].mxu1 }
 0x511   : > { %v975_v5 = vmul.f32 0.25, %v968_v4  ;;  %v2473_v6 = vpop.f32.mrb[5].mxu1 }
 0x512   : > { %v971_v7 = vpop.f32.mrb[6].mxu1 }
 0x513   : > { %v976_v8 = vmul.f32 0.25, %v971_v7  ;;  %v2474_v9 = vpop.f32.mrb[7].mxu1  ;;  %v977_v10 = vsel %vm927_vm3, %v975_v5, -inf }
 0x514   : > { %978 = vmax.xlane.f32.xlu1 %v977_v10 }
 0x515   : > { %v980_v11 = vsel %vm927_vm3, %v976_v8, -inf }
 0x518   : > { %981 = vmax.xlane.f32.xlu1 %v980_v11 }
 0x5a1   : > { %v979_v12 = vpop.xlane.xlu1 %978 }
 0x5a2   : > { %v983_v13 = vsub.f32 %v975_v5, %v979_v12 }
 0x5a4   : > { %v985_v14 = vmul.f32 1.442695, %v983_v13 }
 0x5a5   : > { %v982_v15 = vpop.xlane.xlu1 %981 }
 0x5a6   : > { %2702 = vpow2.f32 %v985_v14  ;;  %v984_v16 = vsub.f32 %v976_v8, %v982_v15  ;;  %v2339_v15 = vld [vmem:[%s3548_s9] ss:$0 sm:$0xff] }
 0x5a8   : > { %v987_v17 = vmul.f32 1.442695, %v984_v16 }
 0x5aa   : > { %2704 = vpow2.f32 %v987_v17 }
 0x5b0   : > { %v2703_v18 = vpop.eup %2702 }
 0x5b1   : > { %v989_v19 = vsel %vm927_vm3, %v2703_v18, 0.0 }
 0x5b2   : > { %990 = vadd.xlane.f32.xlu1 %v989_v19 }
 0x5b4   : > { %v2705_v20 = vpop.eup %2704 }
 0x5b5   : > { %v992_v21 = vsel %vm927_vm3, %v2705_v20, 0.0 }
 0x5b6   : > { %993 = vadd.xlane.f32.xlu1 %v992_v21 }
 0x5c7   : > { %1000 = vrot.lane.b32.xlu1 %v3286_v1, %s2933_s11 }
 0x63f   : > { %v991_v23 = vpop.xlane.xlu1 %990 }
 0x640   : > { %2706 = vrcp.f32 %v991_v23 }
 0x643   : > { %v994_v24 = vpop.xlane.xlu1 %993 }
 0x644   : > { %2708 = vrcp.f32 %v994_v24 }
 0x647   : > { %v1001_v26 = vpop.permute.xlu1 %1000 }
 0x648   : > { %2476 = vmatpush3.bf16.msra.mxu1 %v1001_v26 }
 0x649   : > { %2481 = vmatprep.subr.bf16.mxu1 %v2928_v39 }
 0x64a   : > { %v2707_v27 = vpop.eup %2706 }
 0x64b   : > { %v997_v29 = vmul.f32 %v2707_v27, %v2703_v18 }
 0x64e   : > { %v2709_v28 = vpop.eup %2708 }
 0x64f   : > { %v998_v30 = vmul.f32 %v2709_v28, %v2705_v20 }
 0x651   : > { %v999_v32 = vpack.c.bf16 %v998_v30, %v997_v29 }
 0x653   : > { %2478 = vmatmul.mubr.msk.bf16.vlgmr.msra.gmra.mrb[8].mxu1 %vm927_vm3, %v999_v32 }
 0x654   : > { %2482 = vmatpush3.bf16.xpose.msra.mxu1 %v1055_v33  ;;  %2483 = vmatprep.mubr.msk.bf16.mxu1 %vm2929_vm2, %v2928_v39 }
 0x655   : > { %2487 = vmatprep.subr.bf16.mxu1 %v2928_v39 }
 0x65b   : > { %2484 = vmatmul.mubr.msk.bf16.vlgmr.msra.gmra.mrb[12].mxu1 %vm927_vm3, %v1048_v34 }
 0x65c   : > { %2489 = vmatprep.mubr.msk.bf16.mxu1 %vm2929_vm2, %v2928_v39 }
 0x726   : > { %v1040_v35 = vpop.f32.mrb[8].mxu1 }
 0x727   : > { %v2479_v36 = vpop.f32.mrb[9].mxu1 }
 0x728   : > { %v1043_v37 = vpop.f32.mrb[10].mxu1  ;;  %v2682_v36 = vld [vmem:[%s3551_s12] sm:$0xff]  }
 0x729   : > { %v2480_v38 = vpop.f32.mrb[11].mxu1 }
 0x72e   : > { %v1091_v40 = vpop.f32.mrb[12].mxu1 }
 0x72f   : > { %v1098_v41 = vmul.f32 0.25, %v1091_v40  ;;  %v2485_v42 = vpop.f32.mrb[13].mxu1 }
 0x730   : > { %v1094_v43 = vpop.f32.mrb[14].mxu1 }
 0x731   : > { %v1099_v44 = vmul.f32 0.25, %v1094_v43  ;;  %v2486_v45 = vpop.f32.mrb[15].mxu1  ;;  %v1100_v46 = vsel %vm927_vm3, %v1098_v41, -inf }
 0x732   : > { %1101 = vmax.xlane.f32.xlu0 %v1100_v46  ;;  %v2343_v46 = vld [vmem:[%s3549_s10] ss:$0 sm:$0xff] }
 0x733   : > { %v1103_v47 = vsel %vm927_vm3, %v1099_v44, -inf }
 0x734   : > { %1104 = vmax.xlane.f32.xlu1 %v1103_v47 }
 0x7bf   : > { %v1102_v48 = vpop.xlane.xlu0 %1101 }
 0x7c0   : > { %v1106_v49 = vsub.f32 %v1098_v41, %v1102_v48 }
 0x7c1   : > { %v1105_v50 = vpop.xlane.xlu1 %1104 }
 0x7c2   : > { %v1108_v51 = vmul.f32 1.442695, %v1106_v49  ;;  %v1107_v52 = vsub.f32 %v1099_v44, %v1105_v50 }
 0x7c4   : > { %2710 = vpow2.f32 %v1108_v51  ;;  %v1110_v53 = vmul.f32 1.442695, %v1107_v52  ;;  %v2344_v51 = vld [vmem:[%s3591_s14] ss:$0 sm:$0xff] }
 0x7c6   : > { %2712 = vpow2.f32 %v1110_v53 }
 0x7ce   : > { %v2711_v54 = vpop.eup %2710 }
 0x7cf   : > { %v1112_v55 = vsel %vm927_vm3, %v2711_v54, 0.0 }
 0x7d0   : > { %v2713_v56 = vpop.eup %2712  ;;  %1113 = vadd.xlane.f32.xlu0 %v1112_v55 }
 0x7d1   : > { %v1115_v57 = vsel %vm927_vm3, %v2713_v56, 0.0 }
 0x7d4   : > { %1116 = vadd.xlane.f32.xlu0 %v1115_v57  ;;  %v2685_v57 = vld [vmem:[%s3592_s19 + $0x8] sm:$0xff]  }
 0x7ea   : > { %1123 = vrot.lane.b32.xlu0 %v3286_v1, %s2934_s13  ;;  %v2680_v1 = vld [vmem:[%s3547_s8] sm:$0xff]  }
 0x85d   : > { %v1114_v58 = vpop.xlane.xlu0 %1113 }
 0x85e   : > { %2714 = vrcp.f32 %v1114_v58  ;;  %v2686_v58 = vld [vmem:[%s3592_s19 + $0x10] sm:$0xff]  }
 0x861   : > { %v1117_v59 = vpop.xlane.xlu0 %1116 }
 0x862   : > { %2716 = vrcp.f32 %v1117_v59  ;;  %v2687_v59 = vld [vmem:[%s3592_s19 + $0x18] sm:$0xff]  }
 0x865   : > { %v1124_v60 = vpop.permute.xlu0 %1123 }
 0x866   : > { %2488 = vmatpush3.bf16.msra.mxu1 %v1124_v60  ;;  %v2345_v60 = vld [vmem:[#allocation4] ss:$0 sm:$0xff] }
 0x867   : > { %2493 = vmatprep.subr.bf16.mxu1 %v2928_v39 }
 0x868   : > { %v2715_v61 = vpop.eup %2714 }
 0x869   : > { %v1120_v63 = vmul.f32 %v2715_v61, %v2711_v54 }
 0x86c   : > { %v2717_v62 = vpop.eup %2716 }
 0x86d   : > { %v1121_v0 = vmul.f32 %v2717_v62, %v2713_v56  ;;  %v2684_v56 = vld [vmem:[%s3592_s19] sm:$0xff]  }
 0x86f   : > { %v1122_v2 = vpack.c.bf16 %v1121_v0, %v1120_v63 }
 0x871   : > { %2490 = vmatmul.mubr.msk.bf16.vlgmr.msra.gmra.mrb[16].mxu1 %vm927_vm3, %v1122_v2 }
 0x872   : > { %2497 = vmatprep.mubr.msk.bf16.mxu1 %vm2929_vm2, %v2928_v39  ;;  %2494 = vmatpush3.bf16.msra.mxu1 %v2680_v1 }
 0x873   : > { %2495 = vmatprep.subr.bf16.mxu1 %v2928_v39 }
 0x876   : > { %2496 = vmatpush3.bf16.msra.mxu1 %v2681_v3 }
 0x877   : > { %2501 = vmatprep.subr.bf16.mxu1 %v2928_v39 }
 0x944   : > { %v1163_v4 = vpop.f32.mrb[16].mxu1 }
 0x945   : > { %v2491_v5 = vpop.f32.mrb[17].mxu1 }
 0x946   : > { %v1166_v6 = vpop.f32.mrb[18].mxu1 }
 0x947   : > { %v2653_v7 = vpack.i.bf16 %v1166_v6, %v1163_v4  ;;  %v2492_v8 = vpop.f32.mrb[19].mxu1 }
 0x949   : > { %2654 = vrot.lane.b32.xlu1 %v2653_v7, %s2935_s29 }
 0x9bb   : > { %v2655_v9 = vpop.permute.xlu1 %2654 }
 0x9bc   : > { %v2657_v10 = vunpack.i.h.bf16 %v2655_v9  ;;  %v2656_v11 = vunpack.i.l.bf16 %v2655_v9 }
 0x9be   : > { %v1179_v12 = vsel %vm927_vm3, %v1043_v37, %v2657_v10  ;;  %v1178_v13 = vsel %vm927_vm3, %v1040_v35, %v2656_v11  ;;  %v2683_v37 = vld [vmem:[%s3551_s12 + $0x8] sm:$0xff]  }
 0x9bf   : > { %v1185_v14 = vpack.c.bf16 %v1179_v12, %v1178_v13 }
 0x9c1   : > { %2498 = vmatmul.mubr.msk.bf16.vlgmr.msra.gmra.mrb[20].mxu1 %vm811_vm1, %v1185_v14 }
 0x9c2   : > { %2505 = vmatprep.mubr.msk.bf16.mxu1 %vm2929_vm2, %v2928_v39  ;;  %2502 = vmatpush3.bf16.msra.mxu1 %v2682_v36 }
 0x9c3   : > { %2503 = vmatprep.subr.bf16.mxu1 %v2928_v39 }
 0x9c6   : > { %2504 = vmatpush3.bf16.msra.mxu1 %v2683_v37 }
 0x9c7   : > { %2509 = vmatprep.subr.bf16.mxu1 %v2928_v39 }
 0xa94   : > { %v1241_v16 = vpop.f32.mrb[20].mxu1 }
 0xa95   : > { %v1242_v17 = vadd.f32 %v2339_v15, %v1241_v16  ;;  %v2499_v18 = vpop.f32.mrb[21].mxu1 }
 0xa96   : > { %v1244_v19 = vpop.f32.mrb[22].mxu1 }
 0xa97   : > { %v3343_v20 = vadd.f32 %v1242_v17, %v3248_v22  ;;  %v1245_v21 = vadd.f32 %v2339_v15, %v1244_v19  ;;  %v2500_v23 = vpop.f32.mrb[23].mxu1 }
 0xa99   : > { %v3346_v24 = vadd.f32 %v1245_v21, %v3250_v25  ;;  %v1252_v26 = vsel %vm811_vm1, %v3343_v20, 0.0 }
 0xa9a   : > { %1253 = vadd.xlane.f32.xlu1 %v1252_v26  ;;  %v2349_v26 = vld [vmem:[#allocation6] ss:$0 sm:$0xff] }
 0xa9b   : > { %v1255_v27 = vsel %vm811_vm1, %v3346_v24, 0.0 }
 0xa9c   : > { %1256 = vadd.xlane.f32.xlu0 %v1255_v27 }
 0xb27   : > { %v1254_v28 = vpop.xlane.xlu1 %1253 }
 0xb28   : > { %v1258_v29 = vmul.f32 0.03125, %v1254_v28 }
 0xb29   : > { %v1257_v30 = vpop.xlane.xlu0 %1256 }
 0xb2a   : > { %v1260_v31 = vsub.f32 %v3343_v20, %v1258_v29  ;;  %v1259_v22 = vmul.f32 0.03125, %v1257_v30 }
 0xb2c   : > { %v1261_v32 = vsub.f32 %v3346_v24, %v1259_v22  ;;  %v1262_v33 = vmul.f32 %v1260_v31, %v1260_v31 }
 0xb2e   : > { %v1264_v25 = vsel %vm811_vm1, %v1262_v33, 0.0  ;;  %v1263_v34 = vmul.f32 %v1261_v32, %v1261_v32 }
 0xb2f   : > { %1265 = vadd.xlane.f32.xlu0 %v1264_v25 }
 0xb30   : > { %v1267_v35 = vsel %vm811_vm1, %v1263_v34, 0.0 }
 0xb31   : > { %1268 = vadd.xlane.f32.xlu1 %v1267_v35 }
 0xbbc   : > { %v1266_v38 = vpop.xlane.xlu0 %1265 }
 0xbbd   : > { %v1270_v40 = vmul.f32 0.03125, %v1266_v38 }
 0xbbe   : > { %v1269_v41 = vpop.xlane.xlu1 %1268 }
 0xbbf   : > { %v1272_v42 = vadd.f32 1e-06, %v1270_v40  ;;  %v1271_v43 = vmul.f32 0.03125, %v1269_v41 }
 0xbc1   : > { %2718 = vrsqrt.f32 %v1272_v42  ;;  %v1273_v44 = vadd.f32 1e-06, %v1271_v43 }
 0xbc3   : > { %2720 = vrsqrt.f32 %v1273_v44  ;;  %v2688_v44 = vld [vmem:[%s3545_s6 + $0x10] sm:$0xff]  }
 0xbc4   : > { %2522 = vmatpush3.bf16.msra.mxu0 %v2688_v44 }
 0xbc5   : > { %2523 = vmatprep.subr.bf16.mxu0 %v2928_v39 }
 0xbcb   : > { %v2719_v45 = vpop.eup %2718 }
 0xbcc   : > { %v1276_v47 = vmul.f32 %v2719_v45, %v1260_v31  ;;  %v2689_v45 = vld [vmem:[%s3545_s6 + $0x18] sm:$0xff]  }
 0xbcd   : > { %v2721_v48 = vpop.eup %2720  ;;  %2524 = vmatpush3.bf16.msra.mxu0 %v2689_v45 }
 0xbce   : > { %v1284_v49 = vmul.f32 %v2343_v46, %v1276_v47  ;;  %v1277_v50 = vmul.f32 %v2721_v48, %v1261_v32  ;;  %2529 = vmatprep.subr.bf16.mxu0 %v2928_v39 }
 0xbd0   : > { %v1285_v52 = vmul.f32 %v2343_v46, %v1277_v50  ;;  %v1292_v53 = vadd.f32 %v2344_v51, %v1284_v49 }
 0xbd2   : > { %v1293_v54 = vadd.f32 %v2344_v51, %v1285_v52 }
 0xbd4   : > { %v1299_v55 = vpack.c.bf16 %v1293_v54, %v1292_v53  ;;  %v2357_v53 = vld [vmem:[%s3543_s4 + $0x1] ss:$0 sm:$0xff] }
 0xbd6   : > { %2506 = vmatmul.mubr.msk.bf16.vlgmr.msra.gmra.mrb[24].mxu1 %vm811_vm1, %v1299_v55 }
 0xbd7   : > { %2517 = vmatprep.mubr.msk.bf16.mxu1 %vm2929_vm2, %v2928_v39  ;;  %2510 = vmatpush3.bf16.msra.mxu1 %v2684_v56 }
 0xbd8   : > { %2511 = vmatprep.subr.bf16.mxu1 %v2928_v39 }
 0xbdb   : > { %2512 = vmatpush3.bf16.msra.mxu1 %v2685_v57 }
 0xbdc   : > { %2513 = vmatprep.subr.bf16.mxu1 %v2928_v39 }
 0xbdf   : > { %2514 = vmatpush3.bf16.msra.mxu1 %v2686_v58  ;;  %v2358_v58 = vld [vmem:[%s3544_s5 + $0x1] ss:$0 sm:$0xff] }
 0xbe0   : > { %2515 = vmatprep.subr.bf16.mxu1 %v2928_v39 }
 0xbe3   : > { %2516 = vmatpush3.bf16.msra.mxu1 %v2687_v59 }
 0xbe4   : > { %2535 = vmatprep.subr.bf16.mxu1 %v2928_v39 }
 0xca9   : > { %v1355_v61 = vpop.f32.mrb[24].mxu1 }
 0xcaa   : > { %v1356_v62 = vadd.f32 %v2345_v60, %v1355_v61  ;;  %v2507_v63 = vpop.f32.mrb[25].mxu1 }
 0xcab   : > { %v1358_v0 = vpop.f32.mrb[26].mxu1  ;;  %v2364_v63 = vld [vmem:[%s3546_s7 + $0x1] ss:$0 sm:$0xff] }
 0xcac   : > { %v1362_v2 = vmul.f32 %v1356_v62, %v1356_v62  ;;  %v1359_v1 = vadd.f32 %v2345_v60, %v1358_v0  ;;  %v2508_v3 = vpop.f32.mrb[27].mxu1 }
 0xcae   : > { %v1364_v4 = vmul.f32 %v1362_v2, %v1356_v62  ;;  %v1363_v5 = vmul.f32 %v1359_v1, %v1359_v1 }
 0xcb0   : > { %v1366_v6 = vmul.f32 0.044715, %v1364_v4  ;;  %v1365_v7 = vmul.f32 %v1363_v5, %v1359_v1 }
 0xcb2   : > { %v1368_v8 = vadd.f32 %v1366_v6, %v1356_v62  ;;  %v1367_v9 = vmul.f32 0.044715, %v1365_v7 }
 0xcb4   : > { %v1370_v10 = vmul.f32 0.7978846, %v1368_v8  ;;  %v1369_v11 = vadd.f32 %v1367_v9, %v1359_v1 }
 0xcb6   : > { %2722 = vtanh.f32 %v1370_v10  ;;  %v1371_v12 = vmul.f32 0.7978846, %v1369_v11 }
 0xcb8   : > { %2724 = vtanh.f32 %v1371_v12 }
 0xcc0   : > { %v2723_v13 = vpop.eup %2722 }
 0xcc1   : > { %v1374_v14 = vadd.f32 1.0, %v2723_v13 }
 0xcc2   : > { %v2725_v15 = vpop.eup %2724 }
 0xcc3   : > { %v1376_v16 = vmul.f32 0.5, %v1374_v14  ;;  %v1375_v17 = vadd.f32 1.0, %v2725_v15 }
 0xcc5   : > { %v1377_v18 = vmul.f32 0.5, %v1375_v17  ;;  %v1378_v19 = vmul.f32 %v1376_v16, %v1356_v62 }
 0xcc7   : > { %v1379_v21 = vmul.f32 %v1377_v18, %v1359_v1 }
 0xcc9   : > { %v1389_v23 = vpack.c.bf16 %v1379_v21, %v1378_v19 }
 0xccb   : > { %2518 = vmatmul.mubr.msk.bf16.vlgmr.msra.gmra.mrb[28].mxu1 %vm760_vm0, %v1389_v23 }
 0xccc   : > { %2537 = vmatprep.mubr.msk.bf16.mxu1 %vm2929_vm2, %v2928_v39 }
 0xd9e   : > { %v1457_v27 = vpop.f32.mrb[28].mxu1 }
 0xd9f   : > { %v1458_v28 = vadd.f32 %v2349_v26, %v1457_v27  ;;  %v2519_v29 = vpop.f32.mrb[29].mxu1 }
 0xda0   : > { %v1460_v30 = vpop.f32.mrb[30].mxu1 }
 0xda1   : > { %v3393_v31 = vadd.f32 %v1458_v28, %v3343_v20  ;;  %v1461_v22 = vadd.f32 %v2349_v26, %v1460_v30  ;;  %v2520_v32 = vpop.f32.mrb[31].mxu1 }
 0xda3   : > { %v3396_v33 = vadd.f32 %v1461_v22, %v3346_v24  ;;  %v1470_v25 = vsel %vm811_vm1, %v3393_v31, 0.0 }
 0xda4   : > { %1471 = vadd.xlane.f32.xlu0 %v1470_v25 }
 0xda5   : > { %v1473_v34 = vsel %vm811_vm1, %v3396_v33, 0.0 }
 0xda6   : > { %1474 = vadd.xlane.f32.xlu1 %v1473_v34 }
 0xe31   : > { %v1472_v35 = vpop.xlane.xlu0 %1471 }
 0xe32   : > { %v1476_v36 = vmul.f32 0.03125, %v1472_v35 }
 0xe33   : > { %v1475_v37 = vpop.xlane.xlu1 %1474 }
 0xe34   : > { %v1478_v38 = vsub.f32 %v3393_v31, %v1476_v36  ;;  %v1477_v20 = vmul.f32 0.03125, %v1475_v37 }
 0xe36   : > { %v1479_v40 = vsub.f32 %v3396_v33, %v1477_v20  ;;  %v1480_v41 = vmul.f32 %v1478_v38, %v1478_v38 }
 0xe38   : > { %v1482_v24 = vsel %vm811_vm1, %v1480_v41, 0.0  ;;  %v1481_v42 = vmul.f32 %v1479_v40, %v1479_v40 }
 0xe39   : > { %1483 = vadd.xlane.f32.xlu0 %v1482_v24 }
 0xe3a   : > { %v1485_v43 = vsel %vm811_vm1, %v1481_v42, 0.0 }
 0xe3b   : > { %1486 = vadd.xlane.f32.xlu1 %v1485_v43 }
 0xec6   : > { %v1484_v46 = vpop.xlane.xlu0 %1483 }
 0xec7   : > { %v1488_v47 = vmul.f32 0.03125, %v1484_v46 }
 0xec8   : > { %v1487_v48 = vpop.xlane.xlu1 %1486 }
 0xec9   : > { %v1490_v49 = vadd.f32 1e-06, %v1488_v47  ;;  %v1489_v50 = vmul.f32 0.03125, %v1487_v48 }
 0xecb   : > { %2726 = vrsqrt.f32 %v1490_v49  ;;  %v1491_v51 = vadd.f32 1e-06, %v1489_v50 }
 0xecd   : > { %2728 = vrsqrt.f32 %v1491_v51 }
 0xed5   : > { %v2727_v52 = vpop.eup %2726 }
 0xed6   : > { %v1494_v54 = vmul.f32 %v2727_v52, %v1478_v38 }
 0xed7   : > { %v2729_v55 = vpop.eup %2728 }
 0xed8   : > { %v1502_v56 = vmul.f32 %v2357_v53, %v1494_v54  ;;  %v1495_v57 = vmul.f32 %v2729_v55, %v1479_v40 }
 0xeda   : > { %v1503_v59 = vmul.f32 %v2357_v53, %v1495_v57  ;;  %v1510_v60 = vadd.f32 %v2358_v58, %v1502_v56 }
 0xedc   : > { %v1511_v61 = vadd.f32 %v2358_v58, %v1503_v59 }
 0xede   : > { %v1519_v62 = vpack.c.bf16 %v1511_v61, %v1510_v60 }
 0xee0   : > { %2526 = vmatmul.mubr.msk.bf16.vlgmr.msra.gmra.mrb[4].mxu0 %vm811_vm1, %v1519_v62 }
 0xee1   : > { %2531 = vmatprep.mubr.msk.bf16.mxu0 %vm2929_vm2, %v2928_v39 }
 0xfb3   : > { %v1575_v0 = vpop.f32.mrb[4].mxu0 }
 0xfb4   : > { %v2527_v2 = vpop.f32.mrb[5].mxu0  ;;  %v1576_v3 = vadd.f32 %v2364_v63, %v1575_v0 }
 0xfb5   : > { %v1578_v1 = vpop.f32.mrb[6].mxu0 }
 0xfb6   : > { %v1579_v4 = vadd.f32 %v2364_v63, %v1578_v1  ;;  %v2528_v5 = vpop.f32.mrb[7].mxu0 }
 0xfb8   : > { %v3426_v6 = vpack.c.bf16 %v1579_v4, %v1576_v3  ;;  %v2690_v3 = vld [vmem:[%s3547_s8 + $0x10] sm:$0xff]  }
 0xfba   : > { %1707 = vrot.lane.b32.xlu1 %v3426_v6, %s2931_s27  ;;  %1584 = vrot.lane.b32.xlu0 %v3426_v6, %s2930_s1 }
 0xfbe   : > { %1705 = vrot.lane.b32.xlu1 %v3426_v6, %s2932_s22 }
0x102c   : > { %v1585_v7 = vpop.permute.xlu0 %1584  ;;  %v1708_v9 = vpop.permute.xlu1 %1707 }
0x102d   : > { %v1590_v8 = vsel %vm927_vm3, %v1585_v7, 0  ;;  %v1713_v10 = vsel %vm927_vm3, %v1708_v9, 0 }
0x102e   : > { %2530 = vmatpush3.bf16.xpose.msra.mxu0 %v1590_v8  ;;  %v2691_v8 = vld [vmem:[%s3547_s8 + $0x18] sm:$0xff]  }
0x102f   : > { %2541 = vmatprep.subr.bf16.mxu0 %v2928_v39 }
0x1030   : > { %v1706_v11 = vpop.permute.xlu1 %1705 }
0x1035   : > { %2532 = vmatmul.mubr.msk.bf16.vlgmr.msra.gmra.mrb[8].mxu0 %vm927_vm3, %v3426_v6 }
0x1036   : > { %2542 = vmatpush3.bf16.xpose.msra.mxu0 %v1713_v10  ;;  %2543 = vmatprep.mubr.msk.bf16.mxu0 %vm2929_vm2, %v2928_v39 }
0x1037   : > { %2553 = vmatprep.subr.bf16.mxu0 %v2928_v39 }
0x103d   : > { %2544 = vmatmul.mubr.msk.bf16.vlgmr.msra.gmra.mrb[12].mxu0 %vm927_vm3, %v1706_v11 }
0x103e   : > { %2557 = vmatprep.mubr.msk.bf16.mxu0 %vm2929_vm2, %v2928_v39  ;;  %2554 = vmatpush3.bf16.msra.mxu0 %v2690_v3 }
0x103f   : > { %2555 = vmatprep.subr.bf16.mxu0 %v2928_v39 }
0x1042   : > { %2556 = vmatpush3.bf16.msra.mxu0 %v2691_v8 }
0x1043   : > { %2569 = vmatprep.subr.bf16.mxu0 %v2928_v39 }
0x1108   : > { %v1626_v12 = vpop.f32.mrb[8].mxu0 }
0x1109   : > { %v1633_v13 = vmul.f32 0.25, %v1626_v12  ;;  %v2533_v14 = vpop.f32.mrb[9].mxu0 }
0x110a   : > { %v1629_v15 = vpop.f32.mrb[10].mxu0 }
0x110b   : > { %v1634_v16 = vmul.f32 0.25, %v1629_v15  ;;  %v2534_v17 = vpop.f32.mrb[11].mxu0  ;;  %v1635_v18 = vsel %vm927_vm3, %v1633_v13, -inf }
0x110c   : > { %1636 = vmax.xlane.f32.xlu1 %v1635_v18 }
0x110d   : > { %v1638_v19 = vsel %vm927_vm3, %v1634_v16, -inf }
0x110e   : > { %1639 = vmax.xlane.f32.xlu0 %v1638_v19 }
0x1110   : > { %v1749_v21 = vpop.f32.mrb[12].mxu0 }
0x1111   : > { %v1756_v23 = vmul.f32 0.25, %v1749_v21  ;;  %v2545_v26 = vpop.f32.mrb[13].mxu0  ;;  %v2377_v21 = vld [vmem:[%s3548_s9 + $0x1] ss:$0 sm:$0xff] }
0x1112   : > { %v1752_v27 = vpop.f32.mrb[14].mxu0 }
0x1113   : > { %v1757_v28 = vmul.f32 0.25, %v1752_v27  ;;  %v2546_v29 = vpop.f32.mrb[15].mxu0  ;;  %v1758_v30 = vsel %vm927_vm3, %v1756_v23, -inf }
0x1114   : > { %1759 = vmax.xlane.f32.xlu0 %v1758_v30 }
0x1115   : > { %v1761_v22 = vsel %vm927_vm3, %v1757_v28, -inf }
0x1118   : > { %1762 = vmax.xlane.f32.xlu0 %v1761_v22 }
0x1199   : > { %v1637_v32 = vpop.xlane.xlu1 %1636 }
0x119a   : > { %v1641_v25 = vsub.f32 %v1633_v13, %v1637_v32 }
0x119b   : > { %v1640_v34 = vpop.xlane.xlu0 %1639 }
0x119c   : > { %v1643_v35 = vmul.f32 1.442695, %v1641_v25  ;;  %v1642_v36 = vsub.f32 %v1634_v16, %v1640_v34 }
0x119e   : > { %2730 = vpow2.f32 %v1643_v35  ;;  %v1645_v37 = vmul.f32 1.442695, %v1642_v36 }
0x11a0   : > { %2732 = vpow2.f32 %v1645_v37 }
0x11a1   : > { %v1760_v38 = vpop.xlane.xlu0 %1759 }
0x11a2   : > { %v1764_v20 = vsub.f32 %v1756_v23, %v1760_v38 }
0x11a4   : > { %v1766_v40 = vmul.f32 1.442695, %v1764_v20 }
0x11a5   : > { %v1763_v41 = vpop.xlane.xlu0 %1762 }
0x11a6   : > { %2734 = vpow2.f32 %v1766_v40  ;;  %v1765_v24 = vsub.f32 %v1757_v28, %v1763_v41 }
0x11a8   : > { %v2731_v42 = vpop.eup %2730  ;;  %v1768_v43 = vmul.f32 1.442695, %v1765_v24 }
0x11a9   : > { %v1647_v44 = vsel %vm927_vm3, %v2731_v42, 0.0 }
0x11aa   : > { %v2733_v45 = vpop.eup %2732  ;;  %2736 = vpow2.f32 %v1768_v43  ;;  %1648 = vadd.xlane.f32.xlu1 %v1647_v44  ;;  %v2693_v43 = vld [vmem:[%s3551_s12 + $0x18] sm:$0xff]  }
0x11ab   : > { %v1650_v46 = vsel %vm927_vm3, %v2733_v45, 0.0 }
0x11ac   : > { %1651 = vadd.xlane.f32.xlu0 %v1650_v46 }
0x11b0   : > { %v2735_v47 = vpop.eup %2734 }
0x11b1   : > { %v1770_v48 = vsel %vm927_vm3, %v2735_v47, 0.0 }
0x11b2   : > { %1771 = vadd.xlane.f32.xlu1 %v1770_v48 }
0x11b4   : > { %v2737_v49 = vpop.eup %2736 }
0x11b5   : > { %v1773_v50 = vsel %vm927_vm3, %v2737_v49, 0.0 }
0x11b6   : > { %1774 = vadd.xlane.f32.xlu0 %v1773_v50 }
0x11c3   : > { %1658 = vrot.lane.b32.xlu1 %v3426_v6, %s2933_s11 }
0x11cc   : > { %1781 = vrot.lane.b32.xlu0 %v3426_v6, %s2934_s13 }
0x1237   : > { %v1649_v51 = vpop.xlane.xlu1 %1648 }
0x1238   : > { %2738 = vrcp.f32 %v1649_v51  ;;  %v2383_v51 = vld [vmem:[%s3549_s10 + $0x1] ss:$0 sm:$0xff] }
0x1239   : > { %v1652_v52 = vpop.xlane.xlu0 %1651 }
0x123a   : > { %2740 = vrcp.f32 %v1652_v52 }
0x123f   : > { %v1772_v53 = vpop.xlane.xlu1 %1771 }
0x1240   : > { %2742 = vrcp.f32 %v1772_v53 }
0x1242   : > { %v2739_v54 = vpop.eup %2738 }
0x1243   : > { %v1659_v55 = vpop.permute.xlu1 %1658  ;;  %v1775_v56 = vpop.xlane.xlu0 %1774  ;;  %v1655_v58 = vmul.f32 %v2739_v54, %v2731_v42  ;;  %v2692_v42 = vld [vmem:[%s3551_s12 + $0x10] sm:$0xff]  }
0x1244   : > { %v2741_v57 = vpop.eup %2740  ;;  %2744 = vrcp.f32 %v1775_v56  ;;  %2536 = vmatpush3.bf16.msra.mxu1 %v1659_v55  ;;  %v2384_v56 = vld [vmem:[%s3591_s14 + $0x1] ss:$0 sm:$0xff] }
0x1245   : > { %v1656_v59 = vmul.f32 %v2741_v57, %v2733_v45  ;;  %2547 = vmatprep.subr.bf16.mxu1 %v2928_v39 }
0x1247   : > { %v1782_v60 = vpop.permute.xlu0 %1781  ;;  %v1657_v61 = vpack.c.bf16 %v1656_v59, %v1655_v58 }
0x1249   : > { %2538 = vmatmul.mubr.msk.bf16.vlgmr.msra.gmra.mrb[32].mxu1 %vm927_vm3, %v1657_v61  ;;  %v2694_v61 = vld [vmem:[%s3592_s19 + $0x20] sm:$0xff]  }
0x124a   : > { %2548 = vmatpush3.bf16.msra.mxu1 %v1782_v60  ;;  %2549 = vmatprep.mubr.msk.bf16.mxu1 %vm2929_vm2, %v2928_v39  ;;  %v2743_v62 = vpop.eup %2742 }
0x124b   : > { %2561 = vmatprep.subr.bf16.mxu1 %v2928_v39  ;;  %v1778_v0 = vmul.f32 %v2743_v62, %v2735_v47  ;;  %v2695_v62 = vld [vmem:[%s3592_s19 + $0x28] sm:$0xff]  }
0x124e   : > { %v2745_v63 = vpop.eup %2744 }
0x124f   : > { %v1779_v2 = vmul.f32 %v2745_v63, %v2737_v49  ;;  %v2696_v63 = vld [vmem:[%s3592_s19 + $0x30] sm:$0xff]  }
0x1251   : > { %v1780_v1 = vpack.c.bf16 %v1779_v2, %v1778_v0  ;;  %v2697_v0 = vld [vmem:[%s3592_s19 + $0x38] sm:$0xff]   ;;  %v2389_v2 = vld [vmem:[#allocation4 + $0x1] ss:$0 sm:$0xff] }
0x1253   : > { %2550 = vmatmul.mubr.msk.bf16.vlgmr.msra.gmra.mrb[36].mxu1 %vm927_vm3, %v1780_v1 }
0x1254   : > { %2565 = vmatprep.mubr.msk.bf16.mxu1 %vm2929_vm2, %v2928_v39  ;;  %2562 = vmatpush3.bf16.msra.mxu1 %v2692_v42 }
0x1255   : > { %2563 = vmatprep.subr.bf16.mxu1 %v2928_v39 }
0x1258   : > { %2564 = vmatpush3.bf16.msra.mxu1 %v2693_v43 }
0x131c   : > { %v1698_v4 = vpop.f32.mrb[32].mxu1 }
0x131d   : > { %v2539_v5 = vpop.f32.mrb[33].mxu1 }
0x131e   : > { %v1701_v6 = vpop.f32.mrb[34].mxu1 }
0x131f   : > { %v2540_v7 = vpop.f32.mrb[35].mxu1 }
0x1326   : > { %v1821_v9 = vpop.f32.mrb[36].mxu1 }
0x1327   : > { %v2551_v10 = vpop.f32.mrb[37].mxu1 }
0x1328   : > { %v1824_v11 = vpop.f32.mrb[38].mxu1 }
0x1329   : > { %v2658_v12 = vpack.i.bf16 %v1824_v11, %v1821_v9  ;;  %v2552_v13 = vpop.f32.mrb[39].mxu1 }
0x132b   : > { %2659 = vrot.lane.b32.xlu1 %v2658_v12, %s2935_s29 }
0x139d   : > { %v2660_v14 = vpop.permute.xlu1 %2659 }
0x139e   : > { %v2662_v15 = vunpack.i.h.bf16 %v2660_v14  ;;  %v2661_v16 = vunpack.i.l.bf16 %v2660_v14 }
0x13a0   : > { %v1837_v17 = vsel %vm927_vm3, %v1701_v6, %v2662_v15  ;;  %v1836_v18 = vsel %vm927_vm3, %v1698_v4, %v2661_v16 }
0x13a1   : > { %v1845_v19 = vpack.c.bf16 %v1837_v17, %v1836_v18 }
0x13a3   : > { %2558 = vmatmul.mubr.msk.bf16.vlgmr.msra.gmra.mrb[16].mxu0 %vm811_vm1, %v1845_v19 }
0x13a4   : > { %2577 = vmatprep.mubr.msk.bf16.mxu0 %vm2929_vm2, %v2928_v39  ;;  %2570 = vmatpush3.bf16.msra.mxu0 %v2694_v61 }
0x13a5   : > { %2571 = vmatprep.subr.bf16.mxu0 %v2928_v39 }
0x13a8   : > { %2572 = vmatpush3.bf16.msra.mxu0 %v2695_v62 }
0x13a9   : > { %2573 = vmatprep.subr.bf16.mxu0 %v2928_v39 }
0x13ac   : > { %2574 = vmatpush3.bf16.msra.mxu0 %v2696_v63 }
0x13ad   : > { %2575 = vmatprep.subr.bf16.mxu0 %v2928_v39 }
0x13b0   : > { %2576 = vmatpush3.bf16.msra.mxu0 %v2697_v0 }
0x1476   : > { %v1901_v23 = vpop.f32.mrb[16].mxu0 }
0x1477   : > { %v1902_v26 = vadd.f32 %v2377_v21, %v1901_v23  ;;  %v2559_v27 = vpop.f32.mrb[17].mxu0 }
0x1478   : > { %v1904_v28 = vpop.f32.mrb[18].mxu0 }
0x1479   : > { %v3483_v29 = vadd.f32 %v1902_v26, %v3393_v31  ;;  %v1905_v30 = vadd.f32 %v2377_v21, %v1904_v28  ;;  %v2560_v22 = vpop.f32.mrb[19].mxu0 }
0x147a   : > { %v2401_v22 = vld [vmem:[#allocation6 + $0x1] ss:$0 sm:$0xff] }
0x147b   : > { %v3486_v32 = vadd.f32 %v1905_v30, %v3396_v33  ;;  %v1914_v25 = vsel %vm811_vm1, %v3483_v29, 0.0 }
0x147c   : > { %1915 = vadd.xlane.f32.xlu1 %v1914_v25 }
0x147d   : > { %v1917_v34 = vsel %vm811_vm1, %v3486_v32, 0.0 }
0x147e   : > { %1918 = vadd.xlane.f32.xlu0 %v1917_v34 }
0x1509   : > { %v1916_v35 = vpop.xlane.xlu1 %1915 }
0x150a   : > { %v1920_v36 = vmul.f32 0.03125, %v1916_v35 }
0x150b   : > { %v1919_v37 = vpop.xlane.xlu0 %1918 }
0x150c   : > { %v1922_v38 = vsub.f32 %v3483_v29, %v1920_v36  ;;  %v1921_v31 = vmul.f32 0.03125, %v1919_v37 }
0x150e   : > { %v1923_v20 = vsub.f32 %v3486_v32, %v1921_v31  ;;  %v1924_v40 = vmul.f32 %v1922_v38, %v1922_v38 }
0x1510   : > { %v1926_v33 = vsel %vm811_vm1, %v1924_v40, 0.0  ;;  %v1925_v41 = vmul.f32 %v1923_v20, %v1923_v20 }
0x1511   : > { %1927 = vadd.xlane.f32.xlu0 %v1926_v33 }
0x1512   : > { %v1929_v24 = vsel %vm811_vm1, %v1925_v41, 0.0 }
0x1513   : > { %1930 = vadd.xlane.f32.xlu1 %v1929_v24 }
0x159e   : > { %v1928_v44 = vpop.xlane.xlu0 %1927 }
0x159f   : > { %v1932_v45 = vmul.f32 0.03125, %v1928_v44 }
0x15a0   : > { %v1931_v46 = vpop.xlane.xlu1 %1930 }
0x15a1   : > { %v1934_v47 = vadd.f32 1e-06, %v1932_v45  ;;  %v1933_v48 = vmul.f32 0.03125, %v1931_v46 }
0x15a3   : > { %2746 = vrsqrt.f32 %v1934_v47  ;;  %v1935_v49 = vadd.f32 1e-06, %v1933_v48 }
0x15a5   : > { %2748 = vrsqrt.f32 %v1935_v49 }
0x15ad   : > { %v2747_v50 = vpop.eup %2746 }
0x15ae   : > { %v1938_v52 = vmul.f32 %v2747_v50, %v1922_v38 }
0x15af   : > { %v2749_v53 = vpop.eup %2748 }
0x15b0   : > { %v1946_v54 = vmul.f32 %v2383_v51, %v1938_v52  ;;  %v1939_v55 = vmul.f32 %v2749_v53, %v1923_v20 }
0x15b2   : > { %v1947_v57 = vmul.f32 %v2383_v51, %v1939_v55  ;;  %v1954_v58 = vadd.f32 %v2384_v56, %v1946_v54  ;;  %v2407_v55 = vld [vmem:[#allocation7] ss:$0 sm:$0xff] }
0x15b4   : > { %v1955_v59 = vadd.f32 %v2384_v56, %v1947_v57 }
0x15b6   : > { %v1963_v60 = vpack.c.bf16 %v1955_v59, %v1954_v58  ;;  %v2408_v58 = vld [vmem:[#allocation9] ss:$0 sm:$0xff] }
0x15b8   : > { %2566 = vmatmul.mubr.msk.bf16.vlgmr.msra.gmra.mrb[40].mxu1 %vm811_vm1, %v1963_v60 }
0x168b   : > { %v2019_v1 = vpop.f32.mrb[40].mxu1 }
0x168c   : > { %v2020_v3 = vadd.f32 %v2389_v2, %v2019_v1  ;;  %v2567_v4 = vpop.f32.mrb[41].mxu1 }
0x168d   : > { %v2022_v5 = vpop.f32.mrb[42].mxu1 }
0x168e   : > { %v2026_v6 = vmul.f32 %v2020_v3, %v2020_v3  ;;  %v2023_v7 = vadd.f32 %v2389_v2, %v2022_v5  ;;  %v2568_v8 = vpop.f32.mrb[43].mxu1 }
0x1690   : > { %v2028_v9 = vmul.f32 %v2026_v6, %v2020_v3  ;;  %v2027_v10 = vmul.f32 %v2023_v7, %v2023_v7 }
0x1692   : > { %v2030_v11 = vmul.f32 0.044715, %v2028_v9  ;;  %v2029_v12 = vmul.f32 %v2027_v10, %v2023_v7 }
0x1694   : > { %v2032_v13 = vadd.f32 %v2030_v11, %v2020_v3  ;;  %v2031_v14 = vmul.f32 0.044715, %v2029_v12 }
0x1696   : > { %v2034_v39 = vmul.f32 0.7978846, %v2032_v13  ;;  %v2033_v15 = vadd.f32 %v2031_v14, %v2023_v7 }
0x1698   : > { %2750 = vtanh.f32 %v2034_v39  ;;  %v2035_v16 = vmul.f32 0.7978846, %v2033_v15 }
0x169a   : > { %2752 = vtanh.f32 %v2035_v16 }
0x16a2   : > { %v2751_v17 = vpop.eup %2750 }
0x16a3   : > { %v2038_v18 = vadd.f32 1.0, %v2751_v17 }
0x16a4   : > { %v2753_v19 = vpop.eup %2752 }
0x16a5   : > { %v2040_v21 = vmul.f32 0.5, %v2038_v18  ;;  %v2039_v23 = vadd.f32 1.0, %v2753_v19 }
0x16a7   : > { %v2041_v26 = vmul.f32 0.5, %v2039_v23  ;;  %v2042_v27 = vmul.f32 %v2040_v21, %v2020_v3 }
0x16a9   : > { %v2043_v28 = vmul.f32 %v2041_v26, %v2023_v7 }
0x16ab   : > { %v2055_v30 = vpack.c.bf16 %v2043_v28, %v2042_v27 }
0x16ad   : > { %2578 = vmatmul.mubr.msk.bf16.vlgmr.msra.gmra.mrb[20].mxu0 %vm760_vm0, %v2055_v30 }
0x1780   : > { %v2123_v25 = vpop.f32.mrb[20].mxu0 }
0x1781   : > { %v2124_v34 = vadd.f32 %v2401_v22, %v2123_v25  ;;  %v2579_v35 = vpop.f32.mrb[21].mxu0 }
0x1782   : > { %v2126_v36 = vpop.f32.mrb[22].mxu0 }
0x1783   : > { %v2127_v37 = vadd.f32 %v2401_v22, %v2126_v36  ;;  %v2580_v38 = vpop.f32.mrb[23].mxu0  ;;  %v2130_v31 = vadd.f32 %v2124_v34, %v3483_v29 }
0x1785   : > { %v2134_v20 = vsel %vm811_vm1, %v2130_v31, 0.0  ;;  %v2131_v40 = vadd.f32 %v2127_v37, %v3486_v32 }
0x1786   : > { %2135 = vadd.xlane.f32.xlu0 %v2134_v20 }
0x1787   : > { %v2137_v33 = vsel %vm811_vm1, %v2131_v40, 0.0 }
0x1788   : > { %2138 = vadd.xlane.f32.xlu1 %v2137_v33 }
0x1813   : > { %v2136_v41 = vpop.xlane.xlu0 %2135 }
0x1814   : > { %v2140_v24 = vmul.f32 0.03125, %v2136_v41 }
0x1815   : > { %v2139_v42 = vpop.xlane.xlu1 %2138 }
0x1816   : > { %v2142_v43 = vsub.f32 %v2130_v31, %v2140_v24  ;;  %v2141_v44 = vmul.f32 0.03125, %v2139_v42 }
0x1818   : > { %v2143_v45 = vsub.f32 %v2131_v40, %v2141_v44  ;;  %v2144_v46 = vmul.f32 %v2142_v43, %v2142_v43 }
0x181a   : > { %v2146_v47 = vsel %vm811_vm1, %v2144_v46, 0.0  ;;  %v2145_v48 = vmul.f32 %v2143_v45, %v2143_v45 }
0x181b   : > { %2147 = vadd.xlane.f32.xlu0 %v2146_v47 }
0x181c   : > { %v2149_v29 = vsel %vm811_vm1, %v2145_v48, 0.0 }
0x181d   : > { %2150 = vadd.xlane.f32.xlu1 %v2149_v29 }
0x18a8   : > { %v2148_v32 = vpop.xlane.xlu0 %2147 }
0x18a9   : > { %v2152_v49 = vmul.f32 0.03125, %v2148_v32 }
0x18aa   : > { %v2151_v50 = vpop.xlane.xlu1 %2150 }
0x18ab   : > { %v2154_v51 = vadd.f32 1e-06, %v2152_v49  ;;  %v2153_v52 = vmul.f32 0.03125, %v2151_v50 }
0x18ad   : > { %2754 = vrsqrt.f32 %v2154_v51  ;;  %v2155_v53 = vadd.f32 1e-06, %v2153_v52 }
0x18af   : > { %2756 = vrsqrt.f32 %v2155_v53 }
0x18b7   : > { %v2755_v54 = vpop.eup %2754 }
0x18b8   : > { %v2158_v56 = vmul.f32 %v2755_v54, %v2142_v43 }
0x18b9   : > { %v2757_v57 = vpop.eup %2756 }
0x18ba   : > { %v2166_v59 = vmul.f32 %v2407_v55, %v2158_v56  ;;  %v2159_v60 = vmul.f32 %v2757_v57, %v2143_v45 }
0x18bc   : > { %v2174_v61 = vadd.f32 %v2408_v58, %v2166_v59  ;;  %v2167_v62 = vmul.f32 %v2407_v55, %v2159_v60 }
0x18be   : > { %v2176_v63 = vmax.f32 %v2174_v61, 0.0  ;;  %v2175_v0 = vadd.f32 %v2408_v58, %v2167_v62 }
0x18c0   : > { %v2415_v2 = vpack.c.bf16 %v2176_v63, %v2176_v63  ;;  %v2177_v1 = vmax.f32 %v2175_v0, 0.0 }
0x18c2   : > { %2187 = vst.msk [vmem:[%s644_s23] sm:$0xf] %vm2186_vm4, %v2415_v2  ;;  %v2416_v3 = vpack.c.bf16 %v2177_v1, %v2177_v1 }
0x18c4   : > { %2188 = vst.msk [vmem:[%s644_s23 + $0x4] sm:$0xf] %vm2186_vm4, %v2416_v3 }
0x18c5 PF: > { %s3594_s25 = sld [smem:[#allocation13_spill]] }
0x18cb   : > { %s31_s27 = sadd.s32 1, %s3594_s25  }
0x18cc   : > { %p28_p6 = scmp.ge.s32.totalorder %s31_s27, 4  }
0x18ce   :  { %30 = sbr.rel (!%p28_p6) target bundleno = 11 (0xb), region = 155 }
0x18d5   :  { %2210 = vsyncpa [#allocation3], 1 }
0x18d6   :  { %2212 = vsyncpa [#allocation3 + $0x1], 1 }
0x18d7   :  { %2213 = vsyncpa [#allocation5], 1 }
0x18d8   :  { %2214 = vsyncpa [#allocation8], 1 }

// kernel: vitpose_forward.3
= control target key start
LH: loop header
LB: loop body
LE: loop exit
PB: predicated region body
PF: predicated region fallthrough
CT: control target
= control target key end

     0   :  { %v273_v35 = vlaneseq  ;;  %v2283_v36 = vmov 1966171168   ;;  %s3134_s1 = inlined_call_operand.vmem [shape: bf16[512,1024], index: 1, kind: input, shape index: {}]   ;;  %s3135_s0 = inlined_call_operand.vmem [shape: bf16[2,512], index: 0, kind: input, shape index: {}]   ;;  %s3136_s2 = inlined_call_operand.vmem [shape: f32[1,1024], index: 2, kind: input, shape index: {}]   ;;  %s3137_s3 = inlined_call_operand.vmem [shape: f32[2,1024], index: 3, kind: output, shape index: {}]  }
   0x1   :  { %v15_v0 = vld [vmem:[%s3134_s1] sm:$0xff]  ;;  %v16_v2 = vld [vmem:[%s3134_s1 + $0x8] sm:$0xff]  ;;  %v323_v37 = vunpack.c.l.s4 %v2283_v36 }
   0x2   :  { %v19_v1 = vld [vmem:[%s3134_s1 + $0x20] sm:$0xff]  ;;  %v20_v4 = vld [vmem:[%s3134_s1 + $0x28] sm:$0xff]  ;;  %v2377_v46 = vshrl.u32 %v273_v35, 7 }
   0x3   :  { %v2002_v3 = vcombine.high %v15_v0, %v19_v1  ;;  %v2001_v5 = vcombine.low %v15_v0, %v19_v1  ;;  %v23_v6 = vld [vmem:[%s3134_s1 + $0x40] sm:$0xff]  ;;  %v2004_v8 = vcombine.high %v16_v2, %v20_v4  ;;  %v2003_v9 = vcombine.low %v16_v2, %v20_v4  ;;  %v24_v11 = vld [vmem:[%s3134_s1 + $0x48] sm:$0xff] }
   0x4   :  { %v27_v7 = vld [vmem:[%s3134_s1 + $0x60] sm:$0xff]  ;;  %v28_v12 = vld [vmem:[%s3134_s1 + $0x68] sm:$0xff]  ;;  %v324_v47 = vunpack.c.0.s8 %v323_v37 }
   0x5   :  { %v2010_v10 = vcombine.high %v23_v6, %v27_v7  ;;  %v31_v13 = vld [vmem:[%s3134_s1 + $0x80] sm:$0xff]  ;;  %1622 = vmatprep.subr.bf16.mxu0 %v2002_v3  ;;  %v2012_v14 = vcombine.high %v24_v11, %v28_v12  ;;  %v32_v16 = vld [vmem:[%s3134_s1 + $0x88] sm:$0xff]  ;;  %1704 = vmatprep.subr.bf16.mxu1 %v2004_v8  ;;  %v2009_v18 = vcombine.low %v23_v6, %v27_v7 }
   0x6   :  { %v35_v15 = vld [vmem:[%s3134_s1 + $0xa0] sm:$0xff]  ;;  %v36_v17 = vld [vmem:[%s3134_s1 + $0xa8] sm:$0xff]  ;;  %1623 = vmatpush1.bf16.msra.mxu0 %v2001_v5  ;;  %1705 = vmatpush1.bf16.msra.mxu1 %v2003_v9  ;;  %v2011_v19 = vcombine.low %v24_v11, %v28_v12  ;;  %v2392_v56 = vsub.s32 %v324_v47, %v2377_v46 }
   0x7   :  { %1624 = vmatprep.subr.bf16.mxu0 %v2010_v10  ;;  %v2018_v20 = vcombine.high %v31_v13, %v35_v15  ;;  %1706 = vmatprep.subr.bf16.mxu1 %v2012_v14  ;;  %v2020_v21 = vcombine.high %v32_v16, %v36_v17  ;;  %v39_v22 = vld [vmem:[%s3134_s1 + $0xc0] sm:$0xff]  ;;  %v40_v24 = vld [vmem:[%s3134_s1 + $0xc8] sm:$0xff]  ;;  %v2017_v26 = vcombine.low %v31_v13, %v35_v15 }
   0x8   :  { %v43_v23 = vld [vmem:[%s3134_s1 + $0xe0] sm:$0xff]  ;;  %v44_v25 = vld [vmem:[%s3134_s1 + $0xe8] sm:$0xff]  ;;  %v2019_v27 = vcombine.low %v32_v16, %v36_v17 }
   0x9   :  { %v2026_v28 = vcombine.high %v39_v22, %v43_v23  ;;  %v2028_v29 = vcombine.high %v40_v24, %v44_v25  ;;  %v47_v30 = vld [vmem:[%s3134_s1 + $0x100] sm:$0xff]  ;;  %v48_v32 = vld [vmem:[%s3134_s1 + $0x108] sm:$0xff]  ;;  %v2025_v34 = vcombine.low %v39_v22, %v43_v23  ;;  %v2027_v38 = vcombine.low %v40_v24, %v44_v25 }
   0xa   :  { %1625 = vmatpush1.bf16.msra.mxu0 %v2009_v18  ;;  %1707 = vmatpush1.bf16.msra.mxu1 %v2011_v19  ;;  %v51_v31 = vld [vmem:[%s3134_s1 + $0x120] sm:$0xff]  ;;  %v52_v33 = vld [vmem:[%s3134_s1 + $0x128] sm:$0xff] }
   0xb   :  { %1626 = vmatprep.subr.bf16.mxu0 %v2018_v20  ;;  %1708 = vmatprep.subr.bf16.mxu1 %v2020_v21  ;;  %v2034_v39 = vcombine.high %v47_v30, %v51_v31  ;;  %v2036_v40 = vcombine.high %v48_v32, %v52_v33  ;;  %v55_v41 = vld [vmem:[%s3134_s1 + $0x140] sm:$0xff]  ;;  %v56_v43 = vld [vmem:[%s3134_s1 + $0x148] sm:$0xff]  ;;  %v2033_v45 = vcombine.low %v47_v30, %v51_v31 }
   0xc   :  { %v59_v42 = vld [vmem:[%s3134_s1 + $0x160] sm:$0xff]  ;;  %v60_v44 = vld [vmem:[%s3134_s1 + $0x168] sm:$0xff]  ;;  %v2035_v48 = vcombine.low %v48_v32, %v52_v33 }
   0xd   :  { %v2042_v49 = vcombine.high %v55_v41, %v59_v42  ;;  %v2044_v50 = vcombine.high %v56_v43, %v60_v44  ;;  %v63_v51 = vld [vmem:[%s3134_s1 + $0x180] sm:$0xff]  ;;  %v64_v53 = vld [vmem:[%s3134_s1 + $0x188] sm:$0xff]  ;;  %v2041_v55 = vcombine.low %v55_v41, %v59_v42  ;;  %v2043_v57 = vcombine.low %v56_v43, %v60_v44 }
   0xe   :  { %1627 = vmatpush1.bf16.msra.mxu0 %v2017_v26  ;;  %1709 = vmatpush1.bf16.msra.mxu1 %v2019_v27  ;;  %v67_v52 = vld [vmem:[%s3134_s1 + $0x1a0] sm:$0xff]  ;;  %v68_v54 = vld [vmem:[%s3134_s1 + $0x1a8] sm:$0xff] }
   0xf   :  { %1628 = vmatprep.subr.bf16.mxu0 %v2026_v28  ;;  %1710 = vmatprep.subr.bf16.mxu1 %v2028_v29  ;;  %v2050_v58 = vcombine.high %v63_v51, %v67_v52  ;;  %v2397_v59 = vld.sshfl [vmem:[%s3135_s0] sm:$0x33 pattern:$0x75316420]  ;;  %v2052_v60 = vcombine.high %v64_v53, %v68_v54  ;;  %v72_v0 = vld [vmem:[%s3134_s1 + $0x1c8] sm:$0xff]  ;;  %v2049_v2 = vcombine.low %v63_v51, %v67_v52 }
  0x10   :  { %v71_v61 = vld [vmem:[%s3134_s1 + $0x1c0] sm:$0xff]  ;;  %v321_v63 = vcombine.high %v2397_v59, %v2397_v59  ;;  %v76_v1 = vld [vmem:[%s3134_s1 + $0x1e8] sm:$0xff]  ;;  %v2051_v4 = vcombine.low %v64_v53, %v68_v54 }
  0x11   :  { %v75_v62 = vld [vmem:[%s3134_s1 + $0x1e0] sm:$0xff]  ;;  %v2060_v6 = vcombine.high %v72_v0, %v76_v1  ;;  %v80_v9 = vld [vmem:[%s3134_s1 + $0x208] sm:$0xff]  ;;  %v2059_v12 = vcombine.low %v72_v0, %v76_v1 }
  0x12   :  { %1629 = vmatpush1.bf16.msra.mxu0 %v2025_v34  ;;  %1711 = vmatpush1.bf16.msra.mxu1 %v2027_v38  ;;  %v2414_v3 = vrot.slane %v321_v63, %v2392_v56  ;;  %v2058_v5 = vcombine.high %v71_v61, %v75_v62  ;;  %v79_v7 = vld [vmem:[%s3134_s1 + $0x200] sm:$0xff]  ;;  %v84_v10 = vld [vmem:[%s3134_s1 + $0x228] sm:$0xff]  ;;  %v2057_v11 = vcombine.low %v71_v61, %v75_v62 }
  0x13   :  { %1630 = vmatprep.subr.bf16.mxu0 %v2034_v39  ;;  %1712 = vmatprep.subr.bf16.mxu1 %v2036_v40  ;;  %v83_v8 = vld [vmem:[%s3134_s1 + $0x220] sm:$0xff]  ;;  %v2068_v14 = vcombine.high %v80_v9, %v84_v10  ;;  %v88_v17 = vld [vmem:[%s3134_s1 + $0x248] sm:$0xff]  ;;  %v2067_v20 = vcombine.low %v80_v9, %v84_v10 }
  0x14   :  { %1654 = vmatprep.mubr.bf16.mxu0 %v2414_v3  ;;  %1736 = vmatprep.mubr.bf16.mxu1 %v2414_v3  ;;  %v2066_v13 = vcombine.high %v79_v7, %v83_v8  ;;  %v87_v15 = vld [vmem:[%s3134_s1 + $0x240] sm:$0xff]  ;;  %v92_v18 = vld [vmem:[%s3134_s1 + $0x268] sm:$0xff]  ;;  %v2065_v19 = vcombine.low %v79_v7, %v83_v8 }
  0x15   :  { %v91_v16 = vld [vmem:[%s3134_s1 + $0x260] sm:$0xff]  ;;  %v2076_v22 = vcombine.high %v88_v17, %v92_v18  ;;  %v96_v25 = vld [vmem:[%s3134_s1 + $0x288] sm:$0xff]  ;;  %v2075_v28 = vcombine.low %v88_v17, %v92_v18 }
  0x16   :  { %1631 = vmatpush1.bf16.msra.mxu0 %v2033_v45  ;;  %1713 = vmatpush1.bf16.msra.mxu1 %v2035_v48  ;;  %v2074_v21 = vcombine.high %v87_v15, %v91_v16  ;;  %v95_v23 = vld [vmem:[%s3134_s1 + $0x280] sm:$0xff]  ;;  %v100_v26 = vld [vmem:[%s3134_s1 + $0x2a8] sm:$0xff]  ;;  %v2073_v27 = vcombine.low %v87_v15, %v91_v16 }
  0x17   :  { %1632 = vmatprep.subr.bf16.mxu0 %v2042_v49  ;;  %1714 = vmatprep.subr.bf16.mxu1 %v2044_v50  ;;  %v99_v24 = vld [vmem:[%s3134_s1 + $0x2a0] sm:$0xff]  ;;  %v2084_v30 = vcombine.high %v96_v25, %v100_v26  ;;  %v104_v33 = vld [vmem:[%s3134_s1 + $0x2c8] sm:$0xff]  ;;  %v2083_v36 = vcombine.low %v96_v25, %v100_v26 }
  0x18   :  { %v2082_v29 = vcombine.high %v95_v23, %v99_v24  ;;  %v103_v31 = vld [vmem:[%s3134_s1 + $0x2c0] sm:$0xff]  ;;  %v108_v34 = vld [vmem:[%s3134_s1 + $0x2e8] sm:$0xff]  ;;  %v2081_v35 = vcombine.low %v95_v23, %v99_v24 }
  0x19   :  { %v107_v32 = vld [vmem:[%s3134_s1 + $0x2e0] sm:$0xff]  ;;  %v2092_v38 = vcombine.high %v104_v33, %v108_v34  ;;  %v112_v41 = vld [vmem:[%s3134_s1 + $0x308] sm:$0xff]  ;;  %v2091_v44 = vcombine.low %v104_v33, %v108_v34 }
  0x1a   :  { %1633 = vmatpush1.bf16.msra.mxu0 %v2041_v55  ;;  %1715 = vmatpush1.bf16.msra.mxu1 %v2043_v57  ;;  %v2090_v37 = vcombine.high %v103_v31, %v107_v32  ;;  %v111_v39 = vld [vmem:[%s3134_s1 + $0x300] sm:$0xff]  ;;  %v116_v42 = vld [vmem:[%s3134_s1 + $0x328] sm:$0xff]  ;;  %v2089_v43 = vcombine.low %v103_v31, %v107_v32 }
  0x1b   :  { %1634 = vmatprep.subr.bf16.mxu0 %v2050_v58  ;;  %1716 = vmatprep.subr.bf16.mxu1 %v2052_v60  ;;  %v115_v40 = vld [vmem:[%s3134_s1 + $0x320] sm:$0xff]  ;;  %v2100_v47 = vcombine.high %v112_v41, %v116_v42  ;;  %v120_v50 = vld [vmem:[%s3134_s1 + $0x348] sm:$0xff]  ;;  %v2099_v53 = vcombine.low %v112_v41, %v116_v42 }
  0x1c   :  { %v2098_v45 = vcombine.high %v111_v39, %v115_v40  ;;  %v119_v48 = vld [vmem:[%s3134_s1 + $0x340] sm:$0xff]  ;;  %v124_v51 = vld [vmem:[%s3134_s1 + $0x368] sm:$0xff]  ;;  %v2097_v52 = vcombine.low %v111_v39, %v115_v40 }
  0x1d   :  { %v123_v49 = vld [vmem:[%s3134_s1 + $0x360] sm:$0xff]  ;;  %v2108_v55 = vcombine.high %v120_v50, %v124_v51  ;;  %v128_v60 = vld [vmem:[%s3134_s1 + $0x388] sm:$0xff]  ;;  %v2107_v63 = vcombine.low %v120_v50, %v124_v51 }
  0x1e   :  { %1635 = vmatpush1.bf16.msra.mxu0 %v2049_v2  ;;  %1717 = vmatpush1.bf16.msra.mxu1 %v2051_v4  ;;  %v2106_v54 = vcombine.high %v119_v48, %v123_v49  ;;  %v127_v57 = vld [vmem:[%s3134_s1 + $0x380] sm:$0xff]  ;;  %v132_v61 = vld [vmem:[%s3134_s1 + $0x3a8] sm:$0xff]  ;;  %v2105_v62 = vcombine.low %v119_v48, %v123_v49 }
  0x1f   :  { %1636 = vmatprep.subr.bf16.mxu0 %v2058_v5  ;;  %1718 = vmatprep.subr.bf16.mxu1 %v2060_v6  ;;  %v131_v58 = vld [vmem:[%s3134_s1 + $0x3a0] sm:$0xff]  ;;  %v2116_v1 = vcombine.high %v128_v60, %v132_v61  ;;  %v136_v5 = vld [vmem:[%s3134_s1 + $0x3c8] sm:$0xff]  ;;  %v2115_v8 = vcombine.low %v128_v60, %v132_v61 }
  0x20   :  { %v2114_v0 = vcombine.high %v127_v57, %v131_v58  ;;  %v135_v2 = vld [vmem:[%s3134_s1 + $0x3c0] sm:$0xff]  ;;  %v140_v6 = vld [vmem:[%s3134_s1 + $0x3e8] sm:$0xff]  ;;  %v2113_v7 = vcombine.low %v127_v57, %v131_v58 }
  0x21   :  { %v139_v4 = vld [vmem:[%s3134_s1 + $0x3e0] sm:$0xff]  ;;  %v2124_v10 = vcombine.high %v136_v5, %v140_v6  ;;  %v2123_v16 = vcombine.low %v136_v5, %v140_v6  ;;  %v156_v23 = vld [vmem:[%s3134_s1 + $0x468] sm:$0xff] }
  0x22   :  { %1637 = vmatpush1.bf16.msra.mxu0 %v2057_v11  ;;  %1719 = vmatpush1.bf16.msra.mxu1 %v2059_v12  ;;  %v2122_v9 = vcombine.high %v135_v2, %v139_v4  ;;  %v143_v11 = vld [vmem:[%s3134_s1 + $0x400] sm:$0xff]  ;;  %v2121_v15 = vcombine.low %v135_v2, %v139_v4 }
  0x23   :  { %1638 = vmatprep.subr.bf16.mxu0 %v2066_v13  ;;  %1720 = vmatprep.subr.bf16.mxu1 %v2068_v14  ;;  %v147_v12 = vld [vmem:[%s3134_s1 + $0x420] sm:$0xff]  ;;  %v144_v13 = vld [vmem:[%s3134_s1 + $0x408] sm:$0xff] }
  0x24   :  { %v148_v14 = vld [vmem:[%s3134_s1 + $0x428] sm:$0xff]  ;;  %v2130_v17 = vcombine.high %v143_v11, %v147_v12  ;;  %v2129_v24 = vcombine.low %v143_v11, %v147_v12 }
  0x25   :  { %v2132_v18 = vcombine.high %v144_v13, %v148_v14  ;;  %v2131_v25 = vcombine.low %v144_v13, %v148_v14 }
  0x26   :  { %1639 = vmatpush1.bf16.msra.mxu0 %v2065_v19  ;;  %1721 = vmatpush1.bf16.msra.mxu1 %v2067_v20  ;;  %v151_v19 = vld [vmem:[%s3134_s1 + $0x440] sm:$0xff] }
  0x27   :  { %1640 = vmatprep.subr.bf16.mxu0 %v2074_v21  ;;  %1722 = vmatprep.subr.bf16.mxu1 %v2076_v22  ;;  %v155_v20 = vld [vmem:[%s3134_s1 + $0x460] sm:$0xff]  ;;  %v2534_v21 = vrot.slane %v2397_v59, %v2392_v56  ;;  %v152_v22 = vld [vmem:[%s3134_s1 + $0x448] sm:$0xff] }
  0x28   :  { %v2138_v26 = vcombine.high %v151_v19, %v155_v20  ;;  %v159_v56 = vld [vmem:[%s3134_s1 + $0x480] sm:$0xff]  ;;  %v2137_v31 = vcombine.low %v151_v19, %v155_v20  ;;  %v2139_v32 = vcombine.low %v152_v22, %v156_v23 }
  0x29   :  { %v163_v59 = vld [vmem:[%s3134_s1 + $0x4a0] sm:$0xff] }
  0x2a   :  { %1641 = vmatpush1.bf16.msra.mxu0 %v2073_v27  ;;  %1723 = vmatpush1.bf16.msra.mxu1 %v2075_v28  ;;  %v2140_v27 = vcombine.high %v152_v22, %v156_v23  ;;  %v2550_v28 = vcombine.high %v2414_v3, %v2414_v3  ;;  %v2146_v33 = vcombine.high %v159_v56, %v163_v59 }
  0x2b   :  { %1642 = vmatprep.subr.bf16.mxu0 %v2082_v29  ;;  %1724 = vmatprep.subr.bf16.mxu1 %v2084_v30  ;;  %v160_v29 = vld [vmem:[%s3134_s1 + $0x488] sm:$0xff]  ;;  %v2145_v39 = vcombine.low %v159_v56, %v163_v59 }
  0x2c   :  { %v164_v30 = vld [vmem:[%s3134_s1 + $0x4a8] sm:$0xff] }
  0x2d   :  { %v2148_v34 = vcombine.high %v160_v29, %v164_v30  ;;  %v2147_v40 = vcombine.low %v160_v29, %v164_v30 }
  0x2e   :  { %1643 = vmatpush1.bf16.msra.mxu0 %v2081_v35  ;;  %1725 = vmatpush1.bf16.msra.mxu1 %v2083_v36  ;;  %v167_v35 = vld [vmem:[%s3134_s1 + $0x4c0] sm:$0xff] }
  0x2f   :  { %1644 = vmatprep.subr.bf16.mxu0 %v2090_v37  ;;  %1726 = vmatprep.subr.bf16.mxu1 %v2092_v38  ;;  %v171_v36 = vld [vmem:[%s3134_s1 + $0x4e0] sm:$0xff]  ;;  %v168_v37 = vld [vmem:[%s3134_s1 + $0x4c8] sm:$0xff] }
  0x30   :  { %v172_v38 = vld [vmem:[%s3134_s1 + $0x4e8] sm:$0xff]  ;;  %v2154_v41 = vcombine.high %v167_v35, %v171_v36  ;;  %v2153_v48 = vcombine.low %v167_v35, %v171_v36 }
  0x31   :  { %v2156_v42 = vcombine.high %v168_v37, %v172_v38  ;;  %v2155_v49 = vcombine.low %v168_v37, %v172_v38 }
  0x32   :  { %1645 = vmatpush1.bf16.msra.mxu0 %v2089_v43  ;;  %1727 = vmatpush1.bf16.msra.mxu1 %v2091_v44  ;;  %v175_v43 = vld [vmem:[%s3134_s1 + $0x500] sm:$0xff] }
  0x33   :  { %1646 = vmatprep.subr.bf16.mxu0 %v2098_v45  ;;  %1728 = vmatprep.subr.bf16.mxu1 %v2100_v47  ;;  %v179_v44 = vld [vmem:[%s3134_s1 + $0x520] sm:$0xff]  ;;  %v176_v45 = vld [vmem:[%s3134_s1 + $0x508] sm:$0xff] }
  0x34   :  { %v180_v47 = vld [vmem:[%s3134_s1 + $0x528] sm:$0xff]  ;;  %v2162_v50 = vcombine.high %v175_v43, %v179_v44  ;;  %v2161_v57 = vcombine.low %v175_v43, %v179_v44 }
  0x35   :  { %v2164_v51 = vcombine.high %v176_v45, %v180_v47  ;;  %v2163_v58 = vcombine.low %v176_v45, %v180_v47 }
  0x36   :  { %1647 = vmatpush1.bf16.msra.mxu0 %v2097_v52  ;;  %1729 = vmatpush1.bf16.msra.mxu1 %v2099_v53  ;;  %v183_v52 = vld [vmem:[%s3134_s1 + $0x540] sm:$0xff] }
  0x37   :  { %1648 = vmatprep.subr.bf16.mxu0 %v2106_v54  ;;  %1730 = vmatprep.subr.bf16.mxu1 %v2108_v55  ;;  %v187_v53 = vld [vmem:[%s3134_s1 + $0x560] sm:$0xff]  ;;  %v184_v54 = vld [vmem:[%s3134_s1 + $0x548] sm:$0xff] }
  0x38   :  { %v188_v55 = vld [vmem:[%s3134_s1 + $0x568] sm:$0xff]  ;;  %v2170_v60 = vcombine.high %v183_v52, %v187_v53  ;;  %v2169_v2 = vcombine.low %v183_v52, %v187_v53 }
  0x39   :  { %v2172_v61 = vcombine.high %v184_v54, %v188_v55  ;;  %v2171_v4 = vcombine.low %v184_v54, %v188_v55 }
  0x3a   :  { %1649 = vmatpush1.bf16.msra.mxu0 %v2105_v62  ;;  %1731 = vmatpush1.bf16.msra.mxu1 %v2107_v63  ;;  %v191_v62 = vld [vmem:[%s3134_s1 + $0x580] sm:$0xff] }
  0x3b   :  { %1650 = vmatprep.subr.bf16.mxu0 %v2114_v0  ;;  %1732 = vmatprep.subr.bf16.mxu1 %v2116_v1  ;;  %v195_v63 = vld [vmem:[%s3134_s1 + $0x5a0] sm:$0xff]  ;;  %v192_v0 = vld [vmem:[%s3134_s1 + $0x588] sm:$0xff] }
  0x3c   :  { %v196_v1 = vld [vmem:[%s3134_s1 + $0x5a8] sm:$0xff]  ;;  %v2178_v5 = vcombine.high %v191_v62, %v195_v63  ;;  %v2177_v11 = vcombine.low %v191_v62, %v195_v63 }
  0x3d   :  { %v2180_v6 = vcombine.high %v192_v0, %v196_v1  ;;  %v2179_v12 = vcombine.low %v192_v0, %v196_v1 }
  0x3e   :  { %1651 = vmatpush1.bf16.msra.mxu0 %v2113_v7  ;;  %1733 = vmatpush1.bf16.msra.mxu1 %v2115_v8  ;;  %v199_v7 = vld [vmem:[%s3134_s1 + $0x5c0] sm:$0xff] }
  0x3f   :  { %1652 = vmatprep.subr.bf16.mxu0 %v2122_v9  ;;  %1734 = vmatprep.subr.bf16.mxu1 %v2124_v10  ;;  %v203_v8 = vld [vmem:[%s3134_s1 + $0x5e0] sm:$0xff]  ;;  %v200_v9 = vld [vmem:[%s3134_s1 + $0x5c8] sm:$0xff] }
  0x40   :  { %v204_v10 = vld [vmem:[%s3134_s1 + $0x5e8] sm:$0xff]  ;;  %v2186_v13 = vcombine.high %v199_v7, %v203_v8  ;;  %v2185_v19 = vcombine.low %v199_v7, %v203_v8 }
  0x41   :  { %v2188_v14 = vcombine.high %v200_v9, %v204_v10  ;;  %v2187_v20 = vcombine.low %v200_v9, %v204_v10 }
  0x42   :  { %1653 = vmatpush1.bf16.msra.mxu0 %v2121_v15  ;;  %1735 = vmatpush1.bf16.msra.mxu1 %v2123_v16  ;;  %v207_v15 = vld [vmem:[%s3134_s1 + $0x600] sm:$0xff] }
  0x43   :  { %1663 = vmatprep.subr.bf16.mxu0 %v2130_v17  ;;  %1745 = vmatprep.subr.bf16.mxu1 %v2132_v18  ;;  %v211_v16 = vld [vmem:[%s3134_s1 + $0x620] sm:$0xff]  ;;  %v208_v17 = vld [vmem:[%s3134_s1 + $0x608] sm:$0xff] }
  0x44   :  { %v212_v18 = vld [vmem:[%s3134_s1 + $0x628] sm:$0xff]  ;;  %v2194_v22 = vcombine.high %v207_v15, %v211_v16  ;;  %v2193_v56 = vcombine.low %v207_v15, %v211_v16 }
  0x45   :  { %1655 = vmatmul.mubr.bf16.vlgmr.msra.gmra.mrb[0].mxu0 %v2534_v21  ;;  %1737 = vmatmul.mubr.bf16.vlgmr.msra.gmra.mrb[0].mxu1 %v2534_v21  ;;  %v2196_v23 = vcombine.high %v208_v17, %v212_v18  ;;  %v2195_v59 = vcombine.low %v208_v17, %v212_v18 }
  0x46   :  { %1664 = vmatpush1.bf16.msra.mxu0 %v2129_v24  ;;  %1746 = vmatpush1.bf16.msra.mxu1 %v2131_v25  ;;  %v215_v24 = vld [vmem:[%s3134_s1 + $0x640] sm:$0xff] }
  0x47   :  { %1665 = vmatprep.subr.bf16.mxu0 %v2138_v26  ;;  %1747 = vmatprep.subr.bf16.mxu1 %v2140_v27  ;;  %v219_v25 = vld [vmem:[%s3134_s1 + $0x660] sm:$0xff]  ;;  %v216_v26 = vld [vmem:[%s3134_s1 + $0x648] sm:$0xff] }
  0x48   :  { %1695 = vmatprep.mubr.bf16.mxu0 %v2550_v28  ;;  %1777 = vmatprep.mubr.bf16.mxu1 %v2550_v28  ;;  %v220_v27 = vld [vmem:[%s3134_s1 + $0x668] sm:$0xff]  ;;  %v2202_v29 = vcombine.high %v215_v24, %v219_v25  ;;  %v2201_v35 = vcombine.low %v215_v24, %v219_v25 }
  0x49   :  { %v2204_v30 = vcombine.high %v216_v26, %v220_v27  ;;  %v2203_v36 = vcombine.low %v216_v26, %v220_v27 }
  0x4a   :  { %1666 = vmatpush1.bf16.msra.mxu0 %v2137_v31  ;;  %1748 = vmatpush1.bf16.msra.mxu1 %v2139_v32  ;;  %v223_v31 = vld [vmem:[%s3134_s1 + $0x680] sm:$0xff] }
  0x4b   :  { %1667 = vmatprep.subr.bf16.mxu0 %v2146_v33  ;;  %1749 = vmatprep.subr.bf16.mxu1 %v2148_v34  ;;  %v227_v32 = vld [vmem:[%s3134_s1 + $0x6a0] sm:$0xff]  ;;  %v224_v33 = vld [vmem:[%s3134_s1 + $0x688] sm:$0xff] }
  0x4c   :  { %v228_v34 = vld [vmem:[%s3134_s1 + $0x6a8] sm:$0xff]  ;;  %v2210_v37 = vcombine.high %v223_v31, %v227_v32  ;;  %v2209_v43 = vcombine.low %v223_v31, %v227_v32  ;;  %v30_v31 = vld [vmem:[%s3134_s1 + $0x78] sm:$0xff] }
  0x4d   :  { %v2212_v38 = vcombine.high %v224_v33, %v228_v34  ;;  %v2211_v44 = vcombine.low %v224_v33, %v228_v34 }
  0x4e   :  { %1668 = vmatpush1.bf16.msra.mxu0 %v2145_v39  ;;  %1750 = vmatpush1.bf16.msra.mxu1 %v2147_v40  ;;  %v231_v39 = vld [vmem:[%s3134_s1 + $0x6c0] sm:$0xff] }
  0x4f   :  { %1669 = vmatprep.subr.bf16.mxu0 %v2154_v41  ;;  %1751 = vmatprep.subr.bf16.mxu1 %v2156_v42  ;;  %v235_v40 = vld [vmem:[%s3134_s1 + $0x6e0] sm:$0xff]  ;;  %v232_v41 = vld [vmem:[%s3134_s1 + $0x6c8] sm:$0xff] }
  0x50   :  { %v236_v42 = vld [vmem:[%s3134_s1 + $0x6e8] sm:$0xff]  ;;  %v2218_v45 = vcombine.high %v231_v39, %v235_v40  ;;  %v2217_v52 = vcombine.low %v231_v39, %v235_v40  ;;  %v38_v39 = vld [vmem:[%s3134_s1 + $0xb8] sm:$0xff] }
  0x51   :  { %v2220_v47 = vcombine.high %v232_v41, %v236_v42  ;;  %v2219_v53 = vcombine.low %v232_v41, %v236_v42 }
  0x52   :  { %1670 = vmatpush1.bf16.msra.mxu0 %v2153_v48  ;;  %1752 = vmatpush1.bf16.msra.mxu1 %v2155_v49  ;;  %v239_v48 = vld [vmem:[%s3134_s1 + $0x700] sm:$0xff] }
  0x53   :  { %1671 = vmatprep.subr.bf16.mxu0 %v2162_v50  ;;  %1753 = vmatprep.subr.bf16.mxu1 %v2164_v51  ;;  %v243_v49 = vld [vmem:[%s3134_s1 + $0x720] sm:$0xff]  ;;  %v240_v50 = vld [vmem:[%s3134_s1 + $0x708] sm:$0xff] }
  0x54   :  { %v244_v51 = vld [vmem:[%s3134_s1 + $0x728] sm:$0xff]  ;;  %v2226_v54 = vcombine.high %v239_v48, %v243_v49  ;;  %v2225_v62 = vcombine.low %v239_v48, %v243_v49  ;;  %v46_v48 = vld [vmem:[%s3134_s1 + $0xf8] sm:$0xff] }
  0x55   :  { %v2228_v55 = vcombine.high %v240_v50, %v244_v51  ;;  %v2227_v63 = vcombine.low %v240_v50, %v244_v51 }
  0x56   :  { %1672 = vmatpush1.bf16.msra.mxu0 %v2161_v57  ;;  %1754 = vmatpush1.bf16.msra.mxu1 %v2163_v58  ;;  %v247_v57 = vld [vmem:[%s3134_s1 + $0x740] sm:$0xff] }
  0x57   :  { %1673 = vmatprep.subr.bf16.mxu0 %v2170_v60  ;;  %1755 = vmatprep.subr.bf16.mxu1 %v2172_v61  ;;  %v251_v58 = vld [vmem:[%s3134_s1 + $0x760] sm:$0xff]  ;;  %v248_v60 = vld [vmem:[%s3134_s1 + $0x748] sm:$0xff] }
  0x58   :  { %v252_v61 = vld [vmem:[%s3134_s1 + $0x768] sm:$0xff]  ;;  %v2234_v0 = vcombine.high %v247_v57, %v251_v58  ;;  %v2233_v7 = vcombine.low %v247_v57, %v251_v58 }
  0x59   :  { %v2236_v1 = vcombine.high %v248_v60, %v252_v61  ;;  %v2235_v8 = vcombine.low %v248_v60, %v252_v61 }
  0x5a   :  { %1674 = vmatpush1.bf16.msra.mxu0 %v2169_v2  ;;  %1756 = vmatpush1.bf16.msra.mxu1 %v2171_v4  ;;  %v255_v2 = vld [vmem:[%s3134_s1 + $0x780] sm:$0xff] }
  0x5b   :  { %1675 = vmatprep.subr.bf16.mxu0 %v2178_v5  ;;  %1757 = vmatprep.subr.bf16.mxu1 %v2180_v6  ;;  %v259_v4 = vld [vmem:[%s3134_s1 + $0x7a0] sm:$0xff]  ;;  %v256_v5 = vld [vmem:[%s3134_s1 + $0x788] sm:$0xff] }
  0x5c   :  { %v260_v6 = vld [vmem:[%s3134_s1 + $0x7a8] sm:$0xff]  ;;  %v2242_v9 = vcombine.high %v255_v2, %v259_v4  ;;  %v2241_v15 = vcombine.low %v255_v2, %v259_v4 }
  0x5d   :  { %v2244_v10 = vcombine.high %v256_v5, %v260_v6  ;;  %v2243_v16 = vcombine.low %v256_v5, %v260_v6 }
  0x5e   :  { %1676 = vmatpush1.bf16.msra.mxu0 %v2177_v11  ;;  %1758 = vmatpush1.bf16.msra.mxu1 %v2179_v12  ;;  %v263_v11 = vld [vmem:[%s3134_s1 + $0x7c0] sm:$0xff] }
  0x5f   :  { %1677 = vmatprep.subr.bf16.mxu0 %v2186_v13  ;;  %1759 = vmatprep.subr.bf16.mxu1 %v2188_v14  ;;  %v267_v12 = vld [vmem:[%s3134_s1 + $0x7e0] sm:$0xff]  ;;  %v264_v13 = vld [vmem:[%s3134_s1 + $0x7c8] sm:$0xff] }
  0x60   :  { %v268_v14 = vld [vmem:[%s3134_s1 + $0x7e8] sm:$0xff]  ;;  %v2250_v17 = vcombine.high %v263_v11, %v267_v12  ;;  %v2249_v24 = vcombine.low %v263_v11, %v267_v12 }
  0x61   :  { %v2252_v18 = vcombine.high %v264_v13, %v268_v14  ;;  %v2251_v25 = vcombine.low %v264_v13, %v268_v14 }
  0x62   :  { %1678 = vmatpush1.bf16.msra.mxu0 %v2185_v19  ;;  %1760 = vmatpush1.bf16.msra.mxu1 %v2187_v20  ;;  %v17_v19 = vld [vmem:[%s3134_s1 + $0x10] sm:$0xff] }
  0x63   :  { %1679 = vmatprep.subr.bf16.mxu0 %v2194_v22  ;;  %1761 = vmatprep.subr.bf16.mxu1 %v2196_v23  ;;  %v21_v20 = vld [vmem:[%s3134_s1 + $0x30] sm:$0xff]  ;;  %v18_v22 = vld [vmem:[%s3134_s1 + $0x18] sm:$0xff] }
  0x64   :  { %v22_v23 = vld [vmem:[%s3134_s1 + $0x38] sm:$0xff]  ;;  %v2006_v26 = vcombine.high %v17_v19, %v21_v20  ;;  %v2005_v32 = vcombine.low %v17_v19, %v21_v20 }
  0x65   :  { %v2008_v27 = vcombine.high %v18_v22, %v22_v23  ;;  %v2007_v33 = vcombine.low %v18_v22, %v22_v23 }
  0x66   :  { %1680 = vmatpush1.bf16.msra.mxu0 %v2193_v56  ;;  %1762 = vmatpush1.bf16.msra.mxu1 %v2195_v59  ;;  %v25_v56 = vld [vmem:[%s3134_s1 + $0x50] sm:$0xff] }
  0x67   :  { %1681 = vmatprep.subr.bf16.mxu0 %v2202_v29  ;;  %1763 = vmatprep.subr.bf16.mxu1 %v2204_v30  ;;  %v29_v59 = vld [vmem:[%s3134_s1 + $0x70] sm:$0xff]  ;;  %v2738_v29 = vcombine.high %v2534_v21, %v2534_v21  ;;  %v26_v30 = vld [vmem:[%s3134_s1 + $0x58] sm:$0xff] }
  0x68   :  { %v2014_v34 = vcombine.high %v25_v56, %v29_v59  ;;  %v2013_v40 = vcombine.low %v25_v56, %v29_v59  ;;  %v2015_v41 = vcombine.low %v26_v30, %v30_v31 }
  0x6a   :  { %1682 = vmatpush1.bf16.msra.mxu0 %v2201_v35  ;;  %1764 = vmatpush1.bf16.msra.mxu1 %v2203_v36  ;;  %v2016_v35 = vcombine.high %v26_v30, %v30_v31  ;;  %v33_v36 = vld [vmem:[%s3134_s1 + $0x90] sm:$0xff] }
  0x6b   :  { %1683 = vmatprep.subr.bf16.mxu0 %v2210_v37  ;;  %1765 = vmatprep.subr.bf16.mxu1 %v2212_v38  ;;  %v37_v37 = vld [vmem:[%s3134_s1 + $0xb0] sm:$0xff]  ;;  %v34_v38 = vld [vmem:[%s3134_s1 + $0x98] sm:$0xff] }
  0x6c   :  { %v2022_v42 = vcombine.high %v33_v36, %v37_v37  ;;  %v2021_v49 = vcombine.low %v33_v36, %v37_v37  ;;  %v2023_v50 = vcombine.low %v34_v38, %v38_v39 }
  0x6e   :  { %1684 = vmatpush1.bf16.msra.mxu0 %v2209_v43  ;;  %1766 = vmatpush1.bf16.msra.mxu1 %v2211_v44  ;;  %v2024_v43 = vcombine.high %v34_v38, %v38_v39  ;;  %v41_v44 = vld [vmem:[%s3134_s1 + $0xd0] sm:$0xff] }
  0x6f   :  { %1685 = vmatprep.subr.bf16.mxu0 %v2218_v45  ;;  %1767 = vmatprep.subr.bf16.mxu1 %v2220_v47  ;;  %v45_v45 = vld [vmem:[%s3134_s1 + $0xf0] sm:$0xff]  ;;  %v42_v47 = vld [vmem:[%s3134_s1 + $0xd8] sm:$0xff] }
  0x70   :  { %v2030_v51 = vcombine.high %v41_v44, %v45_v45  ;;  %v2029_v57 = vcombine.low %v41_v44, %v45_v45  ;;  %v2031_v58 = vcombine.low %v42_v47, %v46_v48 }
  0x72   :  { %1686 = vmatpush1.bf16.msra.mxu0 %v2217_v52  ;;  %1768 = vmatpush1.bf16.msra.mxu1 %v2219_v53  ;;  %v2032_v52 = vcombine.high %v42_v47, %v46_v48  ;;  %v49_v53 = vld [vmem:[%s3134_s1 + $0x110] sm:$0xff] }
  0x73   :  { %1687 = vmatprep.subr.bf16.mxu0 %v2226_v54  ;;  %1769 = vmatprep.subr.bf16.mxu1 %v2228_v55  ;;  %v53_v54 = vld [vmem:[%s3134_s1 + $0x130] sm:$0xff]  ;;  %v54_v55 = vld [vmem:[%s3134_s1 + $0x138] sm:$0xff] }
  0x74   :  { %v2038_v60 = vcombine.high %v49_v53, %v53_v54  ;;  %v2037_v2 = vcombine.low %v49_v53, %v53_v54 }
  0x76   :  { %1688 = vmatpush1.bf16.msra.mxu0 %v2225_v62  ;;  %1770 = vmatpush1.bf16.msra.mxu1 %v2227_v63  ;;  %v57_v62 = vld [vmem:[%s3134_s1 + $0x150] sm:$0xff] }
  0x77   :  { %1689 = vmatprep.subr.bf16.mxu0 %v2234_v0  ;;  %1771 = vmatprep.subr.bf16.mxu1 %v2236_v1  ;;  %v61_v63 = vld [vmem:[%s3134_s1 + $0x170] sm:$0xff]  ;;  %v58_v0 = vld [vmem:[%s3134_s1 + $0x158] sm:$0xff] }
  0x78   :  { %v62_v1 = vld [vmem:[%s3134_s1 + $0x178] sm:$0xff]  ;;  %v2046_v5 = vcombine.high %v57_v62, %v61_v63  ;;  %v2045_v11 = vcombine.low %v57_v62, %v61_v63 }
  0x79   :  { %v2048_v6 = vcombine.high %v58_v0, %v62_v1  ;;  %v2047_v12 = vcombine.low %v58_v0, %v62_v1 }
  0x7a   :  { %1690 = vmatpush1.bf16.msra.mxu0 %v2233_v7  ;;  %1772 = vmatpush1.bf16.msra.mxu1 %v2235_v8  ;;  %v65_v7 = vld [vmem:[%s3134_s1 + $0x190] sm:$0xff] }
  0x7b   :  { %1691 = vmatprep.subr.bf16.mxu0 %v2242_v9  ;;  %1773 = vmatprep.subr.bf16.mxu1 %v2244_v10  ;;  %v69_v8 = vld [vmem:[%s3134_s1 + $0x1b0] sm:$0xff]  ;;  %v66_v9 = vld [vmem:[%s3134_s1 + $0x198] sm:$0xff] }
  0x7c   :  { %v70_v10 = vld [vmem:[%s3134_s1 + $0x1b8] sm:$0xff]  ;;  %v2054_v13 = vcombine.high %v65_v7, %v69_v8  ;;  %v2053_v19 = vcombine.low %v65_v7, %v69_v8 }
  0x7d   :  { %v2056_v14 = vcombine.high %v66_v9, %v70_v10  ;;  %v2055_v20 = vcombine.low %v66_v9, %v70_v10 }
  0x7e   :  { %1692 = vmatpush1.bf16.msra.mxu0 %v2241_v15  ;;  %1774 = vmatpush1.bf16.msra.mxu1 %v2243_v16  ;;  %v73_v15 = vld [vmem:[%s3134_s1 + $0x1d0] sm:$0xff] }
  0x7f   :  { %1693 = vmatprep.subr.bf16.mxu0 %v2250_v17  ;;  %1775 = vmatprep.subr.bf16.mxu1 %v2252_v18  ;;  %v77_v16 = vld [vmem:[%s3134_s1 + $0x1f0] sm:$0xff]  ;;  %v74_v17 = vld [vmem:[%s3134_s1 + $0x1d8] sm:$0xff] }
  0x80   :  { %v78_v18 = vld [vmem:[%s3134_s1 + $0x1f8] sm:$0xff]  ;;  %v2062_v22 = vcombine.high %v73_v15, %v77_v16  ;;  %v2061_v56 = vcombine.low %v73_v15, %v77_v16 }
  0x81   :  { %v2064_v23 = vcombine.high %v74_v17, %v78_v18  ;;  %v2063_v59 = vcombine.low %v74_v17, %v78_v18 }
  0x82   :  { %1694 = vmatpush1.bf16.msra.mxu0 %v2249_v24  ;;  %1776 = vmatpush1.bf16.msra.mxu1 %v2251_v25  ;;  %v81_v24 = vld [vmem:[%s3134_s1 + $0x210] sm:$0xff] }
  0x83   :  { %1786 = vmatprep.subr.bf16.mxu0 %v2006_v26  ;;  %1868 = vmatprep.subr.bf16.mxu1 %v2008_v27  ;;  %v85_v25 = vld [vmem:[%s3134_s1 + $0x230] sm:$0xff]  ;;  %v82_v26 = vld [vmem:[%s3134_s1 + $0x218] sm:$0xff] }
  0x84   :  { %v86_v27 = vld [vmem:[%s3134_s1 + $0x238] sm:$0xff]  ;;  %v2070_v30 = vcombine.high %v81_v24, %v85_v25  ;;  %v2069_v36 = vcombine.low %v81_v24, %v85_v25 }
  0x85   :  { %1696 = vmatmul.mubr.bf16.vlgmr.msra.gmra.mrb[0].mxu0 %v2738_v29  ;;  %1778 = vmatmul.mubr.bf16.vlgmr.msra.gmra.mrb[0].mxu1 %v2738_v29  ;;  %v2072_v31 = vcombine.high %v82_v26, %v86_v27  ;;  %v2071_v37 = vcombine.low %v82_v26, %v86_v27 }
  0x86   :  { %1787 = vmatpush1.bf16.msra.mxu0 %v2005_v32  ;;  %1869 = vmatpush1.bf16.msra.mxu1 %v2007_v33  ;;  %v89_v32 = vld [vmem:[%s3134_s1 + $0x250] sm:$0xff] }
  0x87   :  { %1788 = vmatprep.subr.bf16.mxu0 %v2014_v34  ;;  %1870 = vmatprep.subr.bf16.mxu1 %v2016_v35  ;;  %v93_v33 = vld [vmem:[%s3134_s1 + $0x270] sm:$0xff]  ;;  %v90_v34 = vld [vmem:[%s3134_s1 + $0x258] sm:$0xff] }
  0x88   :  { %1818 = vmatprep.mubr.bf16.mxu0 %v2414_v3  ;;  %1900 = vmatprep.mubr.bf16.mxu1 %v2414_v3  ;;  %v50_v3 = vld [vmem:[%s3134_s1 + $0x118] sm:$0xff]  ;;  %v2078_v38 = vcombine.high %v89_v32, %v93_v33  ;;  %v2077_v44 = vcombine.low %v89_v32, %v93_v33 }
  0x89   :  { %v2040_v61 = vcombine.high %v50_v3, %v54_v55  ;;  %v2039_v4 = vcombine.low %v50_v3, %v54_v55  ;;  %v94_v35 = vld [vmem:[%s3134_s1 + $0x278] sm:$0xff] }
  0x8a   :  { %1789 = vmatpush1.bf16.msra.mxu0 %v2013_v40  ;;  %1871 = vmatpush1.bf16.msra.mxu1 %v2015_v41  ;;  %v2080_v39 = vcombine.high %v90_v34, %v94_v35  ;;  %v97_v40 = vld [vmem:[%s3134_s1 + $0x290] sm:$0xff]  ;;  %v2079_v45 = vcombine.low %v90_v34, %v94_v35 }
  0x8b   :  { %1790 = vmatprep.subr.bf16.mxu0 %v2022_v42  ;;  %1872 = vmatprep.subr.bf16.mxu1 %v2024_v43  ;;  %v101_v41 = vld [vmem:[%s3134_s1 + $0x2b0] sm:$0xff]  ;;  %v98_v42 = vld [vmem:[%s3134_s1 + $0x298] sm:$0xff] }
  0x8c   :  { %v102_v43 = vld [vmem:[%s3134_s1 + $0x2b8] sm:$0xff]  ;;  %v2086_v47 = vcombine.high %v97_v40, %v101_v41  ;;  %v2085_v53 = vcombine.low %v97_v40, %v101_v41 }
  0x8d   :  { %v2088_v48 = vcombine.high %v98_v42, %v102_v43  ;;  %v2087_v54 = vcombine.low %v98_v42, %v102_v43 }
  0x8e   :  { %1791 = vmatpush1.bf16.msra.mxu0 %v2021_v49  ;;  %1873 = vmatpush1.bf16.msra.mxu1 %v2023_v50  ;;  %v105_v49 = vld [vmem:[%s3134_s1 + $0x2d0] sm:$0xff] }
  0x8f   :  { %1792 = vmatprep.subr.bf16.mxu0 %v2030_v51  ;;  %1874 = vmatprep.subr.bf16.mxu1 %v2032_v52  ;;  %v109_v50 = vld [vmem:[%s3134_s1 + $0x2f0] sm:$0xff]  ;;  %v106_v51 = vld [vmem:[%s3134_s1 + $0x2d8] sm:$0xff] }
  0x90   :  { %v110_v52 = vld [vmem:[%s3134_s1 + $0x2f8] sm:$0xff]  ;;  %v2094_v3 = vcombine.high %v105_v49, %v109_v50  ;;  %v2093_v62 = vcombine.low %v105_v49, %v109_v50 }
  0x91   :  { %v2096_v55 = vcombine.high %v106_v51, %v110_v52  ;;  %v2095_v63 = vcombine.low %v106_v51, %v110_v52 }
  0x92   :  { %1793 = vmatpush1.bf16.msra.mxu0 %v2029_v57  ;;  %1875 = vmatpush1.bf16.msra.mxu1 %v2031_v58  ;;  %v113_v57 = vld [vmem:[%s3134_s1 + $0x310] sm:$0xff] }
  0x93   :  { %1794 = vmatprep.subr.bf16.mxu0 %v2038_v60  ;;  %1876 = vmatprep.subr.bf16.mxu1 %v2040_v61  ;;  %v117_v58 = vld [vmem:[%s3134_s1 + $0x330] sm:$0xff]  ;;  %v114_v60 = vld [vmem:[%s3134_s1 + $0x318] sm:$0xff] }
  0x94   :  { %v118_v61 = vld [vmem:[%s3134_s1 + $0x338] sm:$0xff]  ;;  %v2102_v0 = vcombine.high %v113_v57, %v117_v58  ;;  %v2101_v7 = vcombine.low %v113_v57, %v117_v58 }
  0x95   :  { %v2104_v1 = vcombine.high %v114_v60, %v118_v61  ;;  %v2103_v8 = vcombine.low %v114_v60, %v118_v61  ;;  %v177_v61 = vld [vmem:[%s3134_s1 + $0x510] sm:$0xff] }
  0x96   :  { %1795 = vmatpush1.bf16.msra.mxu0 %v2037_v2  ;;  %1877 = vmatpush1.bf16.msra.mxu1 %v2039_v4  ;;  %v121_v2 = vld [vmem:[%s3134_s1 + $0x350] sm:$0xff] }
  0x97   :  { %1796 = vmatprep.subr.bf16.mxu0 %v2046_v5  ;;  %1878 = vmatprep.subr.bf16.mxu1 %v2048_v6  ;;  %v125_v4 = vld [vmem:[%s3134_s1 + $0x370] sm:$0xff]  ;;  %v122_v5 = vld [vmem:[%s3134_s1 + $0x358] sm:$0xff] }
  0x98   :  { %v126_v6 = vld [vmem:[%s3134_s1 + $0x378] sm:$0xff]  ;;  %v2110_v9 = vcombine.high %v121_v2, %v125_v4  ;;  %v2109_v15 = vcombine.low %v121_v2, %v125_v4 }
  0x99   :  { %v2112_v10 = vcombine.high %v122_v5, %v126_v6  ;;  %v2111_v16 = vcombine.low %v122_v5, %v126_v6  ;;  %v185_v5 = vld [vmem:[%s3134_s1 + $0x550] sm:$0xff] }
  0x9a   :  { %1797 = vmatpush1.bf16.msra.mxu0 %v2045_v11  ;;  %1879 = vmatpush1.bf16.msra.mxu1 %v2047_v12  ;;  %v129_v11 = vld [vmem:[%s3134_s1 + $0x390] sm:$0xff] }
  0x9b   :  { %1798 = vmatprep.subr.bf16.mxu0 %v2054_v13  ;;  %1880 = vmatprep.subr.bf16.mxu1 %v2056_v14  ;;  %v133_v12 = vld [vmem:[%s3134_s1 + $0x3b0] sm:$0xff]  ;;  %v130_v13 = vld [vmem:[%s3134_s1 + $0x398] sm:$0xff] }
  0x9c   :  { %v134_v14 = vld [vmem:[%s3134_s1 + $0x3b8] sm:$0xff]  ;;  %v2118_v17 = vcombine.high %v129_v11, %v133_v12  ;;  %v2117_v24 = vcombine.low %v129_v11, %v133_v12  ;;  %v189_v6 = vld [vmem:[%s3134_s1 + $0x570] sm:$0xff] }
  0x9d   :  { %v2120_v18 = vcombine.high %v130_v13, %v134_v14  ;;  %v2119_v25 = vcombine.low %v130_v13, %v134_v14  ;;  %v2174_v11 = vcombine.high %v185_v5, %v189_v6  ;;  %v193_v13 = vld [vmem:[%s3134_s1 + $0x590] sm:$0xff] }
  0x9e   :  { %1799 = vmatpush1.bf16.msra.mxu0 %v2053_v19  ;;  %1881 = vmatpush1.bf16.msra.mxu1 %v2055_v20  ;;  %v137_v19 = vld [vmem:[%s3134_s1 + $0x3d0] sm:$0xff] }
  0x9f   :  { %1800 = vmatprep.subr.bf16.mxu0 %v2062_v22  ;;  %1882 = vmatprep.subr.bf16.mxu1 %v2064_v23  ;;  %v141_v20 = vld [vmem:[%s3134_s1 + $0x3f0] sm:$0xff]  ;;  %v138_v22 = vld [vmem:[%s3134_s1 + $0x3d8] sm:$0xff] }
  0xa0   :  { %v142_v23 = vld [vmem:[%s3134_s1 + $0x3f8] sm:$0xff]  ;;  %v2126_v26 = vcombine.high %v137_v19, %v141_v20  ;;  %v2125_v32 = vcombine.low %v137_v19, %v141_v20  ;;  %v197_v14 = vld [vmem:[%s3134_s1 + $0x5b0] sm:$0xff] }
  0xa1   :  { %v2128_v27 = vcombine.high %v138_v22, %v142_v23  ;;  %v2127_v33 = vcombine.low %v138_v22, %v142_v23  ;;  %v2182_v19 = vcombine.high %v193_v13, %v197_v14  ;;  %v201_v22 = vld [vmem:[%s3134_s1 + $0x5d0] sm:$0xff] }
  0xa2   :  { %1801 = vmatpush1.bf16.msra.mxu0 %v2061_v56  ;;  %1883 = vmatpush1.bf16.msra.mxu1 %v2063_v59  ;;  %v145_v56 = vld [vmem:[%s3134_s1 + $0x410] sm:$0xff] }
  0xa3   :  { %1802 = vmatprep.subr.bf16.mxu0 %v2070_v30  ;;  %1884 = vmatprep.subr.bf16.mxu1 %v2072_v31  ;;  %v149_v59 = vld [vmem:[%s3134_s1 + $0x430] sm:$0xff]  ;;  %v146_v30 = vld [vmem:[%s3134_s1 + $0x418] sm:$0xff] }
  0xa4   :  { %v150_v31 = vld [vmem:[%s3134_s1 + $0x438] sm:$0xff]  ;;  %v2134_v34 = vcombine.high %v145_v56, %v149_v59  ;;  %v2133_v40 = vcombine.low %v145_v56, %v149_v59  ;;  %v205_v23 = vld [vmem:[%s3134_s1 + $0x5f0] sm:$0xff] }
  0xa5   :  { %v2136_v35 = vcombine.high %v146_v30, %v150_v31  ;;  %v2135_v41 = vcombine.low %v146_v30, %v150_v31  ;;  %v2190_v56 = vcombine.high %v201_v22, %v205_v23  ;;  %v209_v30 = vld [vmem:[%s3134_s1 + $0x610] sm:$0xff] }
  0xa6   :  { %1803 = vmatpush1.bf16.msra.mxu0 %v2069_v36  ;;  %1885 = vmatpush1.bf16.msra.mxu1 %v2071_v37  ;;  %v153_v36 = vld [vmem:[%s3134_s1 + $0x450] sm:$0xff] }
  0xa7   :  { %1804 = vmatprep.subr.bf16.mxu0 %v2078_v38  ;;  %1886 = vmatprep.subr.bf16.mxu1 %v2080_v39  ;;  %v157_v37 = vld [vmem:[%s3134_s1 + $0x470] sm:$0xff]  ;;  %v154_v38 = vld [vmem:[%s3134_s1 + $0x458] sm:$0xff] }
  0xa8   :  { %v158_v39 = vld [vmem:[%s3134_s1 + $0x478] sm:$0xff]  ;;  %v2142_v42 = vcombine.high %v153_v36, %v157_v37  ;;  %v2141_v49 = vcombine.low %v153_v36, %v157_v37  ;;  %v213_v31 = vld [vmem:[%s3134_s1 + $0x630] sm:$0xff] }
  0xa9   :  { %v2144_v43 = vcombine.high %v154_v38, %v158_v39  ;;  %v2143_v50 = vcombine.low %v154_v38, %v158_v39  ;;  %v2198_v36 = vcombine.high %v209_v30, %v213_v31  ;;  %v217_v38 = vld [vmem:[%s3134_s1 + $0x650] sm:$0xff] }
  0xaa   :  { %1805 = vmatpush1.bf16.msra.mxu0 %v2077_v44  ;;  %1887 = vmatpush1.bf16.msra.mxu1 %v2079_v45  ;;  %v161_v44 = vld [vmem:[%s3134_s1 + $0x490] sm:$0xff] }
  0xab   :  { %1806 = vmatprep.subr.bf16.mxu0 %v2086_v47  ;;  %1888 = vmatprep.subr.bf16.mxu1 %v2088_v48  ;;  %v165_v45 = vld [vmem:[%s3134_s1 + $0x4b0] sm:$0xff]  ;;  %v162_v47 = vld [vmem:[%s3134_s1 + $0x498] sm:$0xff] }
  0xac   :  { %v166_v48 = vld [vmem:[%s3134_s1 + $0x4b8] sm:$0xff]  ;;  %v2150_v51 = vcombine.high %v161_v44, %v165_v45  ;;  %v221_v39 = vld [vmem:[%s3134_s1 + $0x670] sm:$0xff] }
  0xad   :  { %v2152_v52 = vcombine.high %v162_v47, %v166_v48  ;;  %v2151_v57 = vcombine.low %v162_v47, %v166_v48  ;;  %v225_v47 = vld [vmem:[%s3134_s1 + $0x690] sm:$0xff] }
  0xae   :  { %1807 = vmatpush1.bf16.msra.mxu0 %v2085_v53  ;;  %1889 = vmatpush1.bf16.msra.mxu1 %v2087_v54  ;;  %v169_v53 = vld [vmem:[%s3134_s1 + $0x4d0] sm:$0xff] }
  0xaf   :  { %1808 = vmatprep.subr.bf16.mxu0 %v2094_v3  ;;  %1890 = vmatprep.subr.bf16.mxu1 %v2096_v55  ;;  %v173_v54 = vld [vmem:[%s3134_s1 + $0x4f0] sm:$0xff]  ;;  %v174_v3 = vld [vmem:[%s3134_s1 + $0x4f8] sm:$0xff]  ;;  %v2149_v55 = vcombine.low %v161_v44, %v165_v45  ;;  %v2206_v44 = vcombine.high %v217_v38, %v221_v39 }
  0xb0   :  { %v2158_v58 = vcombine.high %v169_v53, %v173_v54  ;;  %v229_v48 = vld [vmem:[%s3134_s1 + $0x6b0] sm:$0xff] }
  0xb2   :  { %1809 = vmatpush1.bf16.msra.mxu0 %v2093_v62  ;;  %1891 = vmatpush1.bf16.msra.mxu1 %v2095_v63  ;;  %v181_v62 = vld [vmem:[%s3134_s1 + $0x530] sm:$0xff]  ;;  %v182_v63 = vld [vmem:[%s3134_s1 + $0x538] sm:$0xff] }
  0xb3   :  { %1810 = vmatprep.subr.bf16.mxu0 %v2102_v0  ;;  %1892 = vmatprep.subr.bf16.mxu1 %v2104_v1  ;;  %v2157_v0 = vcombine.low %v169_v53, %v173_v54  ;;  %v2166_v2 = vcombine.high %v177_v61, %v181_v62  ;;  %v2214_v53 = vcombine.high %v225_v47, %v229_v48 }
  0xb6   :  { %1811 = vmatpush1.bf16.msra.mxu0 %v2101_v7  ;;  %1893 = vmatpush1.bf16.msra.mxu1 %v2103_v8  ;;  %v186_v7 = vld [vmem:[%s3134_s1 + $0x558] sm:$0xff] }
  0xb7   :  { %1812 = vmatprep.subr.bf16.mxu0 %v2110_v9  ;;  %1894 = vmatprep.subr.bf16.mxu1 %v2112_v10  ;;  %v190_v8 = vld [vmem:[%s3134_s1 + $0x578] sm:$0xff]  ;;  %v2165_v9 = vcombine.low %v177_v61, %v181_v62 }
  0xb8   :  { %v2176_v12 = vcombine.high %v186_v7, %v190_v8 }
  0xba   :  { %1813 = vmatpush1.bf16.msra.mxu0 %v2109_v15  ;;  %1895 = vmatpush1.bf16.msra.mxu1 %v2111_v16  ;;  %v194_v15 = vld [vmem:[%s3134_s1 + $0x598] sm:$0xff] }
  0xbb   :  { %1814 = vmatprep.subr.bf16.mxu0 %v2118_v17  ;;  %1896 = vmatprep.subr.bf16.mxu1 %v2120_v18  ;;  %v198_v16 = vld [vmem:[%s3134_s1 + $0x5b8] sm:$0xff]  ;;  %v2173_v17 = vcombine.low %v185_v5, %v189_v6  ;;  %v2175_v18 = vcombine.low %v186_v7, %v190_v8  ;;  %v249_v7 = vld [vmem:[%s3134_s1 + $0x750] sm:$0xff] }
  0xbc   :  { %v2184_v20 = vcombine.high %v194_v15, %v198_v16  ;;  %v253_v8 = vld [vmem:[%s3134_s1 + $0x770] sm:$0xff] }
  0xbe   :  { %1815 = vmatpush1.bf16.msra.mxu0 %v2117_v24  ;;  %1897 = vmatpush1.bf16.msra.mxu1 %v2119_v25  ;;  %v202_v24 = vld [vmem:[%s3134_s1 + $0x5d8] sm:$0xff] }
  0xbf   :  { %1816 = vmatprep.subr.bf16.mxu0 %v2126_v26  ;;  %1898 = vmatprep.subr.bf16.mxu1 %v2128_v27  ;;  %v206_v25 = vld [vmem:[%s3134_s1 + $0x5f8] sm:$0xff]  ;;  %v2181_v26 = vcombine.low %v193_v13, %v197_v14  ;;  %v2183_v27 = vcombine.low %v194_v15, %v198_v16  ;;  %v2238_v13 = vcombine.high %v249_v7, %v253_v8  ;;  %v257_v15 = vld [vmem:[%s3134_s1 + $0x790] sm:$0xff] }
  0xc0   :  { %v2192_v59 = vcombine.high %v202_v24, %v206_v25  ;;  %v261_v16 = vld [vmem:[%s3134_s1 + $0x7b0] sm:$0xff] }
  0xc2   :  { %1817 = vmatpush1.bf16.msra.mxu0 %v2125_v32  ;;  %1899 = vmatpush1.bf16.msra.mxu1 %v2127_v33  ;;  %v210_v32 = vld [vmem:[%s3134_s1 + $0x618] sm:$0xff] }
  0xc3   :  { %1827 = vmatprep.subr.bf16.mxu0 %v2134_v34  ;;  %1909 = vmatprep.subr.bf16.mxu1 %v2136_v35  ;;  %v214_v33 = vld [vmem:[%s3134_s1 + $0x638] sm:$0xff]  ;;  %v2189_v34 = vcombine.low %v201_v22, %v205_v23  ;;  %v2191_v35 = vcombine.low %v202_v24, %v206_v25  ;;  %v2246_v22 = vcombine.high %v257_v15, %v261_v16  ;;  %v265_v24 = vld [vmem:[%s3134_s1 + $0x7d0] sm:$0xff] }
  0xc4   :  { %v2200_v37 = vcombine.high %v210_v32, %v214_v33  ;;  %v269_v25 = vld [vmem:[%s3134_s1 + $0x7f0] sm:$0xff] }
  0xc5   :  { %1819 = vmatmul.mubr.bf16.vlgmr.msra.gmra.mrb[4].mxu0 %v2534_v21  ;;  %1901 = vmatmul.mubr.bf16.vlgmr.msra.gmra.mrb[4].mxu1 %v2534_v21  ;;  %v170_v21 = vld [vmem:[%s3134_s1 + $0x4d8] sm:$0xff] }
  0xc6   :  { %1828 = vmatpush1.bf16.msra.mxu0 %v2133_v40  ;;  %1910 = vmatpush1.bf16.msra.mxu1 %v2135_v41  ;;  %v2160_v60 = vcombine.high %v170_v21, %v174_v3  ;;  %v2159_v1 = vcombine.low %v170_v21, %v174_v3  ;;  %v218_v40 = vld [vmem:[%s3134_s1 + $0x658] sm:$0xff]  ;;  %v233_v21 = vld [vmem:[%s3134_s1 + $0x6d0] sm:$0xff] }
  0xc7   :  { %1829 = vmatprep.subr.bf16.mxu0 %v2142_v42  ;;  %1911 = vmatprep.subr.bf16.mxu1 %v2144_v43  ;;  %v222_v41 = vld [vmem:[%s3134_s1 + $0x678] sm:$0xff]  ;;  %v2197_v42 = vcombine.low %v209_v30, %v213_v31  ;;  %v2199_v43 = vcombine.low %v210_v32, %v214_v33  ;;  %v237_v3 = vld [vmem:[%s3134_s1 + $0x6f0] sm:$0xff]  ;;  %v2254_v30 = vcombine.high %v265_v24, %v269_v25 }
  0xc8   :  { %1859 = vmatprep.mubr.bf16.mxu0 %v2550_v28  ;;  %1941 = vmatprep.mubr.bf16.mxu1 %v2550_v28  ;;  %v178_v28 = vld [vmem:[%s3134_s1 + $0x518] sm:$0xff]  ;;  %v2208_v45 = vcombine.high %v218_v40, %v222_v41  ;;  %v2222_v61 = vcombine.high %v233_v21, %v237_v3  ;;  %v2253_v32 = vcombine.low %v265_v24, %v269_v25 }
  0xc9   :  { %v2168_v4 = vcombine.high %v178_v28, %v182_v63  ;;  %v2167_v10 = vcombine.low %v178_v28, %v182_v63  ;;  %v241_v28 = vld [vmem:[%s3134_s1 + $0x710] sm:$0xff] }
  0xca   :  { %1830 = vmatpush1.bf16.msra.mxu0 %v2141_v49  ;;  %1912 = vmatpush1.bf16.msra.mxu1 %v2143_v50  ;;  %v226_v49 = vld [vmem:[%s3134_s1 + $0x698] sm:$0xff]  ;;  %v245_v63 = vld [vmem:[%s3134_s1 + $0x730] sm:$0xff] }
  0xcb   :  { %1831 = vmatprep.subr.bf16.mxu0 %v2150_v51  ;;  %1913 = vmatprep.subr.bf16.mxu1 %v2152_v52  ;;  %v230_v50 = vld [vmem:[%s3134_s1 + $0x6b8] sm:$0xff]  ;;  %v2205_v51 = vcombine.low %v217_v38, %v221_v39  ;;  %v2207_v52 = vcombine.low %v218_v40, %v222_v41  ;;  %v2230_v5 = vcombine.high %v241_v28, %v245_v63  ;;  %v2284_v38 = vmov 1983009808  }
  0xcc   :  { %v2216_v54 = vcombine.high %v226_v49, %v230_v50  ;;  %v1961_v39 = vunpack.c.l.s4 %v2284_v38  ;;  %v287_v40 = vsub.s32 3, %v2377_v46 }
  0xce   :  { %1832 = vmatpush1.bf16.msra.mxu0 %v2149_v55  ;;  %1914 = vmatpush1.bf16.msra.mxu1 %v2151_v57  ;;  %v234_v55 = vld [vmem:[%s3134_s1 + $0x6d8] sm:$0xff] }
  0xcf   :  { %1833 = vmatprep.subr.bf16.mxu0 %v2158_v58  ;;  %1915 = vmatprep.subr.bf16.mxu1 %v2160_v60  ;;  %v238_v57 = vld [vmem:[%s3134_s1 + $0x6f8] sm:$0xff]  ;;  %v2213_v58 = vcombine.low %v225_v47, %v229_v48  ;;  %v2215_v60 = vcombine.low %v226_v49, %v230_v50 }
  0xd0   :  { %v2224_v62 = vcombine.high %v234_v55, %v238_v57 }
  0xd2   :  { %1834 = vmatpush1.bf16.msra.mxu0 %v2157_v0  ;;  %1916 = vmatpush1.bf16.msra.mxu1 %v2159_v1  ;;  %v242_v0 = vld [vmem:[%s3134_s1 + $0x718] sm:$0xff] }
  0xd3   :  { %1835 = vmatprep.subr.bf16.mxu0 %v2166_v2  ;;  %1917 = vmatprep.subr.bf16.mxu1 %v2168_v4  ;;  %v246_v1 = vld [vmem:[%s3134_s1 + $0x738] sm:$0xff]  ;;  %v2221_v2 = vcombine.low %v233_v21, %v237_v3  ;;  %v2223_v4 = vcombine.low %v234_v55, %v238_v57 }
  0xd4   :  { %v2232_v6 = vcombine.high %v242_v0, %v246_v1 }
  0xd6   :  { %1836 = vmatpush1.bf16.msra.mxu0 %v2165_v9  ;;  %1918 = vmatpush1.bf16.msra.mxu1 %v2167_v10  ;;  %v250_v9 = vld [vmem:[%s3134_s1 + $0x758] sm:$0xff] }
  0xd7   :  { %1837 = vmatprep.subr.bf16.mxu0 %v2174_v11  ;;  %1919 = vmatprep.subr.bf16.mxu1 %v2176_v12  ;;  %v254_v10 = vld [vmem:[%s3134_s1 + $0x778] sm:$0xff]  ;;  %v2229_v11 = vcombine.low %v241_v28, %v245_v63  ;;  %v2231_v12 = vcombine.low %v242_v0, %v246_v1  ;;  %v291_v63 = vsub.s32 4, %v2377_v46  ;;  %v299_v0 = vsub.s32 6, %v2377_v46 }
  0xd8   :  { %v2240_v14 = vcombine.high %v250_v9, %v254_v10  ;;  %v295_v1 = vsub.s32 5, %v2377_v46 }
  0xda   :  { %1838 = vmatpush1.bf16.msra.mxu0 %v2173_v17  ;;  %1920 = vmatpush1.bf16.msra.mxu1 %v2175_v18  ;;  %v258_v17 = vld [vmem:[%s3134_s1 + $0x798] sm:$0xff] }
  0xdb   :  { %1839 = vmatprep.subr.bf16.mxu0 %v2182_v19  ;;  %1921 = vmatprep.subr.bf16.mxu1 %v2184_v20  ;;  %v262_v18 = vld [vmem:[%s3134_s1 + $0x7b8] sm:$0xff]  ;;  %v2237_v19 = vcombine.low %v249_v7, %v253_v8  ;;  %v2239_v20 = vcombine.low %v250_v9, %v254_v10 }
  0xdc   :  { %v2248_v23 = vcombine.high %v258_v17, %v262_v18 }
  0xde   :  { %1840 = vmatpush1.bf16.msra.mxu0 %v2181_v26  ;;  %1922 = vmatpush1.bf16.msra.mxu1 %v2183_v27  ;;  %v266_v26 = vld [vmem:[%s3134_s1 + $0x7d8] sm:$0xff] }
  0xdf   :  { %1841 = vmatprep.subr.bf16.mxu0 %v2190_v56  ;;  %1923 = vmatprep.subr.bf16.mxu1 %v2192_v59  ;;  %v270_v27 = vld [vmem:[%s3134_s1 + $0x7f8] sm:$0xff]  ;;  %v2245_v56 = vcombine.low %v257_v15, %v261_v16  ;;  %v2247_v59 = vcombine.low %v258_v17, %v262_v18 }
  0xe0   :  { %v2256_v31 = vcombine.high %v266_v26, %v270_v27  ;;  %v2255_v33 = vcombine.low %v266_v26, %v270_v27 }
  0xe2   :  { %1842 = vmatpush1.bf16.msra.mxu0 %v2189_v34  ;;  %1924 = vmatpush1.bf16.msra.mxu1 %v2191_v35  ;;  %v275_v34 = vsub.s32 0, %v2377_v46  ;;  %v271_v35 = vld [vmem:[%s3136_s2] sm:$0xff] }
  0xe3   :  { %1843 = vmatprep.subr.bf16.mxu0 %v2198_v36  ;;  %1925 = vmatprep.subr.bf16.mxu1 %v2200_v37  ;;  %v283_v36 = vsub.s32 2, %v2377_v46  ;;  %v279_v37 = vsub.s32 1, %v2377_v46 }
  0xe4   :  { %v276_v41 = vrot.slane %v271_v35, %v275_v34 }
  0xe6   :  { %1844 = vmatpush1.bf16.msra.mxu0 %v2197_v42  ;;  %1926 = vmatpush1.bf16.msra.mxu1 %v2199_v43  ;;  %v284_v42 = vrot.slane %v271_v35, %v283_v36  ;;  %v280_v43 = vrot.slane %v271_v35, %v279_v37 }
  0xe7   :  { %1845 = vmatprep.subr.bf16.mxu0 %v2206_v44  ;;  %1927 = vmatprep.subr.bf16.mxu1 %v2208_v45  ;;  %v1962_v44 = vunpack.c.0.s8 %v1961_v39  ;;  %v288_v45 = vrot.slane %v271_v35, %v287_v40 }
  0xea   :  { %1846 = vmatpush1.bf16.msra.mxu0 %v2205_v51  ;;  %1928 = vmatpush1.bf16.msra.mxu1 %v2207_v52  ;;  %v1965_v52 = vsub.s32 %v1962_v44, %v2377_v46 }
  0xeb   :  { %1847 = vmatprep.subr.bf16.mxu0 %v2214_v53  ;;  %1929 = vmatprep.subr.bf16.mxu1 %v2216_v54 }
  0xee   :  { %1848 = vmatpush1.bf16.msra.mxu0 %v2213_v58  ;;  %1930 = vmatpush1.bf16.msra.mxu1 %v2215_v60 }
  0xef   :  { %1849 = vmatprep.subr.bf16.mxu0 %v2222_v61  ;;  %1931 = vmatprep.subr.bf16.mxu1 %v2224_v62 }
  0xf2   :  { %1850 = vmatpush1.bf16.msra.mxu0 %v2221_v2  ;;  %1932 = vmatpush1.bf16.msra.mxu1 %v2223_v4  ;;  %v303_v2 = vsub.s32 7, %v2377_v46  ;;  %v292_v4 = vrot.slane %v271_v35, %v291_v63 }
  0xf3   :  { %1851 = vmatprep.subr.bf16.mxu0 %v2230_v5  ;;  %1933 = vmatprep.subr.bf16.mxu1 %v2232_v6  ;;  %v300_v5 = vrot.slane %v271_v35, %v299_v0  ;;  %v296_v6 = vrot.slane %v271_v35, %v295_v1 }
  0xf4   :  { %v304_v7 = vrot.slane %v271_v35, %v303_v2 }
  0xf6   :  { %1852 = vmatpush1.bf16.msra.mxu0 %v2229_v11  ;;  %1934 = vmatpush1.bf16.msra.mxu1 %v2231_v12 }
  0xf7   :  { %1853 = vmatprep.subr.bf16.mxu0 %v2238_v13  ;;  %1935 = vmatprep.subr.bf16.mxu1 %v2240_v14 }
  0xfa   :  { %1854 = vmatpush1.bf16.msra.mxu0 %v2237_v19  ;;  %1936 = vmatpush1.bf16.msra.mxu1 %v2239_v20 }
  0xfb   :  { %1855 = vmatprep.subr.bf16.mxu0 %v2246_v22  ;;  %1937 = vmatprep.subr.bf16.mxu1 %v2248_v23 }
  0xfe   :  { %1856 = vmatpush1.bf16.msra.mxu0 %v2245_v56  ;;  %1938 = vmatpush1.bf16.msra.mxu1 %v2247_v59 }
  0xff   :  { %1857 = vmatprep.subr.bf16.mxu0 %v2254_v30  ;;  %1939 = vmatprep.subr.bf16.mxu1 %v2256_v31 }
 0x102   :  { %1858 = vmatpush1.bf16.msra.mxu0 %v2253_v32  ;;  %1940 = vmatpush1.bf16.msra.mxu1 %v2255_v33 }
 0x105   :  { %1860 = vmatmul.mubr.bf16.vlgmr.msra.gmra.mrb[4].mxu0 %v2738_v29  ;;  %1942 = vmatmul.mubr.bf16.vlgmr.msra.gmra.mrb[4].mxu1 %v2738_v29 }
 0x158   :  { %v1697_v29 = vpop.f32.mrb[0].mxu0  ;;  %v1779_v48 = vpop.f32.mrb[0].mxu1 }
 0x159   :  { %v2257_v47 = vadd.f32 %v1697_v29, %v276_v41  ;;  %v1699_v49 = vpop.f32.mrb[1].mxu0  ;;  %v2259_v50 = vadd.f32 %v1779_v48, %v284_v42  ;;  %v1781_v53 = vpop.f32.mrb[1].mxu1 }
 0x15a   :  { %v2258_v51 = vadd.f32 %v1699_v49, %v280_v43  ;;  %v1701_v54 = vpop.f32.mrb[2].mxu0  ;;  %v2260_v21 = vadd.f32 %v1781_v53, %v288_v45  ;;  %v1783_v3 = vpop.f32.mrb[2].mxu1 }
 0x15b   :  { %v1702_v55 = vpop.f32.mrb[3].mxu0  ;;  %v1784_v58 = vpop.f32.mrb[3].mxu1 }
 0x15c   :  { %v1958_v57 = vcombine.low %v2257_v47, %v2258_v51  ;;  %v1959_v60 = vcombine.low %v2259_v50, %v2260_v21 }
 0x15e   :  { %v1966_v61 = vrot.slane %v1958_v57, %v1965_v52  ;;  %v1973_v62 = vrot.slane %v1959_v60, %v1965_v52 }
 0x160   :  { %v1974_v28 = vcombine.low %v1966_v61, %v1973_v62 }
 0x162   :  { %1994 = vst [vmem:[%s3137_s3] sm:$0xff] %v1974_v28 }
 0x1d8   :  { %v1861_v8 = vpop.f32.mrb[4].mxu0  ;;  %v1943_v10 = vpop.f32.mrb[4].mxu1 }
 0x1d9   :  { %v2261_v9 = vadd.f32 %v1861_v8, %v292_v4  ;;  %v1863_v11 = vpop.f32.mrb[5].mxu0  ;;  %v2263_v12 = vadd.f32 %v1943_v10, %v300_v5  ;;  %v1945_v14 = vpop.f32.mrb[5].mxu1 }
 0x1da   :  { %v2262_v13 = vadd.f32 %v1863_v11, %v296_v6  ;;  %v1865_v15 = vpop.f32.mrb[6].mxu0  ;;  %v2264_v16 = vadd.f32 %v1945_v14, %v304_v7  ;;  %v1947_v17 = vpop.f32.mrb[6].mxu1 }
 0x1db   :  { %v1866_v18 = vpop.f32.mrb[7].mxu0  ;;  %v1948_v20 = vpop.f32.mrb[7].mxu1 }
 0x1dc   :  { %v1975_v19 = vcombine.low %v2261_v9, %v2262_v13  ;;  %v1976_v22 = vcombine.low %v2263_v12, %v2264_v16 }
 0x1de   :  { %v1983_v23 = vrot.slane %v1975_v19, %v1965_v52  ;;  %v1990_v46 = vrot.slane %v1976_v22, %v1965_v52 }
 0x1e0   :  { %v1991_v24 = vcombine.low %v1983_v23, %v1990_v46 }
 0x1e2   :  { %1995 = vst [vmem:[%s3137_s3 + $0x8] sm:$0xff] %v1991_v24 }

</bundles_post_ra>
